<compile_context>
chip_gen: v7x
topology: tpu7x:2x2x1
jax: 0.10.0
libtpu: 0.0.40
codegen_flags: <defaults>
</compile_context>

<pallas_src>
import jax
import jax.numpy as jnp
from jax.experimental import pallas as pl
from jax.experimental.pallas import tpu as pltpu

HIDDEN = 64
PROJ = 32
NUM_LAYERS = 3
OUTPUT = 2
OUT_PAD = 128   # lane-dense padded output width


def lstm_kernel(x_ref, w0_ref, b0_ref, whh0_ref,
                w1_ref, b1_ref, w2_ref, b2_ref,
                wfc_ref, bfc_ref,
                out_ref, g0_scratch):
    # x_ref: (T, B_pad, D_in) time-major, fully VMEM-resident.
    # g0_scratch: (T, B_pad, 4H) layer-0 input->hidden gates (+bias), filled
    #             by one batched matmul before the recurrence.
    # Gate order in all packed weights/biases here is [i, f, o, g].
    T, B, D_in = x_ref.shape
    H = HIDDEN

    # ---- Layer-0 input gates: one big (T*B, D_in) @ (D_in, 4H) matmul
    # (input Linear already folded into w0/b0 at trace time).
    x_flat = x_ref[...].reshape(T * B, D_in)
    g0 = jnp.dot(x_flat, w0_ref[...],
                 preferred_element_type=jnp.float32) + b0_ref[...]
    g0_scratch[...] = g0.reshape(T, B, 4 * H)

    def act_update(g, c):
        # 128-lane-aligned EUP launches: [0:2H) = i|f, [2H:4H) = o|g.
        sig_if = jax.nn.sigmoid(g[:, :2 * H])
        hi = g[:, 2 * H:]
        sig_hi = jax.nn.sigmoid(hi)
        tanh_hi = jnp.tanh(hi)
        i_g = sig_if[:, :H]
        f_g = sig_if[:, H:]
        o_g = sig_hi[:, :H]
        g_g = tanh_hi[:, H:]
        c_new = f_g * c + i_g * g_g
        h_new = o_g * jnp.tanh(c_new)
        return h_new, c_new

    zeros = jnp.zeros((B, H), jnp.float32)
    h0, c0 = zeros, zeros
    h1, c1 = zeros, zeros
    h2, c2 = zeros, zeros

    # Wavefront: step d runs layer0@t=d, layer1@t=d-1, layer2@t=d-2.
    # All matmuls in phase 1 use the OLD states, so they are independent.
    for d in range(T + 2):                      # fully unrolled (static T)
        l0 = d < T
        l1 = 1 <= d <= T
        l2 = 2 <= d <= T + 1

        # Phase 1: independent gate matmuls.
        if l0:
            gate0 = g0_scratch[d] + jnp.dot(
                h0, whh0_ref[...], preferred_element_type=jnp.float32)
        if l1:
            gate1 = jnp.dot(jnp.concatenate([h0, h1], axis=1), w1_ref[...],
                            preferred_element_type=jnp.float32) + b1_ref[...]
        if l2:
            gate2 = jnp.dot(jnp.concatenate([h1, h2], axis=1), w2_ref[...],
                            preferred_element_type=jnp.float32) + b2_ref[...]

        # Phase 2: elementwise state updates.
        if l0:
            h0, c0 = act_update(gate0, c0)
        if l1:
            h1, c1 = act_update(gate1, c1)
        if l2:
            h2, c2 = act_update(gate2, c2)

    # fc on the last timestep output of the top layer (lane-dense 128-wide).
    out_ref[...] = jnp.dot(h2, wfc_ref[...],
                           preferred_element_type=jnp.float32) + bfc_ref[...]


def _permute_gates(w):
    """PyTorch gate order [i, f, g, o] -> kernel order [i, f, o, g]."""
    H = HIDDEN
    return jnp.concatenate(
        [w[..., 0:H], w[..., H:2 * H], w[..., 3 * H:4 * H], w[..., 2 * H:3 * H]],
        axis=-1)


def lstm_forward(x, params):
    B, T, D_in = x.shape
    B_pad = max(8, ((B + 7) // 8) * 8)            # sublane-align the batch

    x_tm = jnp.transpose(x, (1, 0, 2))            # (T, B, D_in) time-major
    if B_pad != B:
        x_tm = jnp.pad(x_tm, ((0, 0), (0, B_pad - B), (0, 0)))

    # Permute gate columns to [i, f, o, g].
    w_ih0, w_hh0, b0 = (_permute_gates(params["w_ih0"]),
                        _permute_gates(params["w_hh0"]),
                        _permute_gates(params["b0"]))
    w_ih1, w_hh1, b1 = (_permute_gates(params["w_ih1"]),
                        _permute_gates(params["w_hh1"]),
                        _permute_gates(params["b1"]))
    w_ih2, w_hh2, b2 = (_permute_gates(params["w_ih2"]),
                        _permute_gates(params["w_hh2"]),
                        _permute_gates(params["b2"]))

    # Fold the input Linear into layer 0 (exact: composition of linear maps).
    w0_fold = params["w_lin"] @ w_ih0             # (D_in, 4H)
    b0_fold = params["b_lin"] @ w_ih0 + b0        # (1, 4H)

    # Fused input+recurrent weights for layers 1/2: [h_below, h_prev] @ W.
    w1_fused = jnp.concatenate([w_ih1, w_hh1], axis=0)   # (2H, 4H)
    w2_fused = jnp.concatenate([w_ih2, w_hh2], axis=0)   # (2H, 4H)

    # Lane-dense padded fc weights (output stored 128-wide, sliced outside).
    w_fc_pad = jnp.pad(params["w_fc"], ((0, 0), (0, OUT_PAD - OUTPUT)))
    b_fc_pad = jnp.pad(params["b_fc"], ((0, 0), (0, OUT_PAD - OUTPUT)))

    args = (x_tm, w0_fold, b0_fold, w_hh0,
            w1_fused, b1,
            w2_fused, b2,
            w_fc_pad, b_fc_pad)

    vmem = pl.BlockSpec(memory_space=pltpu.MemorySpace.VMEM)
    out = pl.pallas_call(
        lstm_kernel,
        out_shape=jax.ShapeDtypeStruct((B_pad, OUT_PAD), jnp.float32),
        in_specs=[vmem] * len(args),
        out_specs=vmem,
        scratch_shapes=[pltpu.VMEM((T, B_pad, 4 * HIDDEN), jnp.float32)],
    )(*args)
    return out[:B, :OUTPUT]


def lstm_forward_ref(x, params):
    """Pure-JAX reference with PyTorch semantics (for correctness check)."""
    B, T, _ = x.shape
    inp_seq = jnp.einsum("btd,dp->btp", x, params["w_lin"]) + params["b_lin"]
    layer_params = [(params["w_ih0"], params["w_hh0"], params["b0"]),
                    (params["w_ih1"], params["w_hh1"], params["b1"]),
                    (params["w_ih2"], params["w_hh2"], params["b2"])]
    seq = inp_seq
    for w_ih, w_hh, b in layer_params:
        h = jnp.zeros((B, HIDDEN), jnp.float32)
        c = jnp.zeros((B, HIDDEN), jnp.float32)
        outs = []
        for t in range(T):
            gates = seq[:, t, :] @ w_ih + h @ w_hh + b
            i_g = jax.nn.sigmoid(gates[:, 0 * HIDDEN:1 * HIDDEN])
            f_g = jax.nn.sigmoid(gates[:, 1 * HIDDEN:2 * HIDDEN])
            g_g = jnp.tanh(gates[:, 2 * HIDDEN:3 * HIDDEN])
            o_g = jax.nn.sigmoid(gates[:, 3 * HIDDEN:4 * HIDDEN])
            c = f_g * c + i_g * g_g
            h = o_g * jnp.tanh(c)
            outs.append(h)
        seq = jnp.stack(outs, axis=1)
    return seq[:, -1, :] @ params["w_fc"] + params["b_fc"]


def init_params(key, input_size):
    ks = jax.random.split(key, 16)

    def u(k, shape, scale):
        return jax.random.uniform(k, shape, jnp.float32, -scale, scale)

    s_lin = 1.0 / jnp.sqrt(input_size)
    s_h = 1.0 / jnp.sqrt(HIDDEN)
    s_fc = 1.0 / jnp.sqrt(HIDDEN)
    params = {
        # Linear(input_size, 32): stored as (in, out); bias kept 2-D (1, out)
        "w_lin": u(ks[0], (input_size, PROJ), s_lin),
        "b_lin": u(ks[1], (1, PROJ), s_lin),
        # LSTM layer 0 (input dim 32); PyTorch gate order i,f,g,o
        "w_ih0": u(ks[2], (PROJ, 4 * HIDDEN), s_h),
        "w_hh0": u(ks[3], (HIDDEN, 4 * HIDDEN), s_h),
        "b0":    u(ks[4], (1, 4 * HIDDEN), s_h),   # b_ih + b_hh folded together
        # LSTM layer 1
        "w_ih1": u(ks[5], (HIDDEN, 4 * HIDDEN), s_h),
        "w_hh1": u(ks[6], (HIDDEN, 4 * HIDDEN), s_h),
        "b1":    u(ks[7], (1, 4 * HIDDEN), s_h),
        # LSTM layer 2
        "w_ih2": u(ks[8], (HIDDEN, 4 * HIDDEN), s_h),
        "w_hh2": u(ks[9], (HIDDEN, 4 * HIDDEN), s_h),
        "b2":    u(ks[10], (1, 4 * HIDDEN), s_h),
        # fc: Linear(64, 2)
        "w_fc":  u(ks[11], (HIDDEN, OUTPUT), s_fc),
        "b_fc":  u(ks[12], (1, OUTPUT), s_fc),
    }
    return params


if __name__ == "__main__":
    key = jax.random.PRNGKey(0)
    k_x, k_p = jax.random.split(key)

    B, T, D_IN = 4, 8, 8          # small shapes: batch=4, seq=8, input_size=8
    x = jax.random.normal(k_x, (B, T, D_IN), jnp.float32)
    params = init_params(k_p, D_IN)

    out = jax.block_until_ready(lstm_forward(x, params))
    ref = jax.block_until_ready(lstm_forward_ref(x, params))

    assert out.shape == (B, OUTPUT)
    assert jnp.allclose(out, ref, atol=2e-4, rtol=2e-4), (out, ref)
    print("KERNEL_OK")
</pallas_src>

<mosaic_0001>
module attributes {stable_mosaic.version = 11 : i64} {
  func.func @lstm_kernel(%arg0: memref<8x8x8xf32, #tpu.memory_space<vmem>>, %arg1: memref<8x256xf32, #tpu.memory_space<vmem>>, %arg2: memref<1x256xf32, #tpu.memory_space<vmem>>, %arg3: memref<64x256xf32, #tpu.memory_space<vmem>>, %arg4: memref<128x256xf32, #tpu.memory_space<vmem>>, %arg5: memref<1x256xf32, #tpu.memory_space<vmem>>, %arg6: memref<128x256xf32, #tpu.memory_space<vmem>>, %arg7: memref<1x256xf32, #tpu.memory_space<vmem>>, %arg8: memref<64x128xf32, #tpu.memory_space<vmem>>, %arg9: memref<1x128xf32, #tpu.memory_space<vmem>>, %arg10: memref<8x128xf32, #tpu.memory_space<vmem>>, %arg11: memref<8x8x256xf32, #tpu.memory_space<vmem>>) attributes {dimension_semantics = [], scalar_prefetch = 0 : i64, scratch_operands = 1 : i64, tpu.core_type = #tpu.core_type<tc>} {
    %c0 = arith.constant 0 : index
    %c0_0 = arith.constant 0 : index
    %c0_1 = arith.constant 0 : index
    %0 = vector.load %arg0[%c0, %c0_0, %c0_1] : memref<8x8x8xf32, #tpu.memory_space<vmem>>, vector<8x8x8xf32>
    %1 = vector.shape_cast %0 : vector<8x8x8xf32> to vector<64x8xf32>
    %c0_2 = arith.constant 0 : index
    %c0_3 = arith.constant 0 : index
    %2 = vector.load %arg1[%c0_2, %c0_3] : memref<8x256xf32, #tpu.memory_space<vmem>>, vector<8x256xf32>
    %cst = arith.constant dense<0.000000e+00> : vector<64x256xf32>
    %3 = tpu.matmul %1, %2, %cst {dimension_numbers = #tpu.dot_dimension_numbers<[1], [0], [0], [1], [0, 0, 1, 1], [], []>} : vector<64x8xf32>, vector<8x256xf32>, vector<64x256xf32> -> vector<64x256xf32>
    %c0_4 = arith.constant 0 : index
    %c0_5 = arith.constant 0 : index
    %4 = vector.load %arg2[%c0_4, %c0_5] : memref<1x256xf32, #tpu.memory_space<vmem>>, vector<1x256xf32>
    %5 = vector.broadcast %4 : vector<1x256xf32> to vector<64x256xf32>
    %6 = arith.addf %3, %5 : vector<64x256xf32>
    %7 = vector.shape_cast %6 : vector<64x256xf32> to vector<8x8x256xf32>
    %c0_6 = arith.constant 0 : index
    %c0_7 = arith.constant 0 : index
    %c0_8 = arith.constant 0 : index
    %8 = vector.load %arg11[%c0_6, %c0_7, %c0_8] : memref<8x8x256xf32, #tpu.memory_space<vmem>>, vector<8x8x256xf32>
    tpu.vector_store %arg11[%c0_6, %c0_7, %c0_8], %7 {strides = array<i32>} : memref<8x8x256xf32, #tpu.memory_space<vmem>>, vector<8x8x256xf32>,
    %cst_9 = arith.constant 0.000000e+00 : f32
    %9 = vector.broadcast %cst_9 : f32 to vector<8x64xf32>
    %c0_10 = arith.constant 0 : index
    %c0_11 = arith.constant 0 : index
    %c0_12 = arith.constant 0 : index
    %10 = vector.load %arg11[%c0_10, %c0_11, %c0_12] : memref<8x8x256xf32, #tpu.memory_space<vmem>>, vector<1x8x256xf32>
    %11 = vector.shape_cast %10 : vector<1x8x256xf32> to vector<8x256xf32>
    %c0_13 = arith.constant 0 : index
    %c0_14 = arith.constant 0 : index
    %12 = vector.load %arg3[%c0_13, %c0_14] : memref<64x256xf32, #tpu.memory_space<vmem>>, vector<64x256xf32>
    %cst_15 = arith.constant dense<0.000000e+00> : vector<8x256xf32>
    %13 = tpu.matmul %9, %12, %cst_15 {dimension_numbers = #tpu.dot_dimension_numbers<[1], [0], [0], [1], [0, 0, 1, 1], [], []>} : vector<8x64xf32>, vector<64x256xf32>, vector<8x256xf32> -> vector<8x256xf32>
    %14 = arith.addf %11, %13 : vector<8x256xf32>
    %15 = vector.extract_strided_slice %14 {offsets = [0, 0], sizes = [8, 128], strides = [1, 1]} : vector<8x256xf32> to vector<8x128xf32>
    %16 = arith.negf %15 : vector<8x128xf32>
    %17 = math.exp %16 : vector<8x128xf32>
    %cst_16 = arith.constant 1.000000e+00 : f32
    %18 = vector.broadcast %cst_16 : f32 to vector<8x128xf32>
    %19 = arith.addf %18, %17 : vector<8x128xf32>
    %20 = arith.divf %18, %19 : vector<8x128xf32>
    %21 = vector.extract_strided_slice %14 {offsets = [0, 128], sizes = [8, 128], strides = [1, 1]} : vector<8x256xf32> to vector<8x128xf32>
    %22 = arith.negf %21 : vector<8x128xf32>
    %23 = math.exp %22 : vector<8x128xf32>
    %cst_17 = arith.constant 1.000000e+00 : f32
    %24 = vector.broadcast %cst_17 : f32 to vector<8x128xf32>
    %25 = arith.addf %24, %23 : vector<8x128xf32>
    %26 = arith.divf %24, %25 : vector<8x128xf32>
    %27 = math.tanh %21 : vector<8x128xf32>
    %28 = vector.extract_strided_slice %20 {offsets = [0, 0], sizes = [8, 64], strides = [1, 1]} : vector<8x128xf32> to vector<8x64xf32>
    %29 = vector.extract_strided_slice %20 {offsets = [0, 64], sizes = [8, 64], strides = [1, 1]} : vector<8x128xf32> to vector<8x64xf32>
    %30 = vector.extract_strided_slice %26 {offsets = [0, 0], sizes = [8, 64], strides = [1, 1]} : vector<8x128xf32> to vector<8x64xf32>
    %31 = vector.extract_strided_slice %27 {offsets = [0, 64], sizes = [8, 64], strides = [1, 1]} : vector<8x128xf32> to vector<8x64xf32>
    %32 = arith.mulf %29, %9 : vector<8x64xf32>
    %33 = arith.mulf %28, %31 : vector<8x64xf32>
    %34 = arith.addf %32, %33 : vector<8x64xf32>
    %35 = math.tanh %34 : vector<8x64xf32>
    %36 = arith.mulf %30, %35 : vector<8x64xf32>
    %c1 = arith.constant 1 : index
    %c0_18 = arith.constant 0 : index
    %c0_19 = arith.constant 0 : index
    %37 = vector.load %arg11[%c1, %c0_18, %c0_19] : memref<8x8x256xf32, #tpu.memory_space<vmem>>, vector<1x8x256xf32>
    %38 = vector.shape_cast %37 : vector<1x8x256xf32> to vector<8x256xf32>
    %c0_20 = arith.constant 0 : index
    %c0_21 = arith.constant 0 : index
    %39 = vector.load %arg3[%c0_20, %c0_21] : memref<64x256xf32, #tpu.memory_space<vmem>>, vector<64x256xf32>
    %cst_22 = arith.constant dense<0.000000e+00> : vector<8x256xf32>
    %40 = tpu.matmul %36, %39, %cst_22 {dimension_numbers = #tpu.dot_dimension_numbers<[1], [0], [0], [1], [0, 0, 1, 1], [], []>} : vector<8x64xf32>, vector<64x256xf32>, vector<8x256xf32> -> vector<8x256xf32>
    %41 = arith.addf %38, %40 : vector<8x256xf32>
    %42 = tpu.concatenate %36, %9 in 1 : vector<8x64xf32>, vector<8x64xf32> -> vector<8x128xf32>
    %c0_23 = arith.constant 0 : index
    %c0_24 = arith.constant 0 : index
    %43 = vector.load %arg4[%c0_23, %c0_24] : memref<128x256xf32, #tpu.memory_space<vmem>>, vector<128x256xf32>
    %cst_25 = arith.constant dense<0.000000e+00> : vector<8x256xf32>
    %44 = tpu.matmul %42, %43, %cst_25 {dimension_numbers = #tpu.dot_dimension_numbers<[1], [0], [0], [1], [0, 0, 1, 1], [], []>} : vector<8x128xf32>, vector<128x256xf32>, vector<8x256xf32> -> vector<8x256xf32>
    %c0_26 = arith.constant 0 : index
    %c0_27 = arith.constant 0 : index
    %45 = vector.load %arg5[%c0_26, %c0_27] : memref<1x256xf32, #tpu.memory_space<vmem>>, vector<1x256xf32>
    %46 = vector.broadcast %45 : vector<1x256xf32> to vector<8x256xf32>
    %47 = arith.addf %44, %46 : vector<8x256xf32>
    %48 = vector.extract_strided_slice %41 {offsets = [0, 0], sizes = [8, 128], strides = [1, 1]} : vector<8x256xf32> to vector<8x128xf32>
    %49 = arith.negf %48 : vector<8x128xf32>
    %50 = math.exp %49 : vector<8x128xf32>
    %cst_28 = arith.constant 1.000000e+00 : f32
    %51 = vector.broadcast %cst_28 : f32 to vector<8x128xf32>
    %52 = arith.addf %51, %50 : vector<8x128xf32>
    %53 = arith.divf %51, %52 : vector<8x128xf32>
    %54 = vector.extract_strided_slice %41 {offsets = [0, 128], sizes = [8, 128], strides = [1, 1]} : vector<8x256xf32> to vector<8x128xf32>
    %55 = arith.negf %54 : vector<8x128xf32>
    %56 = math.exp %55 : vector<8x128xf32>
    %cst_29 = arith.constant 1.000000e+00 : f32
    %57 = vector.broadcast %cst_29 : f32 to vector<8x128xf32>
    %58 = arith.addf %57, %56 : vector<8x128xf32>
    %59 = arith.divf %57, %58 : vector<8x128xf32>
    %60 = math.tanh %54 : vector<8x128xf32>
    %61 = vector.extract_strided_slice %53 {offsets = [0, 0], sizes = [8, 64], strides = [1, 1]} : vector<8x128xf32> to vector<8x64xf32>
    %62 = vector.extract_strided_slice %53 {offsets = [0, 64], sizes = [8, 64], strides = [1, 1]} : vector<8x128xf32> to vector<8x64xf32>
    %63 = vector.extract_strided_slice %59 {offsets = [0, 0], sizes = [8, 64], strides = [1, 1]} : vector<8x128xf32> to vector<8x64xf32>
    %64 = vector.extract_strided_slice %60 {offsets = [0, 64], sizes = [8, 64], strides = [1, 1]} : vector<8x128xf32> to vector<8x64xf32>
    %65 = arith.mulf %62, %34 : vector<8x64xf32>
    %66 = arith.mulf %61, %64 : vector<8x64xf32>
    %67 = arith.addf %65, %66 : vector<8x64xf32>
    %68 = math.tanh %67 : vector<8x64xf32>
    %69 = arith.mulf %63, %68 : vector<8x64xf32>
    %70 = vector.extract_strided_slice %47 {offsets = [0, 0], sizes = [8, 128], strides = [1, 1]} : vector<8x256xf32> to vector<8x128xf32>
    %71 = arith.negf %70 : vector<8x128xf32>
    %72 = math.exp %71 : vector<8x128xf32>
    %cst_30 = arith.constant 1.000000e+00 : f32
    %73 = vector.broadcast %cst_30 : f32 to vector<8x128xf32>
    %74 = arith.addf %73, %72 : vector<8x128xf32>
    %75 = arith.divf %73, %74 : vector<8x128xf32>
    %76 = vector.extract_strided_slice %47 {offsets = [0, 128], sizes = [8, 128], strides = [1, 1]} : vector<8x256xf32> to vector<8x128xf32>
    %77 = arith.negf %76 : vector<8x128xf32>
    %78 = math.exp %77 : vector<8x128xf32>
    %cst_31 = arith.constant 1.000000e+00 : f32
    %79 = vector.broadcast %cst_31 : f32 to vector<8x128xf32>
    %80 = arith.addf %79, %78 : vector<8x128xf32>
    %81 = arith.divf %79, %80 : vector<8x128xf32>
    %82 = math.tanh %76 : vector<8x128xf32>
    %83 = vector.extract_strided_slice %75 {offsets = [0, 0], sizes = [8, 64], strides = [1, 1]} : vector<8x128xf32> to vector<8x64xf32>
    %84 = vector.extract_strided_slice %75 {offsets = [0, 64], sizes = [8, 64], strides = [1, 1]} : vector<8x128xf32> to vector<8x64xf32>
    %85 = vector.extract_strided_slice %81 {offsets = [0, 0], sizes = [8, 64], strides = [1, 1]} : vector<8x128xf32> to vector<8x64xf32>
    %86 = vector.extract_strided_slice %82 {offsets = [0, 64], sizes = [8, 64], strides = [1, 1]} : vector<8x128xf32> to vector<8x64xf32>
    %87 = arith.mulf %84, %9 : vector<8x64xf32>
    %88 = arith.mulf %83, %86 : vector<8x64xf32>
    %89 = arith.addf %87, %88 : vector<8x64xf32>
    %90 = math.tanh %89 : vector<8x64xf32>
    %91 = arith.mulf %85, %90 : vector<8x64xf32>
    %c2 = arith.constant 2 : index
    %c0_32 = arith.constant 0 : index
    %c0_33 = arith.constant 0 : index
    %92 = vector.load %arg11[%c2, %c0_32, %c0_33] : memref<8x8x256xf32, #tpu.memory_space<vmem>>, vector<1x8x256xf32>
    %93 = vector.shape_cast %92 : vector<1x8x256xf32> to vector<8x256xf32>
    %c0_34 = arith.constant 0 : index
    %c0_35 = arith.constant 0 : index
    %94 = vector.load %arg3[%c0_34, %c0_35] : memref<64x256xf32, #tpu.memory_space<vmem>>, vector<64x256xf32>
    %cst_36 = arith.constant dense<0.000000e+00> : vector<8x256xf32>
    %95 = tpu.matmul %69, %94, %cst_36 {dimension_numbers = #tpu.dot_dimension_numbers<[1], [0], [0], [1], [0, 0, 1, 1], [], []>} : vector<8x64xf32>, vector<64x256xf32>, vector<8x256xf32> -> vector<8x256xf32>
    %96 = arith.addf %93, %95 : vector<8x256xf32>
    %97 = tpu.concatenate %69, %91 in 1 : vector<8x64xf32>, vector<8x64xf32> -> vector<8x128xf32>
    %c0_37 = arith.constant 0 : index
    %c0_38 = arith.constant 0 : index
    %98 = vector.load %arg4[%c0_37, %c0_38] : memref<128x256xf32, #tpu.memory_space<vmem>>, vector<128x256xf32>
    %cst_39 = arith.constant dense<0.000000e+00> : vector<8x256xf32>
    %99 = tpu.matmul %97, %98, %cst_39 {dimension_numbers = #tpu.dot_dimension_numbers<[1], [0], [0], [1], [0, 0, 1, 1], [], []>} : vector<8x128xf32>, vector<128x256xf32>, vector<8x256xf32> -> vector<8x256xf32>
    %c0_40 = arith.constant 0 : index
    %c0_41 = arith.constant 0 : index
    %100 = vector.load %arg5[%c0_40, %c0_41] : memref<1x256xf32, #tpu.memory_space<vmem>>, vector<1x256xf32>
    %101 = vector.broadcast %100 : vector<1x256xf32> to vector<8x256xf32>
    %102 = arith.addf %99, %101 : vector<8x256xf32>
    %103 = tpu.concatenate %91, %9 in 1 : vector<8x64xf32>, vector<8x64xf32> -> vector<8x128xf32>
    %c0_42 = arith.constant 0 : index
    %c0_43 = arith.constant 0 : index
    %104 = vector.load %arg6[%c0_42, %c0_43] : memref<128x256xf32, #tpu.memory_space<vmem>>, vector<128x256xf32>
    %cst_44 = arith.constant dense<0.000000e+00> : vector<8x256xf32>
    %105 = tpu.matmul %103, %104, %cst_44 {dimension_numbers = #tpu.dot_dimension_numbers<[1], [0], [0], [1], [0, 0, 1, 1], [], []>} : vector<8x128xf32>, vector<128x256xf32>, vector<8x256xf32> -> vector<8x256xf32>
    %c0_45 = arith.constant 0 : index
    %c0_46 = arith.constant 0 : index
    %106 = vector.load %arg7[%c0_45, %c0_46] : memref<1x256xf32, #tpu.memory_space<vmem>>, vector<1x256xf32>
    %107 = vector.broadcast %106 : vector<1x256xf32> to vector<8x256xf32>
    %108 = arith.addf %105, %107 : vector<8x256xf32>
    %109 = vector.extract_strided_slice %96 {offsets = [0, 0], sizes = [8, 128], strides = [1, 1]} : vector<8x256xf32> to vector<8x128xf32>
    %110 = arith.negf %109 : vector<8x128xf32>
    %111 = math.exp %110 : vector<8x128xf32>
    %cst_47 = arith.constant 1.000000e+00 : f32
    %112 = vector.broadcast %cst_47 : f32 to vector<8x128xf32>
    %113 = arith.addf %112, %111 : vector<8x128xf32>
    %114 = arith.divf %112, %113 : vector<8x128xf32>
    %115 = vector.extract_strided_slice %96 {offsets = [0, 128], sizes = [8, 128], strides = [1, 1]} : vector<8x256xf32> to vector<8x128xf32>
    %116 = arith.negf %115 : vector<8x128xf32>
    %117 = math.exp %116 : vector<8x128xf32>
    %cst_48 = arith.constant 1.000000e+00 : f32
    %118 = vector.broadcast %cst_48 : f32 to vector<8x128xf32>
    %119 = arith.addf %118, %117 : vector<8x128xf32>
    %120 = arith.divf %118, %119 : vector<8x128xf32>
    %121 = math.tanh %115 : vector<8x128xf32>
    %122 = vector.extract_strided_slice %114 {offsets = [0, 0], sizes = [8, 64], strides = [1, 1]} : vector<8x128xf32> to vector<8x64xf32>
    %123 = vector.extract_strided_slice %114 {offsets = [0, 64], sizes = [8, 64], strides = [1, 1]} : vector<8x128xf32> to vector<8x64xf32>
    %124 = vector.extract_strided_slice %120 {offsets = [0, 0], sizes = [8, 64], strides = [1, 1]} : vector<8x128xf32> to vector<8x64xf32>
    %125 = vector.extract_strided_slice %121 {offsets = [0, 64], sizes = [8, 64], strides = [1, 1]} : vector<8x128xf32> to vector<8x64xf32>
    %126 = arith.mulf %123, %67 : vector<8x64xf32>
    %127 = arith.mulf %122, %125 : vector<8x64xf32>
    %128 = arith.addf %126, %127 : vector<8x64xf32>
    %129 = math.tanh %128 : vector<8x64xf32>
    %130 = arith.mulf %124, %129 : vector<8x64xf32>
    %131 = vector.extract_strided_slice %102 {offsets = [0, 0], sizes = [8, 128], strides = [1, 1]} : vector<8x256xf32> to vector<8x128xf32>
    %132 = arith.negf %131 : vector<8x128xf32>
    %133 = math.exp %132 : vector<8x128xf32>
    %cst_49 = arith.constant 1.000000e+00 : f32
    %134 = vector.broadcast %cst_49 : f32 to vector<8x128xf32>
    %135 = arith.addf %134, %133 : vector<8x128xf32>
    %136 = arith.divf %134, %135 : vector<8x128xf32>
    %137 = vector.extract_strided_slice %102 {offsets = [0, 128], sizes = [8, 128], strides = [1, 1]} : vector<8x256xf32> to vector<8x128xf32>
    %138 = arith.negf %137 : vector<8x128xf32>
    %139 = math.exp %138 : vector<8x128xf32>
    %cst_50 = arith.constant 1.000000e+00 : f32
    %140 = vector.broadcast %cst_50 : f32 to vector<8x128xf32>
    %141 = arith.addf %140, %139 : vector<8x128xf32>
    %142 = arith.divf %140, %141 : vector<8x128xf32>
    %143 = math.tanh %137 : vector<8x128xf32>
    %144 = vector.extract_strided_slice %136 {offsets = [0, 0], sizes = [8, 64], strides = [1, 1]} : vector<8x128xf32> to vector<8x64xf32>
    %145 = vector.extract_strided_slice %136 {offsets = [0, 64], sizes = [8, 64], strides = [1, 1]} : vector<8x128xf32> to vector<8x64xf32>
    %146 = vector.extract_strided_slice %142 {offsets = [0, 0], sizes = [8, 64], strides = [1, 1]} : vector<8x128xf32> to vector<8x64xf32>
    %147 = vector.extract_strided_slice %143 {offsets = [0, 64], sizes = [8, 64], strides = [1, 1]} : vector<8x128xf32> to vector<8x64xf32>
    %148 = arith.mulf %145, %89 : vector<8x64xf32>
    %149 = arith.mulf %144, %147 : vector<8x64xf32>
    %150 = arith.addf %148, %149 : vector<8x64xf32>
    %151 = math.tanh %150 : vector<8x64xf32>
    %152 = arith.mulf %146, %151 : vector<8x64xf32>
    %153 = vector.extract_strided_slice %108 {offsets = [0, 0], sizes = [8, 128], strides = [1, 1]} : vector<8x256xf32> to vector<8x128xf32>
    %154 = arith.negf %153 : vector<8x128xf32>
    %155 = math.exp %154 : vector<8x128xf32>
    %cst_51 = arith.constant 1.000000e+00 : f32
    %156 = vector.broadcast %cst_51 : f32 to vector<8x128xf32>
    %157 = arith.addf %156, %155 : vector<8x128xf32>
    %158 = arith.divf %156, %157 : vector<8x128xf32>
    %159 = vector.extract_strided_slice %108 {offsets = [0, 128], sizes = [8, 128], strides = [1, 1]} : vector<8x256xf32> to vector<8x128xf32>
    %160 = arith.negf %159 : vector<8x128xf32>
    %161 = math.exp %160 : vector<8x128xf32>
    %cst_52 = arith.constant 1.000000e+00 : f32
    %162 = vector.broadcast %cst_52 : f32 to vector<8x128xf32>
    %163 = arith.addf %162, %161 : vector<8x128xf32>
    %164 = arith.divf %162, %163 : vector<8x128xf32>
    %165 = math.tanh %159 : vector<8x128xf32>
    %166 = vector.extract_strided_slice %158 {offsets = [0, 0], sizes = [8, 64], strides = [1, 1]} : vector<8x128xf32> to vector<8x64xf32>
    %167 = vector.extract_strided_slice %158 {offsets = [0, 64], sizes = [8, 64], strides = [1, 1]} : vector<8x128xf32> to vector<8x64xf32>
    %168 = vector.extract_strided_slice %164 {offsets = [0, 0], sizes = [8, 64], strides = [1, 1]} : vector<8x128xf32> to vector<8x64xf32>
    %169 = vector.extract_strided_slice %165 {offsets = [0, 64], sizes = [8, 64], strides = [1, 1]} : vector<8x128xf32> to vector<8x64xf32>
    %170 = arith.mulf %167, %9 : vector<8x64xf32>
    %171 = arith.mulf %166, %169 : vector<8x64xf32>
    %172 = arith.addf %170, %171 : vector<8x64xf32>
    %173 = math.tanh %172 : vector<8x64xf32>
    %174 = arith.mulf %168, %173 : vector<8x64xf32>
    %c3 = arith.constant 3 : index
    %c0_53 = arith.constant 0 : index
    %c0_54 = arith.constant 0 : index
    %175 = vector.load %arg11[%c3, %c0_53, %c0_54] : memref<8x8x256xf32, #tpu.memory_space<vmem>>, vector<1x8x256xf32>
    %176 = vector.shape_cast %175 : vector<1x8x256xf32> to vector<8x256xf32>
    %c0_55 = arith.constant 0 : index
    %c0_56 = arith.constant 0 : index
    %177 = vector.load %arg3[%c0_55, %c0_56] : memref<64x256xf32, #tpu.memory_space<vmem>>, vector<64x256xf32>
    %cst_57 = arith.constant dense<0.000000e+00> : vector<8x256xf32>
    %178 = tpu.matmul %130, %177, %cst_57 {dimension_numbers = #tpu.dot_dimension_numbers<[1], [0], [0], [1], [0, 0, 1, 1], [], []>} : vector<8x64xf32>, vector<64x256xf32>, vector<8x256xf32> -> vector<8x256xf32>
    %179 = arith.addf %176, %178 : vector<8x256xf32>
    %180 = tpu.concatenate %130, %152 in 1 : vector<8x64xf32>, vector<8x64xf32> -> vector<8x128xf32>
    %c0_58 = arith.constant 0 : index
    %c0_59 = arith.constant 0 : index
    %181 = vector.load %arg4[%c0_58, %c0_59] : memref<128x256xf32, #tpu.memory_space<vmem>>, vector<128x256xf32>
    %cst_60 = arith.constant dense<0.000000e+00> : vector<8x256xf32>
    %182 = tpu.matmul %180, %181, %cst_60 {dimension_numbers = #tpu.dot_dimension_numbers<[1], [0], [0], [1], [0, 0, 1, 1], [], []>} : vector<8x128xf32>, vector<128x256xf32>, vector<8x256xf32> -> vector<8x256xf32>
    %c0_61 = arith.constant 0 : index
    %c0_62 = arith.constant 0 : index
    %183 = vector.load %arg5[%c0_61, %c0_62] : memref<1x256xf32, #tpu.memory_space<vmem>>, vector<1x256xf32>
    %184 = vector.broadcast %183 : vector<1x256xf32> to vector<8x256xf32>
    %185 = arith.addf %182, %184 : vector<8x256xf32>
    %186 = tpu.concatenate %152, %174 in 1 : vector<8x64xf32>, vector<8x64xf32> -> vector<8x128xf32>
    %c0_63 = arith.constant 0 : index
    %c0_64 = arith.constant 0 : index
    %187 = vector.load %arg6[%c0_63, %c0_64] : memref<128x256xf32, #tpu.memory_space<vmem>>, vector<128x256xf32>
    %cst_65 = arith.constant dense<0.000000e+00> : vector<8x256xf32>
    %188 = tpu.matmul %186, %187, %cst_65 {dimension_numbers = #tpu.dot_dimension_numbers<[1], [0], [0], [1], [0, 0, 1, 1], [], []>} : vector<8x128xf32>, vector<128x256xf32>, vector<8x256xf32> -> vector<8x256xf32>
    %c0_66 = arith.constant 0 : index
    %c0_67 = arith.constant 0 : index
    %189 = vector.load %arg7[%c0_66, %c0_67] : memref<1x256xf32, #tpu.memory_space<vmem>>, vector<1x256xf32>
    %190 = vector.broadcast %189 : vector<1x256xf32> to vector<8x256xf32>
    %191 = arith.addf %188, %190 : vector<8x256xf32>
    %192 = vector.extract_strided_slice %179 {offsets = [0, 0], sizes = [8, 128], strides = [1, 1]} : vector<8x256xf32> to vector<8x128xf32>
    %193 = arith.negf %192 : vector<8x128xf32>
    %194 = math.exp %193 : vector<8x128xf32>
    %cst_68 = arith.constant 1.000000e+00 : f32
    %195 = vector.broadcast %cst_68 : f32 to vector<8x128xf32>
    %196 = arith.addf %195, %194 : vector<8x128xf32>
    %197 = arith.divf %195, %196 : vector<8x128xf32>
    %198 = vector.extract_strided_slice %179 {offsets = [0, 128], sizes = [8, 128], strides = [1, 1]} : vector<8x256xf32> to vector<8x128xf32>
    %199 = arith.negf %198 : vector<8x128xf32>
    %200 = math.exp %199 : vector<8x128xf32>
    %cst_69 = arith.constant 1.000000e+00 : f32
    %201 = vector.broadcast %cst_69 : f32 to vector<8x128xf32>
    %202 = arith.addf %201, %200 : vector<8x128xf32>
    %203 = arith.divf %201, %202 : vector<8x128xf32>
    %204 = math.tanh %198 : vector<8x128xf32>
    %205 = vector.extract_strided_slice %197 {offsets = [0, 0], sizes = [8, 64], strides = [1, 1]} : vector<8x128xf32> to vector<8x64xf32>
    %206 = vector.extract_strided_slice %197 {offsets = [0, 64], sizes = [8, 64], strides = [1, 1]} : vector<8x128xf32> to vector<8x64xf32>
    %207 = vector.extract_strided_slice %203 {offsets = [0, 0], sizes = [8, 64], strides = [1, 1]} : vector<8x128xf32> to vector<8x64xf32>
    %208 = vector.extract_strided_slice %204 {offsets = [0, 64], sizes = [8, 64], strides = [1, 1]} : vector<8x128xf32> to vector<8x64xf32>
    %209 = arith.mulf %206, %128 : vector<8x64xf32>
    %210 = arith.mulf %205, %208 : vector<8x64xf32>
    %211 = arith.addf %209, %210 : vector<8x64xf32>
    %212 = math.tanh %211 : vector<8x64xf32>
    %213 = arith.mulf %207, %212 : vector<8x64xf32>
    %214 = vector.extract_strided_slice %185 {offsets = [0, 0], sizes = [8, 128], strides = [1, 1]} : vector<8x256xf32> to vector<8x128xf32>
    %215 = arith.negf %214 : vector<8x128xf32>
    %216 = math.exp %215 : vector<8x128xf32>
    %cst_70 = arith.constant 1.000000e+00 : f32
    %217 = vector.broadcast %cst_70 : f32 to vector<8x128xf32>
    %218 = arith.addf %217, %216 : vector<8x128xf32>
    %219 = arith.divf %217, %218 : vector<8x128xf32>
    %220 = vector.extract_strided_slice %185 {offsets = [0, 128], sizes = [8, 128], strides = [1, 1]} : vector<8x256xf32> to vector<8x128xf32>
    %221 = arith.negf %220 : vector<8x128xf32>
    %222 = math.exp %221 : vector<8x128xf32>
    %cst_71 = arith.constant 1.000000e+00 : f32
    %223 = vector.broadcast %cst_71 : f32 to vector<8x128xf32>
    %224 = arith.addf %223, %222 : vector<8x128xf32>
    %225 = arith.divf %223, %224 : vector<8x128xf32>
    %226 = math.tanh %220 : vector<8x128xf32>
    %227 = vector.extract_strided_slice %219 {offsets = [0, 0], sizes = [8, 64], strides = [1, 1]} : vector<8x128xf32> to vector<8x64xf32>
    %228 = vector.extract_strided_slice %219 {offsets = [0, 64], sizes = [8, 64], strides = [1, 1]} : vector<8x128xf32> to vector<8x64xf32>
    %229 = vector.extract_strided_slice %225 {offsets = [0, 0], sizes = [8, 64], strides = [1, 1]} : vector<8x128xf32> to vector<8x64xf32>
    %230 = vector.extract_strided_slice %226 {offsets = [0, 64], sizes = [8, 64], strides = [1, 1]} : vector<8x128xf32> to vector<8x64xf32>
    %231 = arith.mulf %228, %150 : vector<8x64xf32>
    %232 = arith.mulf %227, %230 : vector<8x64xf32>
    %233 = arith.addf %231, %232 : vector<8x64xf32>
    %234 = math.tanh %233 : vector<8x64xf32>
    %235 = arith.mulf %229, %234 : vector<8x64xf32>
    %236 = vector.extract_strided_slice %191 {offsets = [0, 0], sizes = [8, 128], strides = [1, 1]} : vector<8x256xf32> to vector<8x128xf32>
    %237 = arith.negf %236 : vector<8x128xf32>
    %238 = math.exp %237 : vector<8x128xf32>
    %cst_72 = arith.constant 1.000000e+00 : f32
    %239 = vector.broadcast %cst_72 : f32 to vector<8x128xf32>
    %240 = arith.addf %239, %238 : vector<8x128xf32>
    %241 = arith.divf %239, %240 : vector<8x128xf32>
    %242 = vector.extract_strided_slice %191 {offsets = [0, 128], sizes = [8, 128], strides = [1, 1]} : vector<8x256xf32> to vector<8x128xf32>
    %243 = arith.negf %242 : vector<8x128xf32>
    %244 = math.exp %243 : vector<8x128xf32>
    %cst_73 = arith.constant 1.000000e+00 : f32
    %245 = vector.broadcast %cst_73 : f32 to vector<8x128xf32>
    %246 = arith.addf %245, %244 : vector<8x128xf32>
    %247 = arith.divf %245, %246 : vector<8x128xf32>
    %248 = math.tanh %242 : vector<8x128xf32>
    %249 = vector.extract_strided_slice %241 {offsets = [0, 0], sizes = [8, 64], strides = [1, 1]} : vector<8x128xf32> to vector<8x64xf32>
    %250 = vector.extract_strided_slice %241 {offsets = [0, 64], sizes = [8, 64], strides = [1, 1]} : vector<8x128xf32> to vector<8x64xf32>
    %251 = vector.extract_strided_slice %247 {offsets = [0, 0], sizes = [8, 64], strides = [1, 1]} : vector<8x128xf32> to vector<8x64xf32>
    %252 = vector.extract_strided_slice %248 {offsets = [0, 64], sizes = [8, 64], strides = [1, 1]} : vector<8x128xf32> to vector<8x64xf32>
    %253 = arith.mulf %250, %172 : vector<8x64xf32>
    %254 = arith.mulf %249, %252 : vector<8x64xf32>
    %255 = arith.addf %253, %254 : vector<8x64xf32>
    %256 = math.tanh %255 : vector<8x64xf32>
    %257 = arith.mulf %251, %256 : vector<8x64xf32>
    %c4 = arith.constant 4 : index
    %c0_74 = arith.constant 0 : index
    %c0_75 = arith.constant 0 : index
    %258 = vector.load %arg11[%c4, %c0_74, %c0_75] : memref<8x8x256xf32, #tpu.memory_space<vmem>>, vector<1x8x256xf32>
    %259 = vector.shape_cast %258 : vector<1x8x256xf32> to vector<8x256xf32>
    %c0_76 = arith.constant 0 : index
    %c0_77 = arith.constant 0 : index
    %260 = vector.load %arg3[%c0_76, %c0_77] : memref<64x256xf32, #tpu.memory_space<vmem>>, vector<64x256xf32>
    %cst_78 = arith.constant dense<0.000000e+00> : vector<8x256xf32>
    %261 = tpu.matmul %213, %260, %cst_78 {dimension_numbers = #tpu.dot_dimension_numbers<[1], [0], [0], [1], [0, 0, 1, 1], [], []>} : vector<8x64xf32>, vector<64x256xf32>, vector<8x256xf32> -> vector<8x256xf32>
    %262 = arith.addf %259, %261 : vector<8x256xf32>
    %263 = tpu.concatenate %213, %235 in 1 : vector<8x64xf32>, vector<8x64xf32> -> vector<8x128xf32>
    %c0_79 = arith.constant 0 : index
    %c0_80 = arith.constant 0 : index
    %264 = vector.load %arg4[%c0_79, %c0_80] : memref<128x256xf32, #tpu.memory_space<vmem>>, vector<128x256xf32>
    %cst_81 = arith.constant dense<0.000000e+00> : vector<8x256xf32>
    %265 = tpu.matmul %263, %264, %cst_81 {dimension_numbers = #tpu.dot_dimension_numbers<[1], [0], [0], [1], [0, 0, 1, 1], [], []>} : vector<8x128xf32>, vector<128x256xf32>, vector<8x256xf32> -> vector<8x256xf32>
    %c0_82 = arith.constant 0 : index
    %c0_83 = arith.constant 0 : index
    %266 = vector.load %arg5[%c0_82, %c0_83] : memref<1x256xf32, #tpu.memory_space<vmem>>, vector<1x256xf32>
    %267 = vector.broadcast %266 : vector<1x256xf32> to vector<8x256xf32>
    %268 = arith.addf %265, %267 : vector<8x256xf32>
    %269 = tpu.concatenate %235, %257 in 1 : vector<8x64xf32>, vector<8x64xf32> -> vector<8x128xf32>
    %c0_84 = arith.constant 0 : index
    %c0_85 = arith.constant 0 : index
    %270 = vector.load %arg6[%c0_84, %c0_85] : memref<128x256xf32, #tpu.memory_space<vmem>>, vector<128x256xf32>
    %cst_86 = arith.constant dense<0.000000e+00> : vector<8x256xf32>
    %271 = tpu.matmul %269, %270, %cst_86 {dimension_numbers = #tpu.dot_dimension_numbers<[1], [0], [0], [1], [0, 0, 1, 1], [], []>} : vector<8x128xf32>, vector<128x256xf32>, vector<8x256xf32> -> vector<8x256xf32>
    %c0_87 = arith.constant 0 : index
    %c0_88 = arith.constant 0 : index
    %272 = vector.load %arg7[%c0_87, %c0_88] : memref<1x256xf32, #tpu.memory_space<vmem>>, vector<1x256xf32>
    %273 = vector.broadcast %272 : vector<1x256xf32> to vector<8x256xf32>
    %274 = arith.addf %271, %273 : vector<8x256xf32>
    %275 = vector.extract_strided_slice %262 {offsets = [0, 0], sizes = [8, 128], strides = [1, 1]} : vector<8x256xf32> to vector<8x128xf32>
    %276 = arith.negf %275 : vector<8x128xf32>
    %277 = math.exp %276 : vector<8x128xf32>
    %cst_89 = arith.constant 1.000000e+00 : f32
    %278 = vector.broadcast %cst_89 : f32 to vector<8x128xf32>
    %279 = arith.addf %278, %277 : vector<8x128xf32>
    %280 = arith.divf %278, %279 : vector<8x128xf32>
    %281 = vector.extract_strided_slice %262 {offsets = [0, 128], sizes = [8, 128], strides = [1, 1]} : vector<8x256xf32> to vector<8x128xf32>
    %282 = arith.negf %281 : vector<8x128xf32>
    %283 = math.exp %282 : vector<8x128xf32>
    %cst_90 = arith.constant 1.000000e+00 : f32
    %284 = vector.broadcast %cst_90 : f32 to vector<8x128xf32>
    %285 = arith.addf %284, %283 : vector<8x128xf32>
    %286 = arith.divf %284, %285 : vector<8x128xf32>
    %287 = math.tanh %281 : vector<8x128xf32>
    %288 = vector.extract_strided_slice %280 {offsets = [0, 0], sizes = [8, 64], strides = [1, 1]} : vector<8x128xf32> to vector<8x64xf32>
    %289 = vector.extract_strided_slice %280 {offsets = [0, 64], sizes = [8, 64], strides = [1, 1]} : vector<8x128xf32> to vector<8x64xf32>
    %290 = vector.extract_strided_slice %286 {offsets = [0, 0], sizes = [8, 64], strides = [1, 1]} : vector<8x128xf32> to vector<8x64xf32>
    %291 = vector.extract_strided_slice %287 {offsets = [0, 64], sizes = [8, 64], strides = [1, 1]} : vector<8x128xf32> to vector<8x64xf32>
    %292 = arith.mulf %289, %211 : vector<8x64xf32>
    %293 = arith.mulf %288, %291 : vector<8x64xf32>
    %294 = arith.addf %292, %293 : vector<8x64xf32>
    %295 = math.tanh %294 : vector<8x64xf32>
    %296 = arith.mulf %290, %295 : vector<8x64xf32>
    %297 = vector.extract_strided_slice %268 {offsets = [0, 0], sizes = [8, 128], strides = [1, 1]} : vector<8x256xf32> to vector<8x128xf32>
    %298 = arith.negf %297 : vector<8x128xf32>
    %299 = math.exp %298 : vector<8x128xf32>
    %cst_91 = arith.constant 1.000000e+00 : f32
    %300 = vector.broadcast %cst_91 : f32 to vector<8x128xf32>
    %301 = arith.addf %300, %299 : vector<8x128xf32>
    %302 = arith.divf %300, %301 : vector<8x128xf32>
    %303 = vector.extract_strided_slice %268 {offsets = [0, 128], sizes = [8, 128], strides = [1, 1]} : vector<8x256xf32> to vector<8x128xf32>
    %304 = arith.negf %303 : vector<8x128xf32>
    %305 = math.exp %304 : vector<8x128xf32>
    %cst_92 = arith.constant 1.000000e+00 : f32
    %306 = vector.broadcast %cst_92 : f32 to vector<8x128xf32>
    %307 = arith.addf %306, %305 : vector<8x128xf32>
    %308 = arith.divf %306, %307 : vector<8x128xf32>
    %309 = math.tanh %303 : vector<8x128xf32>
    %310 = vector.extract_strided_slice %302 {offsets = [0, 0], sizes = [8, 64], strides = [1, 1]} : vector<8x128xf32> to vector<8x64xf32>
    %311 = vector.extract_strided_slice %302 {offsets = [0, 64], sizes = [8, 64], strides = [1, 1]} : vector<8x128xf32> to vector<8x64xf32>
    %312 = vector.extract_strided_slice %308 {offsets = [0, 0], sizes = [8, 64], strides = [1, 1]} : vector<8x128xf32> to vector<8x64xf32>
    %313 = vector.extract_strided_slice %309 {offsets = [0, 64], sizes = [8, 64], strides = [1, 1]} : vector<8x128xf32> to vector<8x64xf32>
    %314 = arith.mulf %311, %233 : vector<8x64xf32>
    %315 = arith.mulf %310, %313 : vector<8x64xf32>
    %316 = arith.addf %314, %315 : vector<8x64xf32>
    %317 = math.tanh %316 : vector<8x64xf32>
    %318 = arith.mulf %312, %317 : vector<8x64xf32>
    %319 = vector.extract_strided_slice %274 {offsets = [0, 0], sizes = [8, 128], strides = [1, 1]} : vector<8x256xf32> to vector<8x128xf32>
    %320 = arith.negf %319 : vector<8x128xf32>
    %321 = math.exp %320 : vector<8x128xf32>
    %cst_93 = arith.constant 1.000000e+00 : f32
    %322 = vector.broadcast %cst_93 : f32 to vector<8x128xf32>
    %323 = arith.addf %322, %321 : vector<8x128xf32>
    %324 = arith.divf %322, %323 : vector<8x128xf32>
    %325 = vector.extract_strided_slice %274 {offsets = [0, 128], sizes = [8, 128], strides = [1, 1]} : vector<8x256xf32> to vector<8x128xf32>
    %326 = arith.negf %325 : vector<8x128xf32>
    %327 = math.exp %326 : vector<8x128xf32>
    %cst_94 = arith.constant 1.000000e+00 : f32
    %328 = vector.broadcast %cst_94 : f32 to vector<8x128xf32>
    %329 = arith.addf %328, %327 : vector<8x128xf32>
    %330 = arith.divf %328, %329 : vector<8x128xf32>
    %331 = math.tanh %325 : vector<8x128xf32>
    %332 = vector.extract_strided_slice %324 {offsets = [0, 0], sizes = [8, 64], strides = [1, 1]} : vector<8x128xf32> to vector<8x64xf32>
    %333 = vector.extract_strided_slice %324 {offsets = [0, 64], sizes = [8, 64], strides = [1, 1]} : vector<8x128xf32> to vector<8x64xf32>
    %334 = vector.extract_strided_slice %330 {offsets = [0, 0], sizes = [8, 64], strides = [1, 1]} : vector<8x128xf32> to vector<8x64xf32>
    %335 = vector.extract_strided_slice %331 {offsets = [0, 64], sizes = [8, 64], strides = [1, 1]} : vector<8x128xf32> to vector<8x64xf32>
    %336 = arith.mulf %333, %255 : vector<8x64xf32>
    %337 = arith.mulf %332, %335 : vector<8x64xf32>
    %338 = arith.addf %336, %337 : vector<8x64xf32>
    %339 = math.tanh %338 : vector<8x64xf32>
    %340 = arith.mulf %334, %339 : vector<8x64xf32>
    %c5 = arith.constant 5 : index
    %c0_95 = arith.constant 0 : index
    %c0_96 = arith.constant 0 : index
    %341 = vector.load %arg11[%c5, %c0_95, %c0_96] : memref<8x8x256xf32, #tpu.memory_space<vmem>>, vector<1x8x256xf32>
    %342 = vector.shape_cast %341 : vector<1x8x256xf32> to vector<8x256xf32>
    %c0_97 = arith.constant 0 : index
    %c0_98 = arith.constant 0 : index
    %343 = vector.load %arg3[%c0_97, %c0_98] : memref<64x256xf32, #tpu.memory_space<vmem>>, vector<64x256xf32>
    %cst_99 = arith.constant dense<0.000000e+00> : vector<8x256xf32>
    %344 = tpu.matmul %296, %343, %cst_99 {dimension_numbers = #tpu.dot_dimension_numbers<[1], [0], [0], [1], [0, 0, 1, 1], [], []>} : vector<8x64xf32>, vector<64x256xf32>, vector<8x256xf32> -> vector<8x256xf32>
    %345 = arith.addf %342, %344 : vector<8x256xf32>
    %346 = tpu.concatenate %296, %318 in 1 : vector<8x64xf32>, vector<8x64xf32> -> vector<8x128xf32>
    %c0_100 = arith.constant 0 : index
    %c0_101 = arith.constant 0 : index
    %347 = vector.load %arg4[%c0_100, %c0_101] : memref<128x256xf32, #tpu.memory_space<vmem>>, vector<128x256xf32>
    %cst_102 = arith.constant dense<0.000000e+00> : vector<8x256xf32>
    %348 = tpu.matmul %346, %347, %cst_102 {dimension_numbers = #tpu.dot_dimension_numbers<[1], [0], [0], [1], [0, 0, 1, 1], [], []>} : vector<8x128xf32>, vector<128x256xf32>, vector<8x256xf32> -> vector<8x256xf32>
    %c0_103 = arith.constant 0 : index
    %c0_104 = arith.constant 0 : index
    %349 = vector.load %arg5[%c0_103, %c0_104] : memref<1x256xf32, #tpu.memory_space<vmem>>, vector<1x256xf32>
    %350 = vector.broadcast %349 : vector<1x256xf32> to vector<8x256xf32>
    %351 = arith.addf %348, %350 : vector<8x256xf32>
    %352 = tpu.concatenate %318, %340 in 1 : vector<8x64xf32>, vector<8x64xf32> -> vector<8x128xf32>
    %c0_105 = arith.constant 0 : index
    %c0_106 = arith.constant 0 : index
    %353 = vector.load %arg6[%c0_105, %c0_106] : memref<128x256xf32, #tpu.memory_space<vmem>>, vector<128x256xf32>
    %cst_107 = arith.constant dense<0.000000e+00> : vector<8x256xf32>
    %354 = tpu.matmul %352, %353, %cst_107 {dimension_numbers = #tpu.dot_dimension_numbers<[1], [0], [0], [1], [0, 0, 1, 1], [], []>} : vector<8x128xf32>, vector<128x256xf32>, vector<8x256xf32> -> vector<8x256xf32>
    %c0_108 = arith.constant 0 : index
    %c0_109 = arith.constant 0 : index
    %355 = vector.load %arg7[%c0_108, %c0_109] : memref<1x256xf32, #tpu.memory_space<vmem>>, vector<1x256xf32>
    %356 = vector.broadcast %355 : vector<1x256xf32> to vector<8x256xf32>
    %357 = arith.addf %354, %356 : vector<8x256xf32>
    %358 = vector.extract_strided_slice %345 {offsets = [0, 0], sizes = [8, 128], strides = [1, 1]} : vector<8x256xf32> to vector<8x128xf32>
    %359 = arith.negf %358 : vector<8x128xf32>
    %360 = math.exp %359 : vector<8x128xf32>
    %cst_110 = arith.constant 1.000000e+00 : f32
    %361 = vector.broadcast %cst_110 : f32 to vector<8x128xf32>
    %362 = arith.addf %361, %360 : vector<8x128xf32>
    %363 = arith.divf %361, %362 : vector<8x128xf32>
    %364 = vector.extract_strided_slice %345 {offsets = [0, 128], sizes = [8, 128], strides = [1, 1]} : vector<8x256xf32> to vector<8x128xf32>
    %365 = arith.negf %364 : vector<8x128xf32>
    %366 = math.exp %365 : vector<8x128xf32>
    %cst_111 = arith.constant 1.000000e+00 : f32
    %367 = vector.broadcast %cst_111 : f32 to vector<8x128xf32>
    %368 = arith.addf %367, %366 : vector<8x128xf32>
    %369 = arith.divf %367, %368 : vector<8x128xf32>
    %370 = math.tanh %364 : vector<8x128xf32>
    %371 = vector.extract_strided_slice %363 {offsets = [0, 0], sizes = [8, 64], strides = [1, 1]} : vector<8x128xf32> to vector<8x64xf32>
    %372 = vector.extract_strided_slice %363 {offsets = [0, 64], sizes = [8, 64], strides = [1, 1]} : vector<8x128xf32> to vector<8x64xf32>
    %373 = vector.extract_strided_slice %369 {offsets = [0, 0], sizes = [8, 64], strides = [1, 1]} : vector<8x128xf32> to vector<8x64xf32>
    %374 = vector.extract_strided_slice %370 {offsets = [0, 64], sizes = [8, 64], strides = [1, 1]} : vector<8x128xf32> to vector<8x64xf32>
    %375 = arith.mulf %372, %294 : vector<8x64xf32>
    %376 = arith.mulf %371, %374 : vector<8x64xf32>
    %377 = arith.addf %375, %376 : vector<8x64xf32>
    %378 = math.tanh %377 : vector<8x64xf32>
    %379 = arith.mulf %373, %378 : vector<8x64xf32>
    %380 = vector.extract_strided_slice %351 {offsets = [0, 0], sizes = [8, 128], strides = [1, 1]} : vector<8x256xf32> to vector<8x128xf32>
    %381 = arith.negf %380 : vector<8x128xf32>
    %382 = math.exp %381 : vector<8x128xf32>
    %cst_112 = arith.constant 1.000000e+00 : f32
    %383 = vector.broadcast %cst_112 : f32 to vector<8x128xf32>
    %384 = arith.addf %383, %382 : vector<8x128xf32>
    %385 = arith.divf %383, %384 : vector<8x128xf32>
    %386 = vector.extract_strided_slice %351 {offsets = [0, 128], sizes = [8, 128], strides = [1, 1]} : vector<8x256xf32> to vector<8x128xf32>
    %387 = arith.negf %386 : vector<8x128xf32>
    %388 = math.exp %387 : vector<8x128xf32>
    %cst_113 = arith.constant 1.000000e+00 : f32
    %389 = vector.broadcast %cst_113 : f32 to vector<8x128xf32>
    %390 = arith.addf %389, %388 : vector<8x128xf32>
    %391 = arith.divf %389, %390 : vector<8x128xf32>
    %392 = math.tanh %386 : vector<8x128xf32>
    %393 = vector.extract_strided_slice %385 {offsets = [0, 0], sizes = [8, 64], strides = [1, 1]} : vector<8x128xf32> to vector<8x64xf32>
    %394 = vector.extract_strided_slice %385 {offsets = [0, 64], sizes = [8, 64], strides = [1, 1]} : vector<8x128xf32> to vector<8x64xf32>
    %395 = vector.extract_strided_slice %391 {offsets = [0, 0], sizes = [8, 64], strides = [1, 1]} : vector<8x128xf32> to vector<8x64xf32>
    %396 = vector.extract_strided_slice %392 {offsets = [0, 64], sizes = [8, 64], strides = [1, 1]} : vector<8x128xf32> to vector<8x64xf32>
    %397 = arith.mulf %394, %316 : vector<8x64xf32>
    %398 = arith.mulf %393, %396 : vector<8x64xf32>
    %399 = arith.addf %397, %398 : vector<8x64xf32>
    %400 = math.tanh %399 : vector<8x64xf32>
    %401 = arith.mulf %395, %400 : vector<8x64xf32>
    %402 = vector.extract_strided_slice %357 {offsets = [0, 0], sizes = [8, 128], strides = [1, 1]} : vector<8x256xf32> to vector<8x128xf32>
    %403 = arith.negf %402 : vector<8x128xf32>
    %404 = math.exp %403 : vector<8x128xf32>
    %cst_114 = arith.constant 1.000000e+00 : f32
    %405 = vector.broadcast %cst_114 : f32 to vector<8x128xf32>
    %406 = arith.addf %405, %404 : vector<8x128xf32>
    %407 = arith.divf %405, %406 : vector<8x128xf32>
    %408 = vector.extract_strided_slice %357 {offsets = [0, 128], sizes = [8, 128], strides = [1, 1]} : vector<8x256xf32> to vector<8x128xf32>
    %409 = arith.negf %408 : vector<8x128xf32>
    %410 = math.exp %409 : vector<8x128xf32>
    %cst_115 = arith.constant 1.000000e+00 : f32
    %411 = vector.broadcast %cst_115 : f32 to vector<8x128xf32>
    %412 = arith.addf %411, %410 : vector<8x128xf32>
    %413 = arith.divf %411, %412 : vector<8x128xf32>
    %414 = math.tanh %408 : vector<8x128xf32>
    %415 = vector.extract_strided_slice %407 {offsets = [0, 0], sizes = [8, 64], strides = [1, 1]} : vector<8x128xf32> to vector<8x64xf32>
    %416 = vector.extract_strided_slice %407 {offsets = [0, 64], sizes = [8, 64], strides = [1, 1]} : vector<8x128xf32> to vector<8x64xf32>
    %417 = vector.extract_strided_slice %413 {offsets = [0, 0], sizes = [8, 64], strides = [1, 1]} : vector<8x128xf32> to vector<8x64xf32>
    %418 = vector.extract_strided_slice %414 {offsets = [0, 64], sizes = [8, 64], strides = [1, 1]} : vector<8x128xf32> to vector<8x64xf32>
    %419 = arith.mulf %416, %338 : vector<8x64xf32>
    %420 = arith.mulf %415, %418 : vector<8x64xf32>
    %421 = arith.addf %419, %420 : vector<8x64xf32>
    %422 = math.tanh %421 : vector<8x64xf32>
    %423 = arith.mulf %417, %422 : vector<8x64xf32>
    %c6 = arith.constant 6 : index
    %c0_116 = arith.constant 0 : index
    %c0_117 = arith.constant 0 : index
    %424 = vector.load %arg11[%c6, %c0_116, %c0_117] : memref<8x8x256xf32, #tpu.memory_space<vmem>>, vector<1x8x256xf32>
    %425 = vector.shape_cast %424 : vector<1x8x256xf32> to vector<8x256xf32>
    %c0_118 = arith.constant 0 : index
    %c0_119 = arith.constant 0 : index
    %426 = vector.load %arg3[%c0_118, %c0_119] : memref<64x256xf32, #tpu.memory_space<vmem>>, vector<64x256xf32>
    %cst_120 = arith.constant dense<0.000000e+00> : vector<8x256xf32>
    %427 = tpu.matmul %379, %426, %cst_120 {dimension_numbers = #tpu.dot_dimension_numbers<[1], [0], [0], [1], [0, 0, 1, 1], [], []>} : vector<8x64xf32>, vector<64x256xf32>, vector<8x256xf32> -> vector<8x256xf32>
    %428 = arith.addf %425, %427 : vector<8x256xf32>
    %429 = tpu.concatenate %379, %401 in 1 : vector<8x64xf32>, vector<8x64xf32> -> vector<8x128xf32>
    %c0_121 = arith.constant 0 : index
    %c0_122 = arith.constant 0 : index
    %430 = vector.load %arg4[%c0_121, %c0_122] : memref<128x256xf32, #tpu.memory_space<vmem>>, vector<128x256xf32>
    %cst_123 = arith.constant dense<0.000000e+00> : vector<8x256xf32>
    %431 = tpu.matmul %429, %430, %cst_123 {dimension_numbers = #tpu.dot_dimension_numbers<[1], [0], [0], [1], [0, 0, 1, 1], [], []>} : vector<8x128xf32>, vector<128x256xf32>, vector<8x256xf32> -> vector<8x256xf32>
    %c0_124 = arith.constant 0 : index
    %c0_125 = arith.constant 0 : index
    %432 = vector.load %arg5[%c0_124, %c0_125] : memref<1x256xf32, #tpu.memory_space<vmem>>, vector<1x256xf32>
    %433 = vector.broadcast %432 : vector<1x256xf32> to vector<8x256xf32>
    %434 = arith.addf %431, %433 : vector<8x256xf32>
    %435 = tpu.concatenate %401, %423 in 1 : vector<8x64xf32>, vector<8x64xf32> -> vector<8x128xf32>
    %c0_126 = arith.constant 0 : index
    %c0_127 = arith.constant 0 : index
    %436 = vector.load %arg6[%c0_126, %c0_127] : memref<128x256xf32, #tpu.memory_space<vmem>>, vector<128x256xf32>
    %cst_128 = arith.constant dense<0.000000e+00> : vector<8x256xf32>
    %437 = tpu.matmul %435, %436, %cst_128 {dimension_numbers = #tpu.dot_dimension_numbers<[1], [0], [0], [1], [0, 0, 1, 1], [], []>} : vector<8x128xf32>, vector<128x256xf32>, vector<8x256xf32> -> vector<8x256xf32>
    %c0_129 = arith.constant 0 : index
    %c0_130 = arith.constant 0 : index
    %438 = vector.load %arg7[%c0_129, %c0_130] : memref<1x256xf32, #tpu.memory_space<vmem>>, vector<1x256xf32>
    %439 = vector.broadcast %438 : vector<1x256xf32> to vector<8x256xf32>
    %440 = arith.addf %437, %439 : vector<8x256xf32>
    %441 = vector.extract_strided_slice %428 {offsets = [0, 0], sizes = [8, 128], strides = [1, 1]} : vector<8x256xf32> to vector<8x128xf32>
    %442 = arith.negf %441 : vector<8x128xf32>
    %443 = math.exp %442 : vector<8x128xf32>
    %cst_131 = arith.constant 1.000000e+00 : f32
    %444 = vector.broadcast %cst_131 : f32 to vector<8x128xf32>
    %445 = arith.addf %444, %443 : vector<8x128xf32>
    %446 = arith.divf %444, %445 : vector<8x128xf32>
    %447 = vector.extract_strided_slice %428 {offsets = [0, 128], sizes = [8, 128], strides = [1, 1]} : vector<8x256xf32> to vector<8x128xf32>
    %448 = arith.negf %447 : vector<8x128xf32>
    %449 = math.exp %448 : vector<8x128xf32>
    %cst_132 = arith.constant 1.000000e+00 : f32
    %450 = vector.broadcast %cst_132 : f32 to vector<8x128xf32>
    %451 = arith.addf %450, %449 : vector<8x128xf32>
    %452 = arith.divf %450, %451 : vector<8x128xf32>
    %453 = math.tanh %447 : vector<8x128xf32>
    %454 = vector.extract_strided_slice %446 {offsets = [0, 0], sizes = [8, 64], strides = [1, 1]} : vector<8x128xf32> to vector<8x64xf32>
    %455 = vector.extract_strided_slice %446 {offsets = [0, 64], sizes = [8, 64], strides = [1, 1]} : vector<8x128xf32> to vector<8x64xf32>
    %456 = vector.extract_strided_slice %452 {offsets = [0, 0], sizes = [8, 64], strides = [1, 1]} : vector<8x128xf32> to vector<8x64xf32>
    %457 = vector.extract_strided_slice %453 {offsets = [0, 64], sizes = [8, 64], strides = [1, 1]} : vector<8x128xf32> to vector<8x64xf32>
    %458 = arith.mulf %455, %377 : vector<8x64xf32>
    %459 = arith.mulf %454, %457 : vector<8x64xf32>
    %460 = arith.addf %458, %459 : vector<8x64xf32>
    %461 = math.tanh %460 : vector<8x64xf32>
    %462 = arith.mulf %456, %461 : vector<8x64xf32>
    %463 = vector.extract_strided_slice %434 {offsets = [0, 0], sizes = [8, 128], strides = [1, 1]} : vector<8x256xf32> to vector<8x128xf32>
    %464 = arith.negf %463 : vector<8x128xf32>
    %465 = math.exp %464 : vector<8x128xf32>
    %cst_133 = arith.constant 1.000000e+00 : f32
    %466 = vector.broadcast %cst_133 : f32 to vector<8x128xf32>
    %467 = arith.addf %466, %465 : vector<8x128xf32>
    %468 = arith.divf %466, %467 : vector<8x128xf32>
    %469 = vector.extract_strided_slice %434 {offsets = [0, 128], sizes = [8, 128], strides = [1, 1]} : vector<8x256xf32> to vector<8x128xf32>
    %470 = arith.negf %469 : vector<8x128xf32>
    %471 = math.exp %470 : vector<8x128xf32>
    %cst_134 = arith.constant 1.000000e+00 : f32
    %472 = vector.broadcast %cst_134 : f32 to vector<8x128xf32>
    %473 = arith.addf %472, %471 : vector<8x128xf32>
    %474 = arith.divf %472, %473 : vector<8x128xf32>
    %475 = math.tanh %469 : vector<8x128xf32>
    %476 = vector.extract_strided_slice %468 {offsets = [0, 0], sizes = [8, 64], strides = [1, 1]} : vector<8x128xf32> to vector<8x64xf32>
    %477 = vector.extract_strided_slice %468 {offsets = [0, 64], sizes = [8, 64], strides = [1, 1]} : vector<8x128xf32> to vector<8x64xf32>
    %478 = vector.extract_strided_slice %474 {offsets = [0, 0], sizes = [8, 64], strides = [1, 1]} : vector<8x128xf32> to vector<8x64xf32>
    %479 = vector.extract_strided_slice %475 {offsets = [0, 64], sizes = [8, 64], strides = [1, 1]} : vector<8x128xf32> to vector<8x64xf32>
    %480 = arith.mulf %477, %399 : vector<8x64xf32>
    %481 = arith.mulf %476, %479 : vector<8x64xf32>
    %482 = arith.addf %480, %481 : vector<8x64xf32>
    %483 = math.tanh %482 : vector<8x64xf32>
    %484 = arith.mulf %478, %483 : vector<8x64xf32>
    %485 = vector.extract_strided_slice %440 {offsets = [0, 0], sizes = [8, 128], strides = [1, 1]} : vector<8x256xf32> to vector<8x128xf32>
    %486 = arith.negf %485 : vector<8x128xf32>
    %487 = math.exp %486 : vector<8x128xf32>
    %cst_135 = arith.constant 1.000000e+00 : f32
    %488 = vector.broadcast %cst_135 : f32 to vector<8x128xf32>
    %489 = arith.addf %488, %487 : vector<8x128xf32>
    %490 = arith.divf %488, %489 : vector<8x128xf32>
    %491 = vector.extract_strided_slice %440 {offsets = [0, 128], sizes = [8, 128], strides = [1, 1]} : vector<8x256xf32> to vector<8x128xf32>
    %492 = arith.negf %491 : vector<8x128xf32>
    %493 = math.exp %492 : vector<8x128xf32>
    %cst_136 = arith.constant 1.000000e+00 : f32
    %494 = vector.broadcast %cst_136 : f32 to vector<8x128xf32>
    %495 = arith.addf %494, %493 : vector<8x128xf32>
    %496 = arith.divf %494, %495 : vector<8x128xf32>
    %497 = math.tanh %491 : vector<8x128xf32>
    %498 = vector.extract_strided_slice %490 {offsets = [0, 0], sizes = [8, 64], strides = [1, 1]} : vector<8x128xf32> to vector<8x64xf32>
    %499 = vector.extract_strided_slice %490 {offsets = [0, 64], sizes = [8, 64], strides = [1, 1]} : vector<8x128xf32> to vector<8x64xf32>
    %500 = vector.extract_strided_slice %496 {offsets = [0, 0], sizes = [8, 64], strides = [1, 1]} : vector<8x128xf32> to vector<8x64xf32>
    %501 = vector.extract_strided_slice %497 {offsets = [0, 64], sizes = [8, 64], strides = [1, 1]} : vector<8x128xf32> to vector<8x64xf32>
    %502 = arith.mulf %499, %421 : vector<8x64xf32>
    %503 = arith.mulf %498, %501 : vector<8x64xf32>
    %504 = arith.addf %502, %503 : vector<8x64xf32>
    %505 = math.tanh %504 : vector<8x64xf32>
    %506 = arith.mulf %500, %505 : vector<8x64xf32>
    %c7 = arith.constant 7 : index
    %c0_137 = arith.constant 0 : index
    %c0_138 = arith.constant 0 : index
    %507 = vector.load %arg11[%c7, %c0_137, %c0_138] : memref<8x8x256xf32, #tpu.memory_space<vmem>>, vector<1x8x256xf32>
    %508 = vector.shape_cast %507 : vector<1x8x256xf32> to vector<8x256xf32>
    %c0_139 = arith.constant 0 : index
    %c0_140 = arith.constant 0 : index
    %509 = vector.load %arg3[%c0_139, %c0_140] : memref<64x256xf32, #tpu.memory_space<vmem>>, vector<64x256xf32>
    %cst_141 = arith.constant dense<0.000000e+00> : vector<8x256xf32>
    %510 = tpu.matmul %462, %509, %cst_141 {dimension_numbers = #tpu.dot_dimension_numbers<[1], [0], [0], [1], [0, 0, 1, 1], [], []>} : vector<8x64xf32>, vector<64x256xf32>, vector<8x256xf32> -> vector<8x256xf32>
    %511 = arith.addf %508, %510 : vector<8x256xf32>
    %512 = tpu.concatenate %462, %484 in 1 : vector<8x64xf32>, vector<8x64xf32> -> vector<8x128xf32>
    %c0_142 = arith.constant 0 : index
    %c0_143 = arith.constant 0 : index
    %513 = vector.load %arg4[%c0_142, %c0_143] : memref<128x256xf32, #tpu.memory_space<vmem>>, vector<128x256xf32>
    %cst_144 = arith.constant dense<0.000000e+00> : vector<8x256xf32>
    %514 = tpu.matmul %512, %513, %cst_144 {dimension_numbers = #tpu.dot_dimension_numbers<[1], [0], [0], [1], [0, 0, 1, 1], [], []>} : vector<8x128xf32>, vector<128x256xf32>, vector<8x256xf32> -> vector<8x256xf32>
    %c0_145 = arith.constant 0 : index
    %c0_146 = arith.constant 0 : index
    %515 = vector.load %arg5[%c0_145, %c0_146] : memref<1x256xf32, #tpu.memory_space<vmem>>, vector<1x256xf32>
    %516 = vector.broadcast %515 : vector<1x256xf32> to vector<8x256xf32>
    %517 = arith.addf %514, %516 : vector<8x256xf32>
    %518 = tpu.concatenate %484, %506 in 1 : vector<8x64xf32>, vector<8x64xf32> -> vector<8x128xf32>
    %c0_147 = arith.constant 0 : index
    %c0_148 = arith.constant 0 : index
    %519 = vector.load %arg6[%c0_147, %c0_148] : memref<128x256xf32, #tpu.memory_space<vmem>>, vector<128x256xf32>
    %cst_149 = arith.constant dense<0.000000e+00> : vector<8x256xf32>
    %520 = tpu.matmul %518, %519, %cst_149 {dimension_numbers = #tpu.dot_dimension_numbers<[1], [0], [0], [1], [0, 0, 1, 1], [], []>} : vector<8x128xf32>, vector<128x256xf32>, vector<8x256xf32> -> vector<8x256xf32>
    %c0_150 = arith.constant 0 : index
    %c0_151 = arith.constant 0 : index
    %521 = vector.load %arg7[%c0_150, %c0_151] : memref<1x256xf32, #tpu.memory_space<vmem>>, vector<1x256xf32>
    %522 = vector.broadcast %521 : vector<1x256xf32> to vector<8x256xf32>
    %523 = arith.addf %520, %522 : vector<8x256xf32>
    %524 = vector.extract_strided_slice %511 {offsets = [0, 0], sizes = [8, 128], strides = [1, 1]} : vector<8x256xf32> to vector<8x128xf32>
    %525 = arith.negf %524 : vector<8x128xf32>
    %526 = math.exp %525 : vector<8x128xf32>
    %cst_152 = arith.constant 1.000000e+00 : f32
    %527 = vector.broadcast %cst_152 : f32 to vector<8x128xf32>
    %528 = arith.addf %527, %526 : vector<8x128xf32>
    %529 = arith.divf %527, %528 : vector<8x128xf32>
    %530 = vector.extract_strided_slice %511 {offsets = [0, 128], sizes = [8, 128], strides = [1, 1]} : vector<8x256xf32> to vector<8x128xf32>
    %531 = arith.negf %530 : vector<8x128xf32>
    %532 = math.exp %531 : vector<8x128xf32>
    %cst_153 = arith.constant 1.000000e+00 : f32
    %533 = vector.broadcast %cst_153 : f32 to vector<8x128xf32>
    %534 = arith.addf %533, %532 : vector<8x128xf32>
    %535 = arith.divf %533, %534 : vector<8x128xf32>
    %536 = math.tanh %530 : vector<8x128xf32>
    %537 = vector.extract_strided_slice %529 {offsets = [0, 0], sizes = [8, 64], strides = [1, 1]} : vector<8x128xf32> to vector<8x64xf32>
    %538 = vector.extract_strided_slice %529 {offsets = [0, 64], sizes = [8, 64], strides = [1, 1]} : vector<8x128xf32> to vector<8x64xf32>
    %539 = vector.extract_strided_slice %535 {offsets = [0, 0], sizes = [8, 64], strides = [1, 1]} : vector<8x128xf32> to vector<8x64xf32>
    %540 = vector.extract_strided_slice %536 {offsets = [0, 64], sizes = [8, 64], strides = [1, 1]} : vector<8x128xf32> to vector<8x64xf32>
    %541 = arith.mulf %538, %460 : vector<8x64xf32>
    %542 = arith.mulf %537, %540 : vector<8x64xf32>
    %543 = arith.addf %541, %542 : vector<8x64xf32>
    %544 = math.tanh %543 : vector<8x64xf32>
    %545 = arith.mulf %539, %544 : vector<8x64xf32>
    %546 = vector.extract_strided_slice %517 {offsets = [0, 0], sizes = [8, 128], strides = [1, 1]} : vector<8x256xf32> to vector<8x128xf32>
    %547 = arith.negf %546 : vector<8x128xf32>
    %548 = math.exp %547 : vector<8x128xf32>
    %cst_154 = arith.constant 1.000000e+00 : f32
    %549 = vector.broadcast %cst_154 : f32 to vector<8x128xf32>
    %550 = arith.addf %549, %548 : vector<8x128xf32>
    %551 = arith.divf %549, %550 : vector<8x128xf32>
    %552 = vector.extract_strided_slice %517 {offsets = [0, 128], sizes = [8, 128], strides = [1, 1]} : vector<8x256xf32> to vector<8x128xf32>
    %553 = arith.negf %552 : vector<8x128xf32>
    %554 = math.exp %553 : vector<8x128xf32>
    %cst_155 = arith.constant 1.000000e+00 : f32
    %555 = vector.broadcast %cst_155 : f32 to vector<8x128xf32>
    %556 = arith.addf %555, %554 : vector<8x128xf32>
    %557 = arith.divf %555, %556 : vector<8x128xf32>
    %558 = math.tanh %552 : vector<8x128xf32>
    %559 = vector.extract_strided_slice %551 {offsets = [0, 0], sizes = [8, 64], strides = [1, 1]} : vector<8x128xf32> to vector<8x64xf32>
    %560 = vector.extract_strided_slice %551 {offsets = [0, 64], sizes = [8, 64], strides = [1, 1]} : vector<8x128xf32> to vector<8x64xf32>
    %561 = vector.extract_strided_slice %557 {offsets = [0, 0], sizes = [8, 64], strides = [1, 1]} : vector<8x128xf32> to vector<8x64xf32>
    %562 = vector.extract_strided_slice %558 {offsets = [0, 64], sizes = [8, 64], strides = [1, 1]} : vector<8x128xf32> to vector<8x64xf32>
    %563 = arith.mulf %560, %482 : vector<8x64xf32>
    %564 = arith.mulf %559, %562 : vector<8x64xf32>
    %565 = arith.addf %563, %564 : vector<8x64xf32>
    %566 = math.tanh %565 : vector<8x64xf32>
    %567 = arith.mulf %561, %566 : vector<8x64xf32>
    %568 = vector.extract_strided_slice %523 {offsets = [0, 0], sizes = [8, 128], strides = [1, 1]} : vector<8x256xf32> to vector<8x128xf32>
    %569 = arith.negf %568 : vector<8x128xf32>
    %570 = math.exp %569 : vector<8x128xf32>
    %cst_156 = arith.constant 1.000000e+00 : f32
    %571 = vector.broadcast %cst_156 : f32 to vector<8x128xf32>
    %572 = arith.addf %571, %570 : vector<8x128xf32>
    %573 = arith.divf %571, %572 : vector<8x128xf32>
    %574 = vector.extract_strided_slice %523 {offsets = [0, 128], sizes = [8, 128], strides = [1, 1]} : vector<8x256xf32> to vector<8x128xf32>
    %575 = arith.negf %574 : vector<8x128xf32>
    %576 = math.exp %575 : vector<8x128xf32>
    %cst_157 = arith.constant 1.000000e+00 : f32
    %577 = vector.broadcast %cst_157 : f32 to vector<8x128xf32>
    %578 = arith.addf %577, %576 : vector<8x128xf32>
    %579 = arith.divf %577, %578 : vector<8x128xf32>
    %580 = math.tanh %574 : vector<8x128xf32>
    %581 = vector.extract_strided_slice %573 {offsets = [0, 0], sizes = [8, 64], strides = [1, 1]} : vector<8x128xf32> to vector<8x64xf32>
    %582 = vector.extract_strided_slice %573 {offsets = [0, 64], sizes = [8, 64], strides = [1, 1]} : vector<8x128xf32> to vector<8x64xf32>
    %583 = vector.extract_strided_slice %579 {offsets = [0, 0], sizes = [8, 64], strides = [1, 1]} : vector<8x128xf32> to vector<8x64xf32>
    %584 = vector.extract_strided_slice %580 {offsets = [0, 64], sizes = [8, 64], strides = [1, 1]} : vector<8x128xf32> to vector<8x64xf32>
    %585 = arith.mulf %582, %504 : vector<8x64xf32>
    %586 = arith.mulf %581, %584 : vector<8x64xf32>
    %587 = arith.addf %585, %586 : vector<8x64xf32>
    %588 = math.tanh %587 : vector<8x64xf32>
    %589 = arith.mulf %583, %588 : vector<8x64xf32>
    %590 = tpu.concatenate %545, %567 in 1 : vector<8x64xf32>, vector<8x64xf32> -> vector<8x128xf32>
    %c0_158 = arith.constant 0 : index
    %c0_159 = arith.constant 0 : index
    %591 = vector.load %arg4[%c0_158, %c0_159] : memref<128x256xf32, #tpu.memory_space<vmem>>, vector<128x256xf32>
    %cst_160 = arith.constant dense<0.000000e+00> : vector<8x256xf32>
    %592 = tpu.matmul %590, %591, %cst_160 {dimension_numbers = #tpu.dot_dimension_numbers<[1], [0], [0], [1], [0, 0, 1, 1], [], []>} : vector<8x128xf32>, vector<128x256xf32>, vector<8x256xf32> -> vector<8x256xf32>
    %c0_161 = arith.constant 0 : index
    %c0_162 = arith.constant 0 : index
    %593 = vector.load %arg5[%c0_161, %c0_162] : memref<1x256xf32, #tpu.memory_space<vmem>>, vector<1x256xf32>
    %594 = vector.broadcast %593 : vector<1x256xf32> to vector<8x256xf32>
    %595 = arith.addf %592, %594 : vector<8x256xf32>
    %596 = tpu.concatenate %567, %589 in 1 : vector<8x64xf32>, vector<8x64xf32> -> vector<8x128xf32>
    %c0_163 = arith.constant 0 : index
    %c0_164 = arith.constant 0 : index
    %597 = vector.load %arg6[%c0_163, %c0_164] : memref<128x256xf32, #tpu.memory_space<vmem>>, vector<128x256xf32>
    %cst_165 = arith.constant dense<0.000000e+00> : vector<8x256xf32>
    %598 = tpu.matmul %596, %597, %cst_165 {dimension_numbers = #tpu.dot_dimension_numbers<[1], [0], [0], [1], [0, 0, 1, 1], [], []>} : vector<8x128xf32>, vector<128x256xf32>, vector<8x256xf32> -> vector<8x256xf32>
    %c0_166 = arith.constant 0 : index
    %c0_167 = arith.constant 0 : index
    %599 = vector.load %arg7[%c0_166, %c0_167] : memref<1x256xf32, #tpu.memory_space<vmem>>, vector<1x256xf32>
    %600 = vector.broadcast %599 : vector<1x256xf32> to vector<8x256xf32>
    %601 = arith.addf %598, %600 : vector<8x256xf32>
    %602 = vector.extract_strided_slice %595 {offsets = [0, 0], sizes = [8, 128], strides = [1, 1]} : vector<8x256xf32> to vector<8x128xf32>
    %603 = arith.negf %602 : vector<8x128xf32>
    %604 = math.exp %603 : vector<8x128xf32>
    %cst_168 = arith.constant 1.000000e+00 : f32
    %605 = vector.broadcast %cst_168 : f32 to vector<8x128xf32>
    %606 = arith.addf %605, %604 : vector<8x128xf32>
    %607 = arith.divf %605, %606 : vector<8x128xf32>
    %608 = vector.extract_strided_slice %595 {offsets = [0, 128], sizes = [8, 128], strides = [1, 1]} : vector<8x256xf32> to vector<8x128xf32>
    %609 = arith.negf %608 : vector<8x128xf32>
    %610 = math.exp %609 : vector<8x128xf32>
    %cst_169 = arith.constant 1.000000e+00 : f32
    %611 = vector.broadcast %cst_169 : f32 to vector<8x128xf32>
    %612 = arith.addf %611, %610 : vector<8x128xf32>
    %613 = arith.divf %611, %612 : vector<8x128xf32>
    %614 = math.tanh %608 : vector<8x128xf32>
    %615 = vector.extract_strided_slice %607 {offsets = [0, 0], sizes = [8, 64], strides = [1, 1]} : vector<8x128xf32> to vector<8x64xf32>
    %616 = vector.extract_strided_slice %607 {offsets = [0, 64], sizes = [8, 64], strides = [1, 1]} : vector<8x128xf32> to vector<8x64xf32>
    %617 = vector.extract_strided_slice %613 {offsets = [0, 0], sizes = [8, 64], strides = [1, 1]} : vector<8x128xf32> to vector<8x64xf32>
    %618 = vector.extract_strided_slice %614 {offsets = [0, 64], sizes = [8, 64], strides = [1, 1]} : vector<8x128xf32> to vector<8x64xf32>
    %619 = arith.mulf %616, %565 : vector<8x64xf32>
    %620 = arith.mulf %615, %618 : vector<8x64xf32>
    %621 = arith.addf %619, %620 : vector<8x64xf32>
    %622 = math.tanh %621 : vector<8x64xf32>
    %623 = arith.mulf %617, %622 : vector<8x64xf32>
    %624 = vector.extract_strided_slice %601 {offsets = [0, 0], sizes = [8, 128], strides = [1, 1]} : vector<8x256xf32> to vector<8x128xf32>
    %625 = arith.negf %624 : vector<8x128xf32>
    %626 = math.exp %625 : vector<8x128xf32>
    %cst_170 = arith.constant 1.000000e+00 : f32
    %627 = vector.broadcast %cst_170 : f32 to vector<8x128xf32>
    %628 = arith.addf %627, %626 : vector<8x128xf32>
    %629 = arith.divf %627, %628 : vector<8x128xf32>
    %630 = vector.extract_strided_slice %601 {offsets = [0, 128], sizes = [8, 128], strides = [1, 1]} : vector<8x256xf32> to vector<8x128xf32>
    %631 = arith.negf %630 : vector<8x128xf32>
    %632 = math.exp %631 : vector<8x128xf32>
    %cst_171 = arith.constant 1.000000e+00 : f32
    %633 = vector.broadcast %cst_171 : f32 to vector<8x128xf32>
    %634 = arith.addf %633, %632 : vector<8x128xf32>
    %635 = arith.divf %633, %634 : vector<8x128xf32>
    %636 = math.tanh %630 : vector<8x128xf32>
    %637 = vector.extract_strided_slice %629 {offsets = [0, 0], sizes = [8, 64], strides = [1, 1]} : vector<8x128xf32> to vector<8x64xf32>
    %638 = vector.extract_strided_slice %629 {offsets = [0, 64], sizes = [8, 64], strides = [1, 1]} : vector<8x128xf32> to vector<8x64xf32>
    %639 = vector.extract_strided_slice %635 {offsets = [0, 0], sizes = [8, 64], strides = [1, 1]} : vector<8x128xf32> to vector<8x64xf32>
    %640 = vector.extract_strided_slice %636 {offsets = [0, 64], sizes = [8, 64], strides = [1, 1]} : vector<8x128xf32> to vector<8x64xf32>
    %641 = arith.mulf %638, %587 : vector<8x64xf32>
    %642 = arith.mulf %637, %640 : vector<8x64xf32>
    %643 = arith.addf %641, %642 : vector<8x64xf32>
    %644 = math.tanh %643 : vector<8x64xf32>
    %645 = arith.mulf %639, %644 : vector<8x64xf32>
    %646 = tpu.concatenate %623, %645 in 1 : vector<8x64xf32>, vector<8x64xf32> -> vector<8x128xf32>
    %c0_172 = arith.constant 0 : index
    %c0_173 = arith.constant 0 : index
    %647 = vector.load %arg6[%c0_172, %c0_173] : memref<128x256xf32, #tpu.memory_space<vmem>>, vector<128x256xf32>
    %cst_174 = arith.constant dense<0.000000e+00> : vector<8x256xf32>
    %648 = tpu.matmul %646, %647, %cst_174 {dimension_numbers = #tpu.dot_dimension_numbers<[1], [0], [0], [1], [0, 0, 1, 1], [], []>} : vector<8x128xf32>, vector<128x256xf32>, vector<8x256xf32> -> vector<8x256xf32>
    %c0_175 = arith.constant 0 : index
    %c0_176 = arith.constant 0 : index
    %649 = vector.load %arg7[%c0_175, %c0_176] : memref<1x256xf32, #tpu.memory_space<vmem>>, vector<1x256xf32>
    %650 = vector.broadcast %649 : vector<1x256xf32> to vector<8x256xf32>
    %651 = arith.addf %648, %650 : vector<8x256xf32>
    %652 = vector.extract_strided_slice %651 {offsets = [0, 0], sizes = [8, 128], strides = [1, 1]} : vector<8x256xf32> to vector<8x128xf32>
    %653 = arith.negf %652 : vector<8x128xf32>
    %654 = math.exp %653 : vector<8x128xf32>
    %cst_177 = arith.constant 1.000000e+00 : f32
    %655 = vector.broadcast %cst_177 : f32 to vector<8x128xf32>
    %656 = arith.addf %655, %654 : vector<8x128xf32>
    %657 = arith.divf %655, %656 : vector<8x128xf32>
    %658 = vector.extract_strided_slice %651 {offsets = [0, 128], sizes = [8, 128], strides = [1, 1]} : vector<8x256xf32> to vector<8x128xf32>
    %659 = arith.negf %658 : vector<8x128xf32>
    %660 = math.exp %659 : vector<8x128xf32>
    %cst_178 = arith.constant 1.000000e+00 : f32
    %661 = vector.broadcast %cst_178 : f32 to vector<8x128xf32>
    %662 = arith.addf %661, %660 : vector<8x128xf32>
    %663 = arith.divf %661, %662 : vector<8x128xf32>
    %664 = math.tanh %658 : vector<8x128xf32>
    %665 = vector.extract_strided_slice %657 {offsets = [0, 0], sizes = [8, 64], strides = [1, 1]} : vector<8x128xf32> to vector<8x64xf32>
    %666 = vector.extract_strided_slice %657 {offsets = [0, 64], sizes = [8, 64], strides = [1, 1]} : vector<8x128xf32> to vector<8x64xf32>
    %667 = vector.extract_strided_slice %663 {offsets = [0, 0], sizes = [8, 64], strides = [1, 1]} : vector<8x128xf32> to vector<8x64xf32>
    %668 = vector.extract_strided_slice %664 {offsets = [0, 64], sizes = [8, 64], strides = [1, 1]} : vector<8x128xf32> to vector<8x64xf32>
    %669 = arith.mulf %666, %643 : vector<8x64xf32>
    %670 = arith.mulf %665, %668 : vector<8x64xf32>
    %671 = arith.addf %669, %670 : vector<8x64xf32>
    %672 = math.tanh %671 : vector<8x64xf32>
    %673 = arith.mulf %667, %672 : vector<8x64xf32>
    %c0_179 = arith.constant 0 : index
    %c0_180 = arith.constant 0 : index
    %674 = vector.load %arg8[%c0_179, %c0_180] : memref<64x128xf32, #tpu.memory_space<vmem>>, vector<64x128xf32>
    %cst_181 = arith.constant dense<0.000000e+00> : vector<8x128xf32>
    %675 = tpu.matmul %673, %674, %cst_181 {dimension_numbers = #tpu.dot_dimension_numbers<[1], [0], [0], [1], [0, 0, 1, 1], [], []>} : vector<8x64xf32>, vector<64x128xf32>, vector<8x128xf32> -> vector<8x128xf32>
    %c0_182 = arith.constant 0 : index
    %c0_183 = arith.constant 0 : index
    %676 = vector.load %arg9[%c0_182, %c0_183] : memref<1x128xf32, #tpu.memory_space<vmem>>, vector<1x128xf32>
    %677 = vector.broadcast %676 : vector<1x128xf32> to vector<8x128xf32>
    %678 = arith.addf %675, %677 : vector<8x128xf32>
    %c0_184 = arith.constant 0 : index
    %c0_185 = arith.constant 0 : index
    %679 = vector.load %arg10[%c0_184, %c0_185] : memref<8x128xf32, #tpu.memory_space<vmem>>, vector<8x128xf32>
    tpu.vector_store %arg10[%c0_184, %c0_185], %678 {strides = array<i32>} : memref<8x128xf32, #tpu.memory_space<vmem>>, vector<8x128xf32>,
    return
  }
}

</mosaic_0001>

<bundles_post_ra>
// kernel: tpu_custom_call.1
= control target key start
LH: loop header
LB: loop body
LE: loop exit
PB: predicated region body
PF: predicated region fallthrough
CT: control target
= control target key end

     0   :  { %15 = vsyncpa [#allocation4], 0  ;;  %s5236_s0 = inlined_call_operand.hbm [shape: f32[8,8,8], index: 0, kind: input, shape index: {}]   ;;  %s5237_s1 = inlined_call_operand.hbm [shape: f32[8,256], index: 1, kind: input, shape index: {}]   ;;  %s5238_s2 = inlined_call_operand.vmem [shape: f32[1,256], index: 2, kind: input, shape index: {}]   ;;  %s5239_s3 = inlined_call_operand.hbm [shape: f32[64,256], index: 3, kind: input, shape index: {}]   ;;  %s5240_s4 = inlined_call_operand.hbm [shape: f32[128,256], index: 4, kind: input, shape index: {}]   ;;  %s5241_s5 = inlined_call_operand.vmem [shape: f32[1,256], index: 5, kind: input, shape index: {}]   ;;  %s5242_s6 = inlined_call_operand.hbm [shape: f32[128,256], index: 6, kind: input, shape index: {}]   ;;  %s5243_s7 = inlined_call_operand.vmem [shape: f32[1,256], index: 7, kind: input, shape index: {}]   ;;  %s5244_s8 = inlined_call_operand.hbm [shape: f32[64,128], index: 8, kind: input, shape index: {}]   ;;  %s5245_s9 = inlined_call_operand.vmem [shape: f32[1,128], index: 9, kind: input, shape index: {}]   ;;  %s5246_s10 = inlined_call_operand.hbm [shape: f32[8,128], index: 10, kind: output, shape index: {}]  }
   0x1   :  { %16 = vsyncpa [#allocation7], 0 }
   0x2   :  { %17 = vsyncpa [#allocation10], 0 }
   0x3   :  { %18 = vsyncpa [#allocation13], 0 }
   0x4   :  { %19 = vsyncpa [#allocation5], 0  ;;  %s4309_s13 = smov [#allocation6]   ;;  %s4145_s17 = scalar_lea.hbm %s5237_s1, 256 }
   0x5   :  { %s38_s14 = sshll.u32 %s4309_s13, 4  ;;  %p4146_p0 = scmp.ne.s32.totalorder %s5237_s1, %s4145_s17  ;;  %s39_s14 = int_to_ptr.vmem [resolvable:$true] %s38_s14 }
   0x6   :  { %p4149_p1 = scmp.lt.u32.totalorder %s4145_s17, %s5237_s1 }
   0x8   :  { %p4151_p2 = pnand %p4149_p1, %p4146_p0 }
   0xa   :  { %4154 = shalt.err (!%p4151_p2)
}
   0xb   :  { %s4155_s22 = scalar_lea.vmem %s39_s14, 256  ;;  %p4160_p4 = scmp.lt.s32.totalorder %s39_s14, %s39_s14 }
   0xc   :  { %p4156_p3 = scmp.ne.s32.totalorder %s39_s14, %s4155_s22  ;;  %p4161_p5 = scmp.lt.s32.totalorder %s4155_s22, %s4155_s22 }
   0xe   :  { %p4162_p6 = por %p4161_p5, %p4160_p4 }
  0x10   :  { %p4163_p7 = pnand %p4162_p6, %p4156_p3 }
  0x12   :  { %4166 = shalt.err (!%p4163_p7)
}
  0x13   :  { %41 = dma.hbm_to_vmem [thread:$0]  %s5237_s1, 256, %s39_s14, [#allocation7]  }
  0x14   :  { %s4310_s25 = smov [#allocation9]   ;;  %s4311_s27 = smov [#allocation3]  }
  0x15   :  { %s61_s26 = sshll.u32 %s4310_s25, 4  ;;  %s25_s28 = sshll.u32 %s4311_s27, 4  ;;  %s62_s26 = int_to_ptr.vmem [resolvable:$true] %s61_s26  ;;  %s26_s28 = int_to_ptr.vmem [resolvable:$true] %s25_s28 }
  0x16   :  { %s4167_s11 = scalar_lea.hbm %s5240_s4, 4096 }
  0x17   :  { %p4168_p8 = scmp.ne.s32.totalorder %s5240_s4, %s4167_s11  ;;  %p4171_p9 = scmp.lt.u32.totalorder %s4167_s11, %s5240_s4 }
  0x19   :  { %p4173_p10 = pnand %p4171_p9, %p4168_p8 }
  0x1b   :  { %4176 = shalt.err (!%p4173_p10)
}
  0x1c   :  { %s4177_s1 = scalar_lea.vmem %s62_s26, 4096  ;;  %p4182_p12 = scmp.lt.s32.totalorder %s62_s26, %s62_s26 }
  0x1d   :  { %p4178_p11 = scmp.ne.s32.totalorder %s62_s26, %s4177_s1  ;;  %p4183_p13 = scmp.lt.s32.totalorder %s4177_s1, %s4177_s1 }
  0x1f   :  { %p4184_p0 = por %p4183_p13, %p4182_p12 }
  0x21   :  { %p4185_p1 = pnand %p4184_p0, %p4178_p11 }
  0x23   :  { %4188 = shalt.err (!%p4185_p1)
}
  0x24   :  { %s4312_s14 = smov 256   ;;  %s4313_s17 = smov 16  }
  0x25   :  { %67 = dma.hbm_to_vmem [thread:$0]  %s5240_s4, 4096, %s62_s26, [#allocation10], %s4312_s14, %s4312_s14, %s4313_s17  }
  0x26   :  { %s4189_s22 = scalar_lea.hbm %s5236_s0, 1024 }
  0x27   :  { %p4190_p2 = scmp.ne.s32.totalorder %s5236_s0, %s4189_s22  ;;  %p4193_p3 = scmp.lt.u32.totalorder %s4189_s22, %s5236_s0 }
  0x29   :  { %p4195_p4 = pnand %p4193_p3, %p4190_p2 }
  0x2b   :  { %4198 = shalt.err (!%p4195_p4)
}
  0x2c   :  { %s4199_s29 = scalar_lea.vmem %s26_s28, 1024  ;;  %p4204_p6 = scmp.lt.s32.totalorder %s26_s28, %s26_s28 }
  0x2d   :  { %p4200_p5 = scmp.ne.s32.totalorder %s26_s28, %s4199_s29  ;;  %p4205_p7 = scmp.lt.s32.totalorder %s4199_s29, %s4199_s29 }
  0x2f   :  { %p4206_p8 = por %p4205_p7, %p4204_p6 }
  0x31   :  { %p4207_p9 = pnand %p4206_p8, %p4200_p5 }
  0x33   :  { %4210 = shalt.err (!%p4207_p9)
}
  0x34   :  { %s4314_s4 = smov 128   ;;  %s4315_s26 = smov 8  }
  0x35   :  { %31 = dma.hbm_to_vmem [thread:$0]  %s5236_s0, 1024, %s26_s28, [#allocation4], %s4314_s4, %s4314_s4, %s4315_s26  }
  0x36   :  { %s4316_s12 = smov [#allocation8]   ;;  %s4317_s15 = smov [#allocation11]  }
  0x37   :  { %s49_s13 = sshll.u32 %s4316_s12, 4  ;;  %s75_s16 = sshll.u32 %s4317_s15, 4  ;;  %s50_s13 = int_to_ptr.vmem [resolvable:$true] %s49_s13  ;;  %s76_s16 = int_to_ptr.vmem [resolvable:$true] %s75_s16 }
  0x38   :  { %s4211_s19 = scalar_lea.hbm %s5239_s3, 2048 }
  0x39   :  { %p4212_p10 = scmp.ne.s32.totalorder %s5239_s3, %s4211_s19  ;;  %p4215_p11 = scmp.lt.u32.totalorder %s4211_s19, %s5239_s3 }
  0x3b   :  { %p4217_p12 = pnand %p4215_p11, %p4212_p10 }
  0x3d   :  { %4220 = shalt.err (!%p4217_p12)
}
  0x3e   :  { %s4221_s0 = scalar_lea.vmem %s50_s13, 2048  ;;  %p4226_p0 = scmp.lt.s32.totalorder %s50_s13, %s50_s13 }
  0x3f   :  { %p4222_p13 = scmp.ne.s32.totalorder %s50_s13, %s4221_s0  ;;  %p4227_p1 = scmp.lt.s32.totalorder %s4221_s0, %s4221_s0 }
  0x41   :  { %p4228_p2 = por %p4227_p1, %p4226_p0 }
  0x43   :  { %p4229_p3 = pnand %p4228_p2, %p4222_p13 }
  0x45   :  { %4232 = shalt.err (!%p4229_p3)
}
  0x46   :  { %55 = dma.hbm_to_vmem [thread:$0]  %s5239_s3, 2048, %s50_s13, [#allocation7], %s4312_s14, %s4312_s14, %s4313_s17  }
  0x47   :  { %s4233_s29 = scalar_lea.hbm %s5242_s6, 4096 }
  0x48   :  { %p4234_p4 = scmp.ne.s32.totalorder %s5242_s6, %s4233_s29  ;;  %p4237_p5 = scmp.lt.u32.totalorder %s4233_s29, %s5242_s6 }
  0x4a   :  { %p4239_p6 = pnand %p4237_p5, %p4234_p4 }
  0x4c   :  { %4242 = shalt.err (!%p4239_p6)
}
  0x4d   :  { %s4243_s1 = scalar_lea.vmem %s76_s16, 4096  ;;  %p4248_p8 = scmp.lt.s32.totalorder %s76_s16, %s76_s16 }
  0x4e   :  { %p4244_p7 = scmp.ne.s32.totalorder %s76_s16, %s4243_s1  ;;  %p4249_p9 = scmp.lt.s32.totalorder %s4243_s1, %s4243_s1 }
  0x50   :  { %p4250_p10 = por %p4249_p9, %p4248_p8 }
  0x52   :  { %p4251_p11 = pnand %p4250_p10, %p4244_p7 }
  0x54   :  { %4254 = shalt.err (!%p4251_p11)
}
  0x55   :  { %81 = dma.hbm_to_vmem [thread:$0]  %s5242_s6, 4096, %s76_s16, [#allocation10], %s4312_s14, %s4312_s14, %s4313_s17  }
  0x56   :  { %s4318_s18 = smov [#allocation12]   ;;  %s4255_s22 = scalar_lea.hbm %s5244_s8, 1024 }
  0x57   :  { %s89_s19 = sshll.u32 %s4318_s18, 4  ;;  %p4256_p12 = scmp.ne.s32.totalorder %s5244_s8, %s4255_s22  ;;  %s90_s19 = int_to_ptr.vmem [resolvable:$true] %s89_s19 }
  0x58   :  { %p4259_p13 = scmp.lt.u32.totalorder %s4255_s22, %s5244_s8 }
  0x5a   :  { %p4261_p0 = pnand %p4259_p13, %p4256_p12 }
  0x5c   :  { %4264 = shalt.err (!%p4261_p0)
}
  0x5d   :  { %s4265_s25 = scalar_lea.vmem %s90_s19, 1024  ;;  %p4270_p2 = scmp.lt.s32.totalorder %s90_s19, %s90_s19 }
  0x5e   :  { %p4266_p1 = scmp.ne.s32.totalorder %s90_s19, %s4265_s25  ;;  %p4271_p3 = scmp.lt.s32.totalorder %s4265_s25, %s4265_s25 }
  0x60   :  { %p4272_p4 = por %p4271_p3, %p4270_p2 }
  0x62   :  { %p4273_p5 = pnand %p4272_p4, %p4266_p1 }
  0x64   :  { %4276 = shalt.err (!%p4273_p5)
}
  0x65   :  { %95 = dma.hbm_to_vmem [thread:$0]  %s5244_s8, 1024, %s90_s19, [#allocation13], %s4314_s4, %s4314_s4, %s4315_s26  }
  0x66   :  { %4299 = dma.done.wait [#allocation4], 1024  }
  0x67   :  { %4300 = vsyncadd [#allocation4], 4294966272 }
  0x68   :  { %4301 = dma.done.wait [#allocation7], 2304  }
  0x69   :  { %4302 = vsyncadd [#allocation7], 4294964992 }
  0x6a   :  { %4303 = dma.done.wait [#allocation10], 8192  }
  0x6b   :  { %4304 = vsyncadd [#allocation10], 4294959104 }
  0x6c   :  { %4305 = dma.done.wait [#allocation13], 1024  }
  0x6d   :  { %4306 = vsyncadd [#allocation13], 4294966272  ;;  %v5247_v0 = vmov 0.0   ;;  %v125_v1 = vld [vmem:[#allocation6 + $0x8] sm:$0xff]  ;;  %v124_v2 = vld [vmem:[#allocation6] sm:$0xff]  ;;  %vm138_vm0 = vcmask 64512   ;;  %v128_v35 = vlaneseq }
  0x6e   :  { %227 = vmatprep.mubr.f32.mxu0 %v5247_v0  ;;  %605 = vmatprep.mubr.f32.mxu1 %v5247_v0  ;;  %v116_v3 = vld [vmem:[#allocation3] sm:$0xff]  ;;  %v295_v4 = vld [vmem:[#allocation8 + $0x8] sm:$0xff]  ;;  %v297_v5 = vld [vmem:[#allocation8 + $0x18] sm:$0xff]  ;;  %s4320_s4 = smov 64   ;;  %vm310_vm1 = vcmask 523264   ;;  %vm4322_vm2 = vmmov 0  }
  0x6f   :  { %163 = vmatprep.subr.mxu0 %v125_v1  ;;  %v294_v6 = vld [vmem:[#allocation8] sm:$0xff]  ;;  %v4468_v7 = vpack.c.bf16 %v297_v5, %v295_v4  ;;  %v296_v8 = vld [vmem:[#allocation8 + $0x10] sm:$0xff]  ;;  %v299_v10 = vld [vmem:[#allocation8 + $0x28] sm:$0xff]  ;;  %v129_v36 = vshrl.u32 %v128_v35, 7  ;;  %s4323_s29 = smov [#allocation14]  }
  0x70   :  { %164 = vmatpush1.msra.mxu0 %v124_v2  ;;  %v4471_v9 = vpack.c.bf16 %v296_v8, %v294_v6  ;;  %v301_v11 = vld [vmem:[#allocation8 + $0x38] sm:$0xff]  ;;  %v298_v12 = vld [vmem:[#allocation8 + $0x20] sm:$0xff]  ;;  %v300_v15 = vld [vmem:[#allocation8 + $0x30] sm:$0xff]  ;;  %s3051_s30 = sshll.u32 %s4323_s29, 4  ;;  %s3052_s30 = int_to_ptr.vmem [resolvable:$true] %s3051_s30 }
  0x71   :  { %3063 = vmatmul.mubr.msk.f32.vlgmr.msra.gmra.mrb[0].mxu0 %vm138_vm0, %v116_v3  ;;  %3159 = vmatprep.subr.bf16.mxu0 %v4468_v7  ;;  %v117_v13 = vld [vmem:[#allocation3 + $0x8] sm:$0xff]  ;;  %v4475_v14 = vpack.c.bf16 %v301_v11, %v299_v10  ;;  %v4478_v16 = vpack.c.bf16 %v300_v15, %v298_v12  ;;  %v303_v17 = vld [vmem:[#allocation8 + $0x48] sm:$0xff]  ;;  %v302_v20 = vld [vmem:[#allocation8 + $0x40] sm:$0xff]  ;;  %v4519_v37 = vsub.s32 1, %v129_v36  ;;  %v4532_v44 = vsub.s32 0, %v129_v36  ;;  %s4277_s11 = scalar_lea.vmem %s3052_s30, 128  ;;  %p4282_p7 = scmp.lt.s32.totalorder %s3052_s30, %s3052_s30 }
  0x72   :  { %233 = vmatprep.mubr.f32.mxu0 %v5247_v0  ;;  %3161 = vmatpush1.bf16.msra.mxu0 %v4471_v9  ;;  %v305_v18 = vld [vmem:[#allocation8 + $0x58] sm:$0xff]  ;;  %v304_v21 = vld [vmem:[#allocation8 + $0x50] sm:$0xff]  ;;  %v307_v22 = vld [vmem:[#allocation8 + $0x68] sm:$0xff]  ;;  %p4278_p6 = scmp.ne.s32.totalorder %s3052_s30, %s4277_s11  ;;  %p4283_p8 = scmp.lt.s32.totalorder %s4277_s11, %s4277_s11 }
  0x73   :  { %3163 = vmatprep.subr.bf16.mxu0 %v4475_v14  ;;  %v4481_v19 = vpack.c.bf16 %v305_v18, %v303_v17  ;;  %v309_v23 = vld [vmem:[#allocation8 + $0x78] sm:$0xff]  ;;  %v118_v24 = vld [vmem:[#allocation3 + $0x10] sm:$0xff]  ;;  %v4486_v25 = vpack.c.bf16 %v304_v21, %v302_v20  ;;  %v308_v28 = vld [vmem:[#allocation8 + $0x70] sm:$0xff] }
  0x74   :  { %v4489_v26 = vpack.c.bf16 %v309_v23, %v307_v22  ;;  %v306_v27 = vld [vmem:[#allocation8 + $0x60] sm:$0xff]  ;;  %v119_v29 = vld [vmem:[#allocation3 + $0x18] sm:$0xff]  ;;  %v120_v31 = vld [vmem:[#allocation3 + $0x20] sm:$0xff]  ;;  %p4284_p9 = por %p4283_p8, %p4282_p7 }
  0x75   :  { %3064 = vmatmul.mubr.msk.f32.gmra.mrb[2].mxu0 %vm138_vm0, %v117_v13  ;;  %v4494_v30 = vpack.c.bf16 %v308_v28, %v306_v27  ;;  %v121_v32 = vld [vmem:[#allocation3 + $0x28] sm:$0xff]  ;;  %v122_v33 = vld [vmem:[#allocation3 + $0x30] sm:$0xff]  ;;  %v123_v34 = vld [vmem:[#allocation3 + $0x38] sm:$0xff] }
  0x76   :  { %239 = vmatprep.mubr.f32.mxu0 %v5247_v0  ;;  %3165 = vmatpush1.bf16.msra.mxu0 %v4478_v16  ;;  %v126_v38 = vld [vmem:[%s5238_s2] sm:$0x3]  ;;  %v498_v53 = vld [vmem:[#allocation9 + $0x8] sm:$0xff]  ;;  %v500_v54 = vld [vmem:[#allocation9 + $0x18] sm:$0xff]  ;;  %p4285_p10 = pnand %p4284_p9, %p4278_p6 }
  0x77   :  { %3167 = vmatprep.subr.bf16.mxu0 %v4481_v19  ;;  %5271 = vst [vmem:[#allocation20_spill] sm:$0xff] %v4494_v30  ;;  %v4525_v39 = vrot.slane %v126_v38, %v4519_v37  ;;  %v4535_v45 = vrot.slane %v126_v38, %v4532_v44  ;;  %v497_v55 = vld [vmem:[#allocation9] sm:$0xff]  ;;  %v4542_v56 = vpack.c.bf16 %v500_v54, %v498_v53  ;;  %v499_v57 = vld [vmem:[#allocation9 + $0x10] sm:$0xff]  ;;  %v502_v58 = vld [vmem:[#allocation9 + $0x28] sm:$0xff] }
  0x78   :  { %v504_v59 = vld [vmem:[#allocation9 + $0x38] sm:$0xff]  ;;  %v4544_v60 = vpack.c.bf16 %v499_v57, %v497_v55  ;;  %v501_v62 = vld [vmem:[#allocation9 + $0x20] sm:$0xff]  ;;  %v503_v63 = vld [vmem:[#allocation9 + $0x30] sm:$0xff] }
  0x79   :  { %3065 = vmatmul.mubr.msk.f32.gmra.mrb[4].mxu0 %vm138_vm0, %v118_v24  ;;  %5272 = vst [vmem:[#allocation21_spill] sm:$0xff] %v4525_v39  ;;  %5273 = vst [vmem:[#allocation22_spill] sm:$0xff] %v4542_v56  ;;  %v4546_v61 = vpack.c.bf16 %v504_v59, %v502_v58  ;;  %v506_v1 = vld [vmem:[#allocation9 + $0x48] sm:$0xff]  ;;  %3191 = vmatprep.subr.bf16.mxu1 %v4542_v56  ;;  %v508_v2 = vld [vmem:[#allocation9 + $0x58] sm:$0xff]  ;;  %v4550_v3 = vpack.c.bf16 %v503_v63, %v501_v62 }
  0x7a   :  { %245 = vmatprep.mubr.f32.mxu0 %v5247_v0  ;;  %3169 = vmatpush1.bf16.msra.mxu0 %v4486_v25  ;;  %v4553_v4 = vpack.c.bf16 %v508_v2, %v506_v1  ;;  %v505_v5 = vld [vmem:[#allocation9 + $0x40] sm:$0xff]  ;;  %v507_v6 = vld [vmem:[#allocation9 + $0x50] sm:$0xff]  ;;  %v510_v8 = vld [vmem:[#allocation9 + $0x68] sm:$0xff] }
  0x7b   :  { %3171 = vmatprep.subr.bf16.mxu0 %v4489_v26  ;;  %3193 = vmatpush1.bf16.msra.mxu1 %v4544_v60  ;;  %v512_v10 = vld [vmem:[#allocation9 + $0x78] sm:$0xff]  ;;  %v4556_v11 = vpack.c.bf16 %v507_v6, %v505_v5  ;;  %v509_v13 = vld [vmem:[#allocation9 + $0x60] sm:$0xff]  ;;  %v511_v15 = vld [vmem:[#allocation9 + $0x70] sm:$0xff] }
  0x7c   :  { %3195 = vmatprep.subr.bf16.mxu1 %v4546_v61  ;;  %v4559_v12 = vpack.c.bf16 %v512_v10, %v510_v8  ;;  %v514_v17 = vld [vmem:[#allocation9 + $0x88] sm:$0xff]  ;;  %v516_v18 = vld [vmem:[#allocation9 + $0x98] sm:$0xff]  ;;  %v4562_v20 = vpack.c.bf16 %v511_v15, %v509_v13  ;;  %v513_v22 = vld [vmem:[#allocation9 + $0x80] sm:$0xff] }
  0x7d   :  { %3066 = vmatmul.mubr.msk.f32.gmra.mrb[6].mxu0 %vm138_vm0, %v119_v29  ;;  %v4565_v21 = vpack.c.bf16 %v516_v18, %v514_v17  ;;  %v515_v23 = vld [vmem:[#allocation9 + $0x90] sm:$0xff]  ;;  %v518_v24 = vld [vmem:[#allocation9 + $0xa8] sm:$0xff]  ;;  %v520_v27 = vld [vmem:[#allocation9 + $0xb8] sm:$0xff] }
  0x7e   :  { %251 = vmatprep.mubr.f32.mxu0 %v5247_v0  ;;  %3173 = vmatpush1.bf16.msra.mxu0 %v4494_v30  ;;  %v4568_v28 = vpack.c.bf16 %v515_v23, %v513_v22  ;;  %v4571_v29 = vpack.c.bf16 %v520_v27, %v518_v24  ;;  %v521_v38 = vld [vmem:[#allocation9 + $0xc0] sm:$0xff] }
  0x7f   :  { %3175 = vmatprep.subr.bf16.mxu0 %v4468_v7  ;;  %3197 = vmatpush1.bf16.msra.mxu1 %v4550_v3 }
  0x80   :  { %3199 = vmatprep.subr.bf16.mxu1 %v4553_v4 }
  0x81   :  { %3067 = vmatmul.mubr.msk.f32.gmra.mrb[8].mxu0 %vm138_vm0, %v120_v31  ;;  %v517_v31 = vld [vmem:[#allocation9 + $0xa0] sm:$0xff] }
  0x82   :  { %257 = vmatprep.mubr.f32.mxu0 %v5247_v0 }
  0x83   :  { %3201 = vmatpush1.bf16.msra.mxu1 %v4556_v11 }
  0x84   :  { %3203 = vmatprep.subr.bf16.mxu1 %v4559_v12 }
  0x85   :  { %3068 = vmatmul.mubr.msk.f32.gmra.mrb[10].mxu0 %vm138_vm0, %v121_v32  ;;  %v519_v32 = vld [vmem:[#allocation9 + $0xb0] sm:$0xff] }
  0x86   :  { %263 = vmatprep.mubr.f32.mxu0 %v5247_v0  ;;  %v4574_v35 = vpack.c.bf16 %v519_v32, %v517_v31 }
  0x87   :  { %3205 = vmatpush1.bf16.msra.mxu1 %v4562_v20 }
  0x88   :  { %3207 = vmatprep.subr.bf16.mxu1 %v4565_v21 }
  0x89   :  { %3069 = vmatmul.mubr.msk.f32.gmra.mrb[12].mxu0 %vm138_vm0, %v122_v33  ;;  %v522_v33 = vld [vmem:[#allocation9 + $0xc8] sm:$0xff] }
  0x8a   :  { %269 = vmatprep.mubr.f32.mxu0 %v5247_v0 }
  0x8b   :  { %3209 = vmatpush1.bf16.msra.mxu1 %v4568_v28 }
  0x8c   :  { %3211 = vmatprep.subr.bf16.mxu1 %v4571_v29 }
  0x8d   :  { %3070 = vmatmul.mubr.msk.f32.gmra.mrb[14].mxu0 %vm138_vm0, %v123_v34  ;;  %v524_v34 = vld [vmem:[#allocation9 + $0xd8] sm:$0xff] }
  0x8e   :  { %378 = vmatprep.mubr.f32.mxu0 %v5247_v0  ;;  %v4577_v36 = vpack.c.bf16 %v524_v34, %v522_v33 }
  0x8f   :  { %3213 = vmatpush1.bf16.msra.mxu1 %v4574_v35 }
  0x90   :  { %3215 = vmatprep.subr.bf16.mxu1 %v4577_v36 }
  0x91   :  { %379 = vmatmul.mubr.f32.vlgmr.msra.gmra.mrb[0].mxu0 %v5247_v0 }
  0x92   :  { %3177 = vmatpush1.bf16.msra.mxu0 %v4471_v9  ;;  %487 = vmatprep.mubr.f32.mxu0 %v5247_v0 }
  0x93   :  { %3179 = vmatprep.subr.bf16.mxu0 %v4475_v14 }
  0x96   :  { %3181 = vmatpush1.bf16.msra.mxu0 %v4478_v16 }
  0x97   :  { %3183 = vmatprep.subr.bf16.mxu0 %v4481_v19 }
  0x9a   :  { %3185 = vmatpush1.bf16.msra.mxu0 %v4486_v25 }
  0x9b   :  { %3187 = vmatprep.subr.bf16.mxu0 %v4489_v26 }
  0x9e   :  { %3189 = vmatpush1.bf16.msra.mxu0 %v4494_v30 }
  0x9f   :  { %3223 = vmatprep.subr.bf16.mxu0 %v4468_v7 }
 0x164   :  { %v380_v40 = vpop.f32.mrb[0].mxu0 }
 0x165   :  { %v382_v41 = vpop.f32.mrb[1].mxu0  ;;  %v3810_v46 = vadd.f32 %v380_v40, %v4535_v45  ;;  %v523_v40 = vld [vmem:[#allocation9 + $0xd0] sm:$0xff] }
 0x166   :  { %v4528_v42 = vadd.f32 %v382_v41, %v4525_v39  ;;  %v526_v41 = vld [vmem:[#allocation9 + $0xe8] sm:$0xff] }
 0x167   :  { %v3071_v47 = vmul.f32 -1.442695, %v3810_v46  ;;  %v4580_v46 = vpack.c.bf16 %v523_v40, %v521_v38 }
 0x168   :  { %3857 = vtanh.f32 %v4528_v42  ;;  %v3072_v57 = vmul.f32 -1.442695, %v4528_v42  ;;  %v529_v42 = vld [vmem:[%s5241_s5] sm:$0x3] }
 0x169   :  { %3859 = vpow2.f32 %v3071_v47  ;;  %5274 = vst [vmem:[#allocation23_spill] sm:$0xff] %v4580_v46  ;;  %3217 = vmatpush1.bf16.msra.mxu1 %v4580_v46  ;;  %v4628_v6 = vrot.slane %v529_v42, %v4519_v37  ;;  %v4636_v22 = vrot.slane %v529_v42, %v4532_v44 }
 0x16b   :  { %5277 = vst [vmem:[#allocation26_spill] sm:$0xff] %v4628_v6 }
 0x172   :  { %v3858_v43 = vpop.eup %3857 }
 0x173   :  { %402 = vrot.lane.b32.xlu0 %v3858_v43, %s4320_s4  ;;  %v3860_v48 = vpop.eup %3859  ;;  %v528_v43 = vld [vmem:[#allocation9 + $0xf8] sm:$0xff] }
 0x174   :  { %v390_v49 = vadd.f32 1.0, %v3860_v48  ;;  %v4583_v47 = vpack.c.bf16 %v528_v43, %v526_v41  ;;  %v525_v48 = vld [vmem:[#allocation9 + $0xe0] sm:$0xff] }
 0x176   :  { %3861 = vrcp.f32 %v390_v49  ;;  %5275 = vst [vmem:[#allocation24_spill] sm:$0xff] %v4583_v47  ;;  %v527_v49 = vld [vmem:[#allocation9 + $0xf0] sm:$0xff]  ;;  %3219 = vmatprep.subr.bf16.mxu1 %v4583_v47 }
 0x180   :  { %v4538_v50 = vpop.eup %3861 }
 0x1e5   :  { %v403_v51 = vpop.permute.xlu0 %402 }
 0x1e6   :  { %v405_v52 = vmul.f32 %v4538_v50, %v403_v51  ;;  %v4586_v51 = vpack.c.bf16 %v527_v49, %v525_v48 }
 0x1e8   :  { %407 = vrot.lane.b32.xlu0 %v405_v52, %s4320_s4  ;;  %5276 = vst [vmem:[#allocation25_spill] sm:$0xff] %v4586_v51  ;;  %3221 = vmatpush1.bf16.msra.mxu1 %v4586_v51  ;;  %v400_v52 = vmul.f32 0.0, %v4538_v50 }
 0x1e9   :  { %3239 = vmatprep.subr.bf16.mxu1 %v4542_v56 }
 0x25a   :  { %v408_v53 = vpop.permute.xlu0 %407 }
 0x25b   :  { %v4592_v54 = vadd.f32 %v408_v53, %v400_v52 }
 0x25d   :  { %3863 = vtanh.f32 %v4592_v54 }
 0x25e   :  { %3865 = vpow2.f32 %v3072_v57 }
 0x267   :  { %v3864_v55 = vpop.eup %3863 }
 0x268   :  { %413 = vrot.lane.b32.xlu1 %v3864_v55, %s4320_s4  ;;  %v3866_v58 = vpop.eup %3865 }
 0x269   :  { %v396_v59 = vadd.f32 1.0, %v3866_v58 }
 0x26b   :  { %3867 = vrcp.f32 %v396_v59 }
 0x275   :  { %v3868_v62 = vpop.eup %3867 }
 0x2da   :  { %v414_v63 = vpop.permute.xlu1 %413 }
 0x2db   :  { %v416_v1 = vmul.f32 %v3868_v62, %v414_v63 }
 0x2dd   :  { %3073 = vmatmul.mubr.msk.f32.vlgmr.msra.gmra.mrb[2].mxu0 %vm310_vm1, %v416_v1  ;;  %3074 = vmatmul.mubr.msk.f32.vlgmr.msra.gmra.mrb[0].mxu1 %vm310_vm1, %v416_v1 }
 0x2de   :  { %3225 = vmatpush1.bf16.msra.mxu0 %v4471_v9  ;;  %742 = vmatprep.mubr.f32.mxu0 %v5247_v0 }
 0x2df   :  { %3227 = vmatprep.subr.bf16.mxu0 %v4475_v14  ;;  %3241 = vmatpush1.bf16.msra.mxu1 %v4544_v60 }
 0x2e0   :  { %3243 = vmatprep.subr.bf16.mxu1 %v4546_v61  ;;  %820 = vmatprep.mubr.f32.mxu1 %v5247_v0 }
 0x2e2   :  { %3229 = vmatpush1.bf16.msra.mxu0 %v4478_v16 }
 0x2e3   :  { %3231 = vmatprep.subr.bf16.mxu0 %v4481_v19  ;;  %3245 = vmatpush1.bf16.msra.mxu1 %v4550_v3 }
 0x2e4   :  { %3247 = vmatprep.subr.bf16.mxu1 %v4553_v4 }
 0x2e6   :  { %3233 = vmatpush1.bf16.msra.mxu0 %v4486_v25 }
 0x2e7   :  { %3235 = vmatprep.subr.bf16.mxu0 %v4489_v26  ;;  %3249 = vmatpush1.bf16.msra.mxu1 %v4556_v11 }
 0x2e8   :  { %3251 = vmatprep.subr.bf16.mxu1 %v4559_v12 }
 0x2ea   :  { %3237 = vmatpush1.bf16.msra.mxu0 %v4494_v30 }
 0x2eb   :  { %3253 = vmatpush1.bf16.msra.mxu1 %v4562_v20  ;;  %3303 = vmatprep.subr.bf16.mxu0 %v4468_v7 }
 0x2ec   :  { %3255 = vmatprep.subr.bf16.mxu1 %v4565_v21 }
 0x2ef   :  { %3257 = vmatpush1.bf16.msra.mxu1 %v4568_v28 }
 0x2f0   :  { %3259 = vmatprep.subr.bf16.mxu1 %v4571_v29 }
 0x2f3   :  { %3261 = vmatpush1.bf16.msra.mxu1 %v4574_v35 }
 0x2f4   :  { %3263 = vmatprep.subr.bf16.mxu1 %v4577_v36 }
 0x2f7   :  { %3265 = vmatpush1.bf16.msra.mxu1 %v4580_v46 }
 0x2f8   :  { %3267 = vmatprep.subr.bf16.mxu1 %v4583_v47 }
 0x2fb   :  { %3269 = vmatpush1.bf16.msra.mxu1 %v4586_v51 }
 0x3b0   :  { %v489_v50 = vpop.f32.mrb[2].mxu0  ;;  %v607_v2 = vpop.f32.mrb[0].mxu1 }
 0x3b1   :  { %v491_v5 = vpop.f32.mrb[3].mxu0  ;;  %v609_v8 = vpop.f32.mrb[1].mxu1  ;;  %v3812_v18 = vadd.f32 %v489_v50, %v4535_v45  ;;  %v608_v24 = vadd.f32 %v607_v2, %v4636_v22 }
 0x3b2   :  { %v3813_v10 = vadd.f32 %v491_v5, %v4525_v39  ;;  %v610_v13 = vadd.f32 %v609_v8, %v4628_v6  ;;  %v829_v8 = vld [vmem:[#allocation11 + $0x8] sm:$0xff] }
 0x3b3   :  { %v3075_v23 = vmul.f32 -1.442695, %v3812_v18  ;;  %v3077_v27 = vmul.f32 -1.442695, %v608_v24 }
 0x3b4   :  { %3869 = vtanh.f32 %v3813_v10  ;;  %v3076_v1 = vmul.f32 -1.442695, %v3813_v10 }
 0x3b5   :  { %3871 = vtanh.f32 %v610_v13 }
 0x3b6   :  { %3873 = vpow2.f32 %v3075_v23 }
 0x3b7   :  { %3875 = vpow2.f32 %v3077_v27 }
 0x3be   :  { %v3870_v15 = vpop.eup %3869 }
 0x3bf   :  { %627 = vrot.lane.b32.xlu0 %v3870_v15, %s4320_s4  ;;  %v3872_v17 = vpop.eup %3871  ;;  %v831_v15 = vld [vmem:[#allocation11 + $0x18] sm:$0xff] }
 0x3c0   :  { %657 = vrot.lane.b32.xlu1 %v3872_v17, %s4320_s4  ;;  %v3874_v31 = vpop.eup %3873  ;;  %v4650_v17 = vpack.c.bf16 %v831_v15, %v829_v8  ;;  %v845_v8 = vld [vmem:[#allocation11 + $0x88] sm:$0xff]  ;;  %v847_v15 = vld [vmem:[#allocation11 + $0x98] sm:$0xff] }
 0x3c1   :  { %v615_v32 = vadd.f32 1.0, %v3874_v31  ;;  %v3876_v33 = vpop.eup %3875  ;;  %v828_v31 = vld [vmem:[#allocation11] sm:$0xff] }
 0x3c2   :  { %v645_v34 = vadd.f32 1.0, %v3876_v33  ;;  %3271 = vmatprep.subr.bf16.mxu1 %v4650_v17  ;;  %v833_v33 = vld [vmem:[#allocation11 + $0x28] sm:$0xff] }
 0x3c3   :  { %3877 = vrcp.f32 %v615_v32  ;;  %v830_v32 = vld [vmem:[#allocation11 + $0x10] sm:$0xff] }
 0x3c4   :  { %3879 = vrcp.f32 %v645_v34  ;;  %v835_v34 = vld [vmem:[#allocation11 + $0x38] sm:$0xff] }
 0x3cd   :  { %v3878_v38 = vpop.eup %3877 }
 0x3ce   :  { %v3880_v43 = vpop.eup %3879  ;;  %v625_v52 = vmul.f32 %v3878_v38, %v4592_v54  ;;  %v3078_v54 = vmul.f32 -1.442695, %v610_v13 }
 0x3cf   :  { %v655_v57 = vmul.f32 0.0, %v3880_v43 }
 0x431   :  { %v628_v40 = vpop.permute.xlu0 %627 }
 0x432   :  { %v630_v41 = vmul.f32 %v3878_v38, %v628_v40  ;;  %v658_v48 = vpop.permute.xlu1 %657  ;;  %v4667_v38 = vpack.c.bf16 %v830_v32, %v828_v31  ;;  %v851_v31 = vld [vmem:[#allocation11 + $0xb8] sm:$0xff] }
 0x433   :  { %v660_v49 = vmul.f32 %v3880_v43, %v658_v48  ;;  %v832_v43 = vld [vmem:[#allocation11 + $0x20] sm:$0xff]  ;;  %v834_v48 = vld [vmem:[#allocation11 + $0x30] sm:$0xff] }
 0x434   :  { %632 = vrot.lane.b32.xlu0 %v630_v41, %s4320_s4  ;;  %v4669_v41 = vpack.c.bf16 %v835_v34, %v833_v33  ;;  %v848_v34 = vld [vmem:[#allocation11 + $0xa0] sm:$0xff] }
 0x435   :  { %662 = vrot.lane.b32.xlu1 %v660_v49, %s4320_s4 }
 0x4a6   :  { %v633_v53 = vpop.permute.xlu0 %632 }
 0x4a7   :  { %v4642_v55 = vadd.f32 %v633_v53, %v625_v52  ;;  %v663_v58 = vpop.permute.xlu1 %662  ;;  %v837_v52 = vld [vmem:[#allocation11 + $0x48] sm:$0xff]  ;;  %v839_v53 = vld [vmem:[#allocation11 + $0x58] sm:$0xff] }
 0x4a8   :  { %v4645_v59 = vadd.f32 %v663_v58, %v655_v57  ;;  %v4673_v57 = vpack.c.bf16 %v834_v48, %v832_v43  ;;  %v4677_v58 = vpack.c.bf16 %v839_v53, %v837_v52  ;;  %v853_v43 = vld [vmem:[#allocation11 + $0xc8] sm:$0xff]  ;;  %v855_v48 = vld [vmem:[#allocation11 + $0xd8] sm:$0xff]  ;;  %v852_v53 = vld [vmem:[#allocation11 + $0xc0] sm:$0xff] }
 0x4a9   :  { %3881 = vtanh.f32 %v4642_v55  ;;  %v4701_v52 = vpack.c.bf16 %v855_v48, %v853_v43 }
 0x4aa   :  { %3883 = vtanh.f32 %v4645_v59 }
 0x4ab   :  { %3885 = vpow2.f32 %v3076_v1  ;;  %v841_v1 = vld [vmem:[#allocation11 + $0x68] sm:$0xff] }
 0x4ac   :  { %3887 = vpow2.f32 %v3078_v54  ;;  %v843_v54 = vld [vmem:[#allocation11 + $0x78] sm:$0xff] }
 0x4b3   :  { %v3882_v62 = vpop.eup %3881 }
 0x4b4   :  { %638 = vrot.lane.b32.xlu0 %v3882_v62, %s4320_s4  ;;  %v3884_v63 = vpop.eup %3883  ;;  %v836_v62 = vld [vmem:[#allocation11 + $0x40] sm:$0xff] }
 0x4b5   :  { %668 = vrot.lane.b32.xlu1 %v3884_v63, %s4320_s4  ;;  %v3886_v42 = vpop.eup %3885  ;;  %v838_v63 = vld [vmem:[#allocation11 + $0x50] sm:$0xff] }
 0x4b6   :  { %v621_v50 = vadd.f32 1.0, %v3886_v42  ;;  %v3888_v2 = vpop.eup %3887  ;;  %v4680_v42 = vpack.c.bf16 %v838_v63, %v836_v62  ;;  %v854_v62 = vld [vmem:[#allocation11 + $0xd0] sm:$0xff]  ;;  %v857_v63 = vld [vmem:[#allocation11 + $0xe8] sm:$0xff] }
 0x4b7   :  { %v651_v5 = vadd.f32 1.0, %v3888_v2  ;;  %v840_v2 = vld [vmem:[#allocation11 + $0x60] sm:$0xff] }
 0x4b8   :  { %3889 = vrcp.f32 %v621_v50  ;;  %v4683_v50 = vpack.c.bf16 %v843_v54, %v841_v1  ;;  %v859_v1 = vld [vmem:[#allocation11 + $0xf8] sm:$0xff]  ;;  %v4704_v54 = vpack.c.bf16 %v854_v62, %v852_v53  ;;  %v860_v62 = vld [vmem:[%s5243_s7] sm:$0x3] }
 0x4b9   :  { %3891 = vrcp.f32 %v651_v5  ;;  %v842_v5 = vld [vmem:[#allocation11 + $0x70] sm:$0xff] }
 0x4ba   :  { %5278 = vst [vmem:[#allocation27_spill] sm:$0xff] %v4704_v54 }
 0x4c2   :  { %v3890_v18 = vpop.eup %3889 }
 0x4c3   :  { %v3892_v10 = vpop.eup %3891 }
 0x526   :  { %v639_v23 = vpop.permute.xlu0 %638 }
 0x527   :  { %v641_v24 = vmul.f32 %v3890_v18, %v639_v23  ;;  %v669_v13 = vpop.permute.xlu1 %668  ;;  %v4686_v18 = vpack.c.bf16 %v842_v5, %v840_v2  ;;  %v4689_v23 = vpack.c.bf16 %v847_v15, %v845_v8  ;;  %v4707_v2 = vpack.c.bf16 %v859_v1, %v857_v63  ;;  %v856_v5 = vld [vmem:[#allocation11 + $0xe0] sm:$0xff]  ;;  %v858_v8 = vld [vmem:[#allocation11 + $0xf0] sm:$0xff] }
 0x528   :  { %v4657_v27 = vmul.f32 %v3892_v10, %v669_v13  ;;  %v846_v10 = vld [vmem:[#allocation11 + $0x90] sm:$0xff]  ;;  %v849_v13 = vld [vmem:[#allocation11 + $0xa8] sm:$0xff]  ;;  %v4710_v15 = vpack.c.bf16 %v858_v8, %v856_v5  ;;  %v4746_v63 = vrot.slane %v860_v62, %v4519_v37 }
 0x529   :  { %3079 = vmatmul.mubr.msk.f32.vlgmr.msra.gmra.mrb[4].mxu0 %vm310_vm1, %v641_v24  ;;  %v4695_v33 = vpack.c.bf16 %v851_v31, %v849_v13  ;;  %5279 = vst [vmem:[#allocation28_spill] sm:$0xff] %v4707_v2 }
 0x52a   :  { %3305 = vmatpush1.bf16.msra.mxu0 %v4471_v9  ;;  %1103 = vmatprep.mubr.f32.mxu0 %v5247_v0  ;;  %5280 = vst [vmem:[#allocation29_spill] sm:$0xff] %v4710_v15  ;;  %5281 = vst [vmem:[#allocation30_spill] sm:$0xff] %v4746_v63 }
 0x52b   :  { %3307 = vmatprep.subr.bf16.mxu0 %v4475_v14  ;;  %752 = vrot.lane.b32.xlu1 %v4657_v27, %s4320_s4 }
 0x52e   :  { %3309 = vmatpush1.bf16.msra.mxu0 %v4478_v16 }
 0x52f   :  { %3311 = vmatprep.subr.bf16.mxu0 %v4481_v19 }
 0x532   :  { %3313 = vmatpush1.bf16.msra.mxu0 %v4486_v25 }
 0x533   :  { %3315 = vmatprep.subr.bf16.mxu0 %v4489_v26 }
 0x536   :  { %3317 = vmatpush1.bf16.msra.mxu0 %v4494_v30 }
 0x537   :  { %3319 = vmatprep.subr.bf16.mxu0 %v4542_v56 }
 0x59d   :  { %v753_v40 = vpop.permute.xlu1 %752 }
 0x59e   :  { %v755_v49 = vsel %vm310_vm1, %v641_v24, %v753_v40  ;;  %v844_v24 = vld [vmem:[#allocation11 + $0x80] sm:$0xff]  ;;  %v850_v40 = vld [vmem:[#allocation11 + $0xb0] sm:$0xff] }
 0x59f   :  { %821 = vmatmul.mubr.f32.vlgmr.msra.gmra.mrb[2].mxu1 %v755_v49  ;;  %v4692_v32 = vpack.c.bf16 %v846_v10, %v844_v24  ;;  %v4698_v49 = vpack.c.bf16 %v850_v40, %v848_v34 }
 0x5a0   :  { %3273 = vmatpush1.bf16.msra.mxu1 %v4667_v38  ;;  %936 = vmatprep.mubr.f32.mxu1 %v5247_v0 }
 0x5a1   :  { %3275 = vmatprep.subr.bf16.mxu1 %v4669_v41 }
 0x5a4   :  { %3277 = vmatpush1.bf16.msra.mxu1 %v4673_v57 }
 0x5a5   :  { %3279 = vmatprep.subr.bf16.mxu1 %v4677_v58 }
 0x5a8   :  { %3281 = vmatpush1.bf16.msra.mxu1 %v4680_v42 }
 0x5a9   :  { %3283 = vmatprep.subr.bf16.mxu1 %v4683_v50 }
 0x5ac   :  { %3285 = vmatpush1.bf16.msra.mxu1 %v4686_v18 }
 0x5ad   :  { %3287 = vmatprep.subr.bf16.mxu1 %v4689_v23 }
 0x5b0   :  { %3289 = vmatpush1.bf16.msra.mxu1 %v4692_v32 }
 0x5b1   :  { %3291 = vmatprep.subr.bf16.mxu1 %v4695_v33 }
 0x5b4   :  { %3293 = vmatpush1.bf16.msra.mxu1 %v4698_v49 }
 0x5b5   :  { %3295 = vmatprep.subr.bf16.mxu1 %v4701_v52 }
 0x5b8   :  { %3297 = vmatpush1.bf16.msra.mxu1 %v4704_v54 }
 0x5b9   :  { %3299 = vmatprep.subr.bf16.mxu1 %v4707_v2 }
 0x5bc   :  { %3301 = vmatpush1.bf16.msra.mxu1 %v4710_v15 }
 0x5bd   :  { %3351 = vmatprep.subr.bf16.mxu1 %v4650_v17 }
 0x5bf   :  { %3080 = vmatmul.mubr.msk.f32.vlgmr.msra.gmra.mrb[4].mxu1 %vm310_vm1, %v4657_v27 }
 0x5c0   :  { %3353 = vmatpush1.bf16.msra.mxu1 %v4667_v38  ;;  %1257 = vmatprep.mubr.f32.mxu1 %v5247_v0 }
 0x5c1   :  { %3355 = vmatprep.subr.bf16.mxu1 %v4669_v41 }
 0x5c4   :  { %3357 = vmatpush1.bf16.msra.mxu1 %v4673_v57 }
 0x5c5   :  { %3359 = vmatprep.subr.bf16.mxu1 %v4677_v58 }
 0x5c8   :  { %3361 = vmatpush1.bf16.msra.mxu1 %v4680_v42 }
 0x5c9   :  { %3363 = vmatprep.subr.bf16.mxu1 %v4683_v50 }
 0x5cc   :  { %3365 = vmatpush1.bf16.msra.mxu1 %v4686_v18 }
 0x5cd   :  { %3367 = vmatprep.subr.bf16.mxu1 %v4689_v23 }
 0x5d0   :  { %3369 = vmatpush1.bf16.msra.mxu1 %v4692_v32 }
 0x5d1   :  { %3371 = vmatprep.subr.bf16.mxu1 %v4695_v33 }
 0x5d4   :  { %3373 = vmatpush1.bf16.msra.mxu1 %v4698_v49 }
 0x5d5   :  { %3375 = vmatprep.subr.bf16.mxu1 %v4701_v52 }
 0x5d8   :  { %3377 = vmatpush1.bf16.msra.mxu1 %v4704_v54 }
 0x5d9   :  { %3379 = vmatprep.subr.bf16.mxu1 %v4707_v2 }
 0x5dc   :  { %3381 = vmatpush1.bf16.msra.mxu1 %v4710_v15 }
 0x5dd   :  { %3399 = vmatprep.subr.bf16.mxu1 %v4542_v56 }
 0x5fc   :  { %v744_v27 = vpop.f32.mrb[4].mxu0 }
 0x5fd   :  { %v746_v24 = vpop.f32.mrb[5].mxu0  ;;  %v3814_v43 = vadd.f32 %v744_v27, %v4535_v45 }
 0x5fe   :  { %v3815_v10 = vadd.f32 %v746_v24, %v4525_v39 }
 0x5ff   :  { %v3081_v53 = vmul.f32 -1.442695, %v3814_v43 }
 0x600   :  { %3893 = vtanh.f32 %v3815_v10 }
 0x60a   :  { %v3894_v13 = vpop.eup %3893 }
 0x60b   :  { %958 = vrot.lane.b32.xlu1 %v3894_v13, %s4320_s4 }
 0x672   :  { %v822_v31 = vpop.f32.mrb[2].mxu1 }
 0x673   :  { %v824_v34 = vpop.f32.mrb[3].mxu1  ;;  %v823_v37 = vadd.f32 %v822_v31, %v4636_v22 }
 0x674   :  { %v4737_v40 = vadd.f32 %v824_v34, %v4628_v6 }
 0x676   :  { %3895 = vtanh.f32 %v4737_v40 }
 0x677   :  { %3897 = vpow2.f32 %v3081_v53  ;;  %v3083_v53 = vmul.f32 -1.442695, %v823_v37 }
 0x67d   :  { %v959_v34 = vpop.permute.xlu1 %958 }
 0x680   :  { %v3896_v48 = vpop.eup %3895 }
 0x681   :  { %988 = vrot.lane.b32.xlu0 %v3896_v48, %s4320_s4  ;;  %v3898_v1 = vpop.eup %3897 }
 0x682   :  { %v946_v24 = vadd.f32 1.0, %v3898_v1 }
 0x692   :  { %v938_v5 = vpop.f32.mrb[4].mxu1 }
 0x693   :  { %v940_v8 = vpop.f32.mrb[5].mxu1 }
 0x694   :  { %v4749_v13 = vadd.f32 %v940_v8, %v4746_v63  ;;  %v4756_v8 = vrot.slane %v860_v62, %v4532_v44 }
 0x696   :  { %3899 = vtanh.f32 %v4749_v13 }
 0x697   :  { %3901 = vrcp.f32 %v946_v24  ;;  %v939_v24 = vadd.f32 %v938_v5, %v4756_v8 }
 0x698   :  { %3903 = vpow2.f32 %v3083_v53 }
 0x699   :  { %v3085_v54 = vmul.f32 -1.442695, %v939_v24 }
 0x6a0   :  { %v3900_v27 = vpop.eup %3899 }
 0x6a1   :  { %1018 = vrot.lane.b32.xlu0 %v3900_v27, %s4320_s4  ;;  %v3902_v43 = vpop.eup %3901 }
 0x6a2   :  { %v961_v48 = vmul.f32 %v3902_v43, %v959_v34  ;;  %v3904_v0 = vpop.eup %3903 }
 0x6a3   :  { %v976_v1 = vadd.f32 1.0, %v3904_v0  ;;  %v956_v0 = vmul.f32 %v3902_v43, %v4642_v55 }
 0x6a5   :  { %963 = vrot.lane.b32.xlu0 %v961_v48, %s4320_s4  ;;  %3905 = vrcp.f32 %v976_v1 }
 0x6a6   :  { %3907 = vpow2.f32 %v3085_v54 }
 0x6af   :  { %v3906_v15 = vpop.eup %3905 }
 0x6b0   :  { %v3908_v34 = vpop.eup %3907  ;;  %v986_v54 = vmul.f32 %v3906_v15, %v4645_v59 }
 0x6b1   :  { %v1006_v48 = vadd.f32 1.0, %v3908_v34 }
 0x6b3   :  { %3909 = vrcp.f32 %v1006_v48 }
 0x6bd   :  { %v3910_v31 = vpop.eup %3909 }
 0x6be   :  { %v1016_v43 = vmul.f32 0.0, %v3910_v31 }
 0x6f3   :  { %v989_v2 = vpop.permute.xlu0 %988 }
 0x6f4   :  { %v991_v27 = vmul.f32 %v3906_v15, %v989_v2 }
 0x6f6   :  { %993 = vrot.lane.b32.xlu1 %v991_v27, %s4320_s4  ;;  %v3082_v27 = vmul.f32 -1.442695, %v3815_v10  ;;  %v5282_v10 = vmov 0.0  }
 0x713   :  { %v1019_v37 = vpop.permute.xlu0 %1018 }
 0x714   :  { %v1021_v53 = vmul.f32 %v3910_v31, %v1019_v37  ;;  %v3084_v31 = vmul.f32 -1.442695, %v4737_v40 }
 0x716   :  { %1023 = vrot.lane.b32.xlu1 %v1021_v53, %s4320_s4 }
 0x717   :  { %v964_v44 = vpop.permute.xlu0 %963 }
 0x718   :  { %v4762_v62 = vadd.f32 %v964_v44, %v956_v0 }
 0x71a   :  { %3911 = vtanh.f32 %v4762_v62 }
 0x724   :  { %v3912_v5 = vpop.eup %3911 }
 0x725   :  { %969 = vrot.lane.b32.xlu1 %v3912_v5, %s4320_s4 }
 0x768   :  { %v994_v2 = vpop.permute.xlu1 %993 }
 0x769   :  { %v4767_v1 = vadd.f32 %v994_v2, %v986_v54 }
 0x76b   :  { %3913 = vtanh.f32 %v4767_v1 }
 0x76c   :  { %3915 = vpow2.f32 %v3082_v27 }
 0x775   :  { %v3914_v24 = vpop.eup %3913 }
 0x776   :  { %999 = vrot.lane.b32.xlu0 %v3914_v24, %s4320_s4  ;;  %v3916_v55 = vpop.eup %3915  ;;  %v3086_v24 = vmul.f32 -1.442695, %v4749_v13 }
 0x777   :  { %v952_v48 = vadd.f32 1.0, %v3916_v55 }
 0x788   :  { %v1024_v34 = vpop.permute.xlu1 %1023 }
 0x789   :  { %v4771_v37 = vadd.f32 %v1024_v34, %v1016_v43 }
 0x78b   :  { %3917 = vtanh.f32 %v4771_v37 }
 0x78c   :  { %3919 = vrcp.f32 %v952_v48 }
 0x78d   :  { %3921 = vpow2.f32 %v3084_v31 }
 0x795   :  { %v3918_v59 = vpop.eup %3917 }
 0x796   :  { %1029 = vrot.lane.b32.xlu0 %v3918_v59, %s4320_s4  ;;  %v3920_v15 = vpop.eup %3919 }
 0x797   :  { %v970_v53 = vpop.permute.xlu1 %969  ;;  %v3922_v44 = vpop.eup %3921 }
 0x798   :  { %v972_v0 = vmul.f32 %v3920_v15, %v970_v53  ;;  %v982_v5 = vadd.f32 1.0, %v3922_v44 }
 0x79a   :  { %3087 = vmatmul.mubr.msk.f32.vlgmr.msra.gmra.mrb[6].mxu0 %vm310_vm1, %v972_v0  ;;  %3923 = vrcp.f32 %v982_v5 }
 0x79b   :  { %3321 = vmatpush1.bf16.msra.mxu0 %v4544_v60  ;;  %1181 = vmatprep.mubr.f32.mxu0 %v5282_v10  ;;  %3925 = vpow2.f32 %v3086_v24 }
 0x79c   :  { %3323 = vmatprep.subr.bf16.mxu0 %v4546_v61 }
 0x79f   :  { %3325 = vmatpush1.bf16.msra.mxu0 %v4550_v3 }
 0x7a0   :  { %3327 = vmatprep.subr.bf16.mxu0 %v4553_v4 }
 0x7a3   :  { %3329 = vmatpush1.bf16.msra.mxu0 %v4556_v11 }
 0x7a4   :  { %3331 = vmatprep.subr.bf16.mxu0 %v4559_v12  ;;  %v3924_v54 = vpop.eup %3923 }
 0x7a5   :  { %v3926_v55 = vpop.eup %3925 }
 0x7a6   :  { %v1012_v43 = vadd.f32 1.0, %v3926_v55 }
 0x7a7   :  { %3333 = vmatpush1.bf16.msra.mxu0 %v4562_v20 }
 0x7a8   :  { %3335 = vmatprep.subr.bf16.mxu0 %v4565_v21  ;;  %3927 = vrcp.f32 %v1012_v43 }
 0x7ab   :  { %3337 = vmatpush1.bf16.msra.mxu0 %v4568_v28 }
 0x7ac   :  { %3339 = vmatprep.subr.bf16.mxu0 %v4571_v29 }
 0x7af   :  { %3341 = vmatpush1.bf16.msra.mxu0 %v4574_v35 }
 0x7b0   :  { %3343 = vmatprep.subr.bf16.mxu0 %v4577_v36 }
 0x7b2   :  { %v3928_v34 = vpop.eup %3927 }
 0x7b3   :  { %3345 = vmatpush1.bf16.msra.mxu0 %v4580_v46 }
 0x7b4   :  { %3347 = vmatprep.subr.bf16.mxu0 %v4583_v47 }
 0x7b7   :  { %3349 = vmatpush1.bf16.msra.mxu0 %v4586_v51 }
 0x7b8   :  { %3383 = vmatprep.subr.bf16.mxu0 %v4468_v7 }
 0x7e8   :  { %v1000_v2 = vpop.permute.xlu0 %999 }
 0x7e9   :  { %v1002_v27 = vmul.f32 %v3924_v54, %v1000_v2 }
 0x7eb   :  { %1113 = vrot.lane.b32.xlu1 %v1002_v27, %s4320_s4 }
 0x808   :  { %v1030_v48 = vpop.permute.xlu0 %1029 }
 0x809   :  { %v1032_v59 = vmul.f32 %v3928_v34, %v1030_v48 }
 0x80b   :  { %1189 = vrot.lane.b32.xlu0 %v1032_v59, %s4320_s4 }
 0x85d   :  { %v1114_v40 = vpop.permute.xlu1 %1113 }
 0x85e   :  { %v1116_v15 = vsel %vm310_vm1, %v972_v0, %v1114_v40 }
 0x85f   :  { %1182 = vmatmul.mubr.f32.vlgmr.msra.gmra.mrb[16].mxu0 %v1116_v15 }
 0x860   :  { %3385 = vmatpush1.bf16.msra.mxu0 %v4471_v9  ;;  %1424 = vmatprep.mubr.f32.mxu0 %v5282_v10 }
 0x861   :  { %3387 = vmatprep.subr.bf16.mxu0 %v4475_v14 }
 0x864   :  { %3389 = vmatpush1.bf16.msra.mxu0 %v4478_v16 }
 0x865   :  { %3391 = vmatprep.subr.bf16.mxu0 %v4481_v19 }
 0x868   :  { %3393 = vmatpush1.bf16.msra.mxu0 %v4486_v25 }
 0x869   :  { %3395 = vmatprep.subr.bf16.mxu0 %v4489_v26 }
 0x86c   :  { %3397 = vmatpush1.bf16.msra.mxu0 %v4494_v30 }
 0x86d   :  { %v1105_v13 = vpop.f32.mrb[6].mxu0  ;;  %3431 = vmatprep.subr.bf16.mxu0 %v4650_v17 }
 0x86e   :  { %v1107_v53 = vpop.f32.mrb[7].mxu0  ;;  %v3816_v40 = vadd.f32 %v1105_v13, %v4535_v45 }
 0x86f   :  { %v3817_v2 = vadd.f32 %v1107_v53, %v4525_v39 }
 0x870   :  { %v3088_v53 = vmul.f32 -1.442695, %v3816_v40 }
 0x87d   :  { %v1190_v0 = vpop.permute.xlu0 %1189 }
 0x87e   :  { %v1192_v31 = vsel %vm310_vm1, %v1002_v27, %v1190_v0 }
 0x87f   :  { %1258 = vmatmul.mubr.f32.vlgmr.msra.gmra.mrb[6].mxu1 %v1192_v31 }
 0x880   :  { %3401 = vmatpush1.bf16.msra.mxu1 %v4544_v60  ;;  %1502 = vmatprep.mubr.f32.mxu1 %v5282_v10 }
 0x881   :  { %3403 = vmatprep.subr.bf16.mxu1 %v4546_v61 }
 0x884   :  { %3405 = vmatpush1.bf16.msra.mxu1 %v4550_v3 }
 0x885   :  { %3407 = vmatprep.subr.bf16.mxu1 %v4553_v4 }
 0x888   :  { %3409 = vmatpush1.bf16.msra.mxu1 %v4556_v11 }
 0x889   :  { %3411 = vmatprep.subr.bf16.mxu1 %v4559_v12 }
 0x88c   :  { %3413 = vmatpush1.bf16.msra.mxu1 %v4562_v20 }
 0x88d   :  { %3415 = vmatprep.subr.bf16.mxu1 %v4565_v21 }
 0x890   :  { %3417 = vmatpush1.bf16.msra.mxu1 %v4568_v28 }
 0x891   :  { %3419 = vmatprep.subr.bf16.mxu1 %v4571_v29 }
 0x894   :  { %3421 = vmatpush1.bf16.msra.mxu1 %v4574_v35 }
 0x895   :  { %3423 = vmatprep.subr.bf16.mxu1 %v4577_v36 }
 0x898   :  { %3425 = vmatpush1.bf16.msra.mxu1 %v4580_v46 }
 0x899   :  { %3427 = vmatprep.subr.bf16.mxu1 %v4583_v47 }
 0x89c   :  { %3429 = vmatpush1.bf16.msra.mxu1 %v4586_v51 }
 0x89d   :  { %3479 = vmatprep.subr.bf16.mxu1 %v4542_v56 }
 0x932   :  { %v1183_v44 = vpop.f32.mrb[16].mxu0 }
 0x933   :  { %v1185_v5 = vpop.f32.mrb[17].mxu0  ;;  %v1184_v59 = vadd.f32 %v1183_v44, %v4636_v22 }
 0x934   :  { %v1186_v54 = vadd.f32 %v1185_v5, %v4628_v6 }
 0x935   :  { %v3090_v15 = vmul.f32 -1.442695, %v1184_v59 }
 0x936   :  { %3929 = vtanh.f32 %v1186_v54 }
 0x937   :  { %3931 = vtanh.f32 %v3817_v2 }
 0x940   :  { %v3930_v24 = vpop.eup %3929 }
 0x941   :  { %1309 = vrot.lane.b32.xlu1 %v3930_v24, %s4320_s4  ;;  %v3932_v27 = vpop.eup %3931 }
 0x945   :  { %1279 = vrot.lane.b32.xlu1 %v3932_v27, %s4320_s4 }
 0x952   :  { %v1259_v55 = vpop.f32.mrb[6].mxu1 }
 0x953   :  { %v1261_v43 = vpop.f32.mrb[7].mxu1  ;;  %v1260_v27 = vadd.f32 %v1259_v55, %v4756_v8 }
 0x954   :  { %v4830_v34 = vadd.f32 %v1261_v43, %v4746_v63 }
 0x955   :  { %v3092_v39 = vmul.f32 -1.442695, %v1260_v27 }
 0x956   :  { %3933 = vtanh.f32 %v4830_v34 }
 0x957   :  { %3935 = vpow2.f32 %v3090_v15 }
 0x958   :  { %3937 = vpow2.f32 %v3088_v53 }
 0x960   :  { %v3934_v48 = vpop.eup %3933 }
 0x961   :  { %1339 = vrot.lane.b32.xlu0 %v3934_v48, %s4320_s4  ;;  %v3936_v0 = vpop.eup %3935 }
 0x962   :  { %v1297_v31 = vadd.f32 1.0, %v3936_v0  ;;  %v3938_v5 = vpop.eup %3937 }
 0x963   :  { %v1267_v24 = vadd.f32 1.0, %v3938_v5 }
 0x964   :  { %3939 = vrcp.f32 %v1297_v31 }
 0x965   :  { %3941 = vrcp.f32 %v1267_v24 }
 0x966   :  { %3943 = vpow2.f32 %v3092_v39 }
 0x96e   :  { %v3940_v43 = vpop.eup %3939 }
 0x96f   :  { %v3942_v44 = vpop.eup %3941  ;;  %v1307_v55 = vmul.f32 %v3940_v43, %v4767_v1 }
 0x970   :  { %v3944_v40 = vpop.eup %3943  ;;  %v1277_v39 = vmul.f32 %v3942_v44, %v4762_v62  ;;  %v3091_v62 = vmul.f32 -1.442695, %v1186_v54 }
 0x971   :  { %v1327_v15 = vadd.f32 1.0, %v3944_v40 }
 0x973   :  { %3945 = vrcp.f32 %v1327_v15 }
 0x97d   :  { %v3946_v53 = vpop.eup %3945 }
 0x97e   :  { %v1337_v1 = vmul.f32 %v3946_v53, %v4771_v37 }
 0x9b3   :  { %v1310_v63 = vpop.permute.xlu1 %1309 }
 0x9b4   :  { %v1312_v48 = vmul.f32 %v3940_v43, %v1310_v63 }
 0x9b6   :  { %1314 = vrot.lane.b32.xlu0 %v1312_v48, %s4320_s4 }
 0x9b7   :  { %v1280_v13 = vpop.permute.xlu1 %1279 }
 0x9b8   :  { %v1282_v59 = vmul.f32 %v3942_v44, %v1280_v13  ;;  %v3089_v44 = vmul.f32 -1.442695, %v3817_v2 }
 0x9ba   :  { %1284 = vrot.lane.b32.xlu0 %v1282_v59, %s4320_s4 }
 0x9d3   :  { %v1340_v0 = vpop.permute.xlu0 %1339 }
 0x9d4   :  { %v1342_v31 = vmul.f32 %v3946_v53, %v1340_v0  ;;  %v3093_v53 = vmul.f32 -1.442695, %v4830_v34 }
 0x9d6   :  { %1344 = vrot.lane.b32.xlu1 %v1342_v31, %s4320_s4 }
 0xa28   :  { %v1315_v5 = vpop.permute.xlu0 %1314 }
 0xa29   :  { %v4841_v63 = vadd.f32 %v1315_v5, %v1307_v55 }
 0xa2b   :  { %3947 = vtanh.f32 %v4841_v63 }
 0xa2c   :  { %v1285_v24 = vpop.permute.xlu0 %1284 }
 0xa2d   :  { %v4845_v27 = vadd.f32 %v1285_v24, %v1277_v39 }
 0xa2f   :  { %3949 = vtanh.f32 %v4845_v27 }
 0xa35   :  { %v3948_v48 = vpop.eup %3947 }
 0xa36   :  { %1320 = vrot.lane.b32.xlu1 %v3948_v48, %s4320_s4 }
 0xa39   :  { %v3950_v13 = vpop.eup %3949 }
 0xa3a   :  { %1290 = vrot.lane.b32.xlu1 %v3950_v13, %s4320_s4 }
 0xa48   :  { %v1345_v43 = vpop.permute.xlu1 %1344 }
 0xa49   :  { %v4851_v59 = vadd.f32 %v1345_v43, %v1337_v1  ;;  %v5283_v43 = vld [vmem:[#allocation27_spill] sm:$0xff] }
 0xa4b   :  { %3951 = vtanh.f32 %v4851_v59 }
 0xa4c   :  { %3953 = vpow2.f32 %v3091_v62  ;;  %v5284_v62 = vld [vmem:[#allocation28_spill] sm:$0xff] }
 0xa4d   :  { %3955 = vpow2.f32 %v3089_v44  ;;  %v5285_v44 = vld [vmem:[#allocation29_spill] sm:$0xff] }
 0xa55   :  { %v3952_v40 = vpop.eup %3951 }
 0xa56   :  { %1350 = vrot.lane.b32.xlu0 %v3952_v40, %s4320_s4  ;;  %v3954_v15 = vpop.eup %3953 }
 0xa57   :  { %v1303_v0 = vadd.f32 1.0, %v3954_v15  ;;  %v3956_v31 = vpop.eup %3955 }
 0xa58   :  { %v1273_v55 = vadd.f32 1.0, %v3956_v31 }
 0xa59   :  { %3957 = vrcp.f32 %v1303_v0 }
 0xa5a   :  { %3959 = vrcp.f32 %v1273_v55 }
 0xa5b   :  { %3961 = vpow2.f32 %v3093_v53 }
 0xa63   :  { %v3958_v5 = vpop.eup %3957 }
 0xa64   :  { %v3960_v24 = vpop.eup %3959 }
 0xa65   :  { %v3962_v2 = vpop.eup %3961 }
 0xa66   :  { %v1333_v34 = vadd.f32 1.0, %v3962_v2 }
 0xa68   :  { %3963 = vrcp.f32 %v1333_v34 }
 0xa72   :  { %v3964_v13 = vpop.eup %3963 }
 0xaa8   :  { %v1321_v37 = vpop.permute.xlu1 %1320 }
 0xaa9   :  { %v1323_v39 = vmul.f32 %v3958_v5, %v1321_v37 }
 0xaab   :  { %1434 = vrot.lane.b32.xlu0 %v1323_v39, %s4320_s4 }
 0xaac   :  { %v1291_v48 = vpop.permute.xlu1 %1290 }
 0xaad   :  { %v1293_v54 = vmul.f32 %v3960_v24, %v1291_v48  ;;  %v5286_v48 = vld [vmem:[#allocation21_spill] sm:$0xff] }
 0xaaf   :  { %3094 = vmatmul.mubr.msk.f32.vlgmr.msra.gmra.mrb[8].mxu0 %vm310_vm1, %v1293_v54 }
 0xab0   :  { %3433 = vmatpush1.bf16.msra.mxu0 %v4667_v38  ;;  %1578 = vmatprep.mubr.f32.mxu0 %v5282_v10 }
 0xab1   :  { %3435 = vmatprep.subr.bf16.mxu0 %v4669_v41 }
 0xab4   :  { %3437 = vmatpush1.bf16.msra.mxu0 %v4673_v57 }
 0xab5   :  { %3439 = vmatprep.subr.bf16.mxu0 %v4677_v58 }
 0xab8   :  { %3441 = vmatpush1.bf16.msra.mxu0 %v4680_v42 }
 0xab9   :  { %3443 = vmatprep.subr.bf16.mxu0 %v4683_v50 }
 0xabc   :  { %3445 = vmatpush1.bf16.msra.mxu0 %v4686_v18 }
 0xabd   :  { %3447 = vmatprep.subr.bf16.mxu0 %v4689_v23 }
 0xac0   :  { %3449 = vmatpush1.bf16.msra.mxu0 %v4692_v32 }
 0xac1   :  { %3451 = vmatprep.subr.bf16.mxu0 %v4695_v33 }
 0xac4   :  { %3453 = vmatpush1.bf16.msra.mxu0 %v4698_v49 }
 0xac5   :  { %3455 = vmatprep.subr.bf16.mxu0 %v4701_v52 }
 0xac8   :  { %v1351_v1 = vpop.permute.xlu0 %1350  ;;  %3457 = vmatpush1.bf16.msra.mxu0 %v5283_v43 }
 0xac9   :  { %v1353_v40 = vmul.f32 %v3964_v13, %v1351_v1  ;;  %3459 = vmatprep.subr.bf16.mxu0 %v5284_v62 }
 0xacb   :  { %1510 = vrot.lane.b32.xlu1 %v1353_v40, %s4320_s4  ;;  %v5287_v40 = vld [vmem:[#allocation30_spill] sm:$0xff] }
 0xacc   :  { %3461 = vmatpush1.bf16.msra.mxu0 %v5285_v44 }
 0xacd   :  { %3463 = vmatprep.subr.bf16.mxu0 %v4468_v7 }
 0xb1d   :  { %v1435_v15 = vpop.permute.xlu0 %1434 }
 0xb1e   :  { %v1437_v0 = vsel %vm310_vm1, %v1293_v54, %v1435_v15 }
 0xb1f   :  { %1503 = vmatmul.mubr.f32.vlgmr.msra.gmra.mrb[8].mxu1 %v1437_v0 }
 0xb20   :  { %3481 = vmatpush1.bf16.msra.mxu1 %v4544_v60  ;;  %1823 = vmatprep.mubr.f32.mxu1 %v5282_v10 }
 0xb21   :  { %3483 = vmatprep.subr.bf16.mxu1 %v4546_v61 }
 0xb24   :  { %3485 = vmatpush1.bf16.msra.mxu1 %v4550_v3 }
 0xb25   :  { %3487 = vmatprep.subr.bf16.mxu1 %v4553_v4 }
 0xb28   :  { %3489 = vmatpush1.bf16.msra.mxu1 %v4556_v11 }
 0xb29   :  { %3491 = vmatprep.subr.bf16.mxu1 %v4559_v12 }
 0xb2c   :  { %3493 = vmatpush1.bf16.msra.mxu1 %v4562_v20 }
 0xb2d   :  { %3495 = vmatprep.subr.bf16.mxu1 %v4565_v21 }
 0xb30   :  { %3497 = vmatpush1.bf16.msra.mxu1 %v4568_v28 }
 0xb31   :  { %3499 = vmatprep.subr.bf16.mxu1 %v4571_v29 }
 0xb34   :  { %3501 = vmatpush1.bf16.msra.mxu1 %v4574_v35 }
 0xb35   :  { %3503 = vmatprep.subr.bf16.mxu1 %v4577_v36 }
 0xb38   :  { %3505 = vmatpush1.bf16.msra.mxu1 %v4580_v46 }
 0xb39   :  { %3507 = vmatprep.subr.bf16.mxu1 %v4583_v47 }
 0xb3c   :  { %3509 = vmatpush1.bf16.msra.mxu1 %v4586_v51 }
 0xb3d   :  { %v1511_v31 = vpop.permute.xlu1 %1510  ;;  %3559 = vmatprep.subr.bf16.mxu1 %v4542_v56 }
 0xb3e   :  { %v1513_v55 = vsel %vm310_vm1, %v1323_v39, %v1511_v31 }
 0xb3f   :  { %1579 = vmatmul.mubr.f32.vlgmr.msra.gmra.mrb[18].mxu0 %v1513_v55 }
 0xb40   :  { %3465 = vmatpush1.bf16.msra.mxu0 %v4471_v9  ;;  %1745 = vmatprep.mubr.f32.mxu0 %v5282_v10 }
 0xb41   :  { %3467 = vmatprep.subr.bf16.mxu0 %v4475_v14 }
 0xb44   :  { %3469 = vmatpush1.bf16.msra.mxu0 %v4478_v16 }
 0xb45   :  { %3471 = vmatprep.subr.bf16.mxu0 %v4481_v19 }
 0xb48   :  { %3473 = vmatpush1.bf16.msra.mxu0 %v4486_v25 }
 0xb49   :  { %3475 = vmatprep.subr.bf16.mxu0 %v4489_v26 }
 0xb4c   :  { %3477 = vmatpush1.bf16.msra.mxu0 %v4494_v30 }
 0xb4d   :  { %3511 = vmatprep.subr.bf16.mxu0 %v4650_v17 }
 0xb82   :  { %v1426_v5 = vpop.f32.mrb[8].mxu0 }
 0xb83   :  { %v1428_v37 = vpop.f32.mrb[9].mxu0  ;;  %v3818_v55 = vadd.f32 %v1426_v5, %v4535_v45 }
 0xb84   :  { %v3819_v54 = vadd.f32 %v1428_v37, %v5286_v48 }
 0xbf2   :  { %v1504_v53 = vpop.f32.mrb[8].mxu1 }
 0xbf3   :  { %v1506_v39 = vpop.f32.mrb[9].mxu1  ;;  %v1505_v31 = vadd.f32 %v1504_v53, %v4636_v22 }
 0xbf4   :  { %v1507_v24 = vadd.f32 %v1506_v39, %v4628_v6  ;;  %v3095_v39 = vmul.f32 -1.442695, %v3818_v55 }
 0xbf5   :  { %v3097_v37 = vmul.f32 -1.442695, %v1505_v31 }
 0xbf6   :  { %3965 = vtanh.f32 %v1507_v24 }
 0xbf7   :  { %3967 = vtanh.f32 %v3819_v54 }
 0xc00   :  { %v3966_v2 = vpop.eup %3965 }
 0xc01   :  { %1630 = vrot.lane.b32.xlu0 %v3966_v2, %s4320_s4  ;;  %v3968_v34 = vpop.eup %3967 }
 0xc05   :  { %1600 = vrot.lane.b32.xlu0 %v3968_v34, %s4320_s4 }
 0xc12   :  { %v1580_v13 = vpop.f32.mrb[18].mxu0 }
 0xc13   :  { %v1582_v1 = vpop.f32.mrb[19].mxu0 }
 0xc14   :  { %v4909_v15 = vadd.f32 %v1582_v1, %v5287_v40  ;;  %v1581_v1 = vadd.f32 %v1580_v13, %v4756_v8 }
 0xc16   :  { %3969 = vtanh.f32 %v4909_v15  ;;  %v3099_v30 = vmul.f32 -1.442695, %v1581_v1 }
 0xc17   :  { %3971 = vpow2.f32 %v3097_v37 }
 0xc18   :  { %3973 = vpow2.f32 %v3095_v39 }
 0xc20   :  { %v3970_v0 = vpop.eup %3969 }
 0xc21   :  { %1660 = vrot.lane.b32.xlu1 %v3970_v0, %s4320_s4  ;;  %v3972_v2 = vpop.eup %3971 }
 0xc22   :  { %v1618_v34 = vadd.f32 1.0, %v3972_v2  ;;  %v3974_v56 = vpop.eup %3973 }
 0xc23   :  { %v1588_v48 = vadd.f32 1.0, %v3974_v56 }
 0xc24   :  { %3975 = vrcp.f32 %v1618_v34 }
 0xc25   :  { %3977 = vrcp.f32 %v1588_v48 }
 0xc26   :  { %3979 = vpow2.f32 %v3099_v30 }
 0xc2e   :  { %v3976_v40 = vpop.eup %3975 }
 0xc2f   :  { %v3978_v53 = vpop.eup %3977  ;;  %v1628_v13 = vmul.f32 %v3976_v40, %v4841_v63 }
 0xc30   :  { %v3980_v55 = vpop.eup %3979  ;;  %v1598_v30 = vmul.f32 %v3978_v53, %v4845_v27  ;;  %v3098_v27 = vmul.f32 -1.442695, %v1507_v24 }
 0xc31   :  { %v1648_v37 = vadd.f32 1.0, %v3980_v55 }
 0xc33   :  { %3981 = vrcp.f32 %v1648_v37 }
 0xc3d   :  { %v3982_v56 = vpop.eup %3981 }
 0xc3e   :  { %v1658_v63 = vmul.f32 %v3982_v56, %v4851_v59 }
 0xc73   :  { %v1631_v6 = vpop.permute.xlu0 %1630 }
 0xc74   :  { %v1633_v0 = vmul.f32 %v3976_v40, %v1631_v6 }
 0xc76   :  { %1635 = vrot.lane.b32.xlu1 %v1633_v0, %s4320_s4 }
 0xc77   :  { %v1601_v5 = vpop.permute.xlu0 %1600 }
 0xc78   :  { %v1603_v31 = vmul.f32 %v3978_v53, %v1601_v5  ;;  %v3096_v53 = vmul.f32 -1.442695, %v3819_v54 }
 0xc7a   :  { %1605 = vrot.lane.b32.xlu1 %v1603_v31, %s4320_s4 }
 0xc93   :  { %v1661_v39 = vpop.permute.xlu1 %1660 }
 0xc94   :  { %v1663_v48 = vmul.f32 %v3982_v56, %v1661_v39  ;;  %v3100_v56 = vmul.f32 -1.442695, %v4909_v15 }
 0xc96   :  { %1665 = vrot.lane.b32.xlu0 %v1663_v48, %s4320_s4 }
 0xce8   :  { %v1636_v2 = vpop.permute.xlu1 %1635 }
 0xce9   :  { %v4920_v6 = vadd.f32 %v1636_v2, %v1628_v13 }
 0xceb   :  { %3983 = vtanh.f32 %v4920_v6 }
 0xcec   :  { %v1606_v34 = vpop.permute.xlu1 %1605 }
 0xced   :  { %v4924_v1 = vadd.f32 %v1606_v34, %v1598_v30 }
 0xcef   :  { %3985 = vtanh.f32 %v4924_v1 }
 0xcf5   :  { %v3984_v0 = vpop.eup %3983 }
 0xcf6   :  { %1641 = vrot.lane.b32.xlu0 %v3984_v0, %s4320_s4 }
 0xcf9   :  { %v3986_v5 = vpop.eup %3985 }
 0xcfa   :  { %1611 = vrot.lane.b32.xlu0 %v3986_v5, %s4320_s4 }
 0xd08   :  { %v1666_v40 = vpop.permute.xlu0 %1665 }
 0xd09   :  { %v4930_v31 = vadd.f32 %v1666_v40, %v1658_v63 }
 0xd0b   :  { %3987 = vtanh.f32 %v4930_v31 }
 0xd0c   :  { %3989 = vpow2.f32 %v3098_v27 }
 0xd0d   :  { %3991 = vpow2.f32 %v3096_v53 }
 0xd15   :  { %v3988_v55 = vpop.eup %3987 }
 0xd16   :  { %1671 = vrot.lane.b32.xlu1 %v3988_v55, %s4320_s4  ;;  %v3990_v37 = vpop.eup %3989 }
 0xd17   :  { %v1624_v39 = vadd.f32 1.0, %v3990_v37  ;;  %v3992_v48 = vpop.eup %3991 }
 0xd18   :  { %v1594_v13 = vadd.f32 1.0, %v3992_v48 }
 0xd19   :  { %3993 = vrcp.f32 %v1624_v39  ;;  %v5288_v39 = vld [vmem:[#allocation20_spill] sm:$0xff] }
 0xd1a   :  { %3995 = vrcp.f32 %v1594_v13 }
 0xd1b   :  { %3997 = vpow2.f32 %v3100_v56  ;;  %v5289_v56 = vld [vmem:[#allocation26_spill] sm:$0xff] }
 0xd23   :  { %v3994_v2 = vpop.eup %3993 }
 0xd24   :  { %v3996_v34 = vpop.eup %3995 }
 0xd25   :  { %v3998_v54 = vpop.eup %3997 }
 0xd26   :  { %v1654_v15 = vadd.f32 1.0, %v3998_v54 }
 0xd28   :  { %3999 = vrcp.f32 %v1654_v15 }
 0xd32   :  { %v4000_v5 = vpop.eup %3999 }
 0xd68   :  { %v1642_v59 = vpop.permute.xlu0 %1641 }
 0xd69   :  { %v1644_v30 = vmul.f32 %v3994_v2, %v1642_v59 }
 0xd6b   :  { %1755 = vrot.lane.b32.xlu1 %v1644_v30, %s4320_s4 }
 0xd6c   :  { %v1612_v0 = vpop.permute.xlu0 %1611 }
 0xd6d   :  { %v1614_v24 = vmul.f32 %v3996_v34, %v1612_v0  ;;  %v5290_v34 = vld [vmem:[#allocation21_spill] sm:$0xff] }
 0xd6f   :  { %3101 = vmatmul.mubr.msk.f32.vlgmr.msra.gmra.mrb[10].mxu0 %vm310_vm1, %v1614_v24 }
 0xd70   :  { %3513 = vmatpush1.bf16.msra.mxu0 %v4667_v38  ;;  %1899 = vmatprep.mubr.f32.mxu0 %v5282_v10 }
 0xd71   :  { %3515 = vmatprep.subr.bf16.mxu0 %v4669_v41 }
 0xd74   :  { %3517 = vmatpush1.bf16.msra.mxu0 %v4673_v57 }
 0xd75   :  { %3519 = vmatprep.subr.bf16.mxu0 %v4677_v58 }
 0xd78   :  { %3521 = vmatpush1.bf16.msra.mxu0 %v4680_v42 }
 0xd79   :  { %3523 = vmatprep.subr.bf16.mxu0 %v4683_v50 }
 0xd7c   :  { %3525 = vmatpush1.bf16.msra.mxu0 %v4686_v18 }
 0xd7d   :  { %3527 = vmatprep.subr.bf16.mxu0 %v4689_v23 }
 0xd80   :  { %3529 = vmatpush1.bf16.msra.mxu0 %v4692_v32 }
 0xd81   :  { %3531 = vmatprep.subr.bf16.mxu0 %v4695_v33 }
 0xd84   :  { %3533 = vmatpush1.bf16.msra.mxu0 %v4698_v49 }
 0xd85   :  { %3535 = vmatprep.subr.bf16.mxu0 %v4701_v52 }
 0xd88   :  { %v1672_v63 = vpop.permute.xlu1 %1671  ;;  %3537 = vmatpush1.bf16.msra.mxu0 %v5283_v43 }
 0xd89   :  { %v1674_v40 = vmul.f32 %v4000_v5, %v1672_v63  ;;  %3539 = vmatprep.subr.bf16.mxu0 %v5284_v62  ;;  %v5291_v63 = vld [vmem:[#allocation30_spill] sm:$0xff] }
 0xd8b   :  { %1831 = vrot.lane.b32.xlu0 %v1674_v40, %s4320_s4 }
 0xd8c   :  { %3541 = vmatpush1.bf16.msra.mxu0 %v5285_v44 }
 0xd8d   :  { %3543 = vmatprep.subr.bf16.mxu0 %v4468_v7 }
 0xddd   :  { %v1756_v55 = vpop.permute.xlu1 %1755 }
 0xdde   :  { %v1758_v27 = vsel %vm310_vm1, %v1614_v24, %v1756_v55 }
 0xddf   :  { %1824 = vmatmul.mubr.f32.vlgmr.msra.gmra.mrb[10].mxu1 %v1758_v27 }
 0xde0   :  { %3561 = vmatpush1.bf16.msra.mxu1 %v4544_v60  ;;  %2144 = vmatprep.mubr.f32.mxu1 %v5282_v10 }
 0xde1   :  { %3563 = vmatprep.subr.bf16.mxu1 %v4546_v61 }
 0xde4   :  { %3565 = vmatpush1.bf16.msra.mxu1 %v4550_v3 }
 0xde5   :  { %3567 = vmatprep.subr.bf16.mxu1 %v4553_v4 }
 0xde8   :  { %3569 = vmatpush1.bf16.msra.mxu1 %v4556_v11 }
 0xde9   :  { %3571 = vmatprep.subr.bf16.mxu1 %v4559_v12 }
 0xdec   :  { %3573 = vmatpush1.bf16.msra.mxu1 %v4562_v20 }
 0xded   :  { %3575 = vmatprep.subr.bf16.mxu1 %v4565_v21 }
 0xdf0   :  { %3577 = vmatpush1.bf16.msra.mxu1 %v4568_v28 }
 0xdf1   :  { %3579 = vmatprep.subr.bf16.mxu1 %v4571_v29 }
 0xdf4   :  { %3581 = vmatpush1.bf16.msra.mxu1 %v4574_v35 }
 0xdf5   :  { %3583 = vmatprep.subr.bf16.mxu1 %v4577_v36 }
 0xdf8   :  { %3585 = vmatpush1.bf16.msra.mxu1 %v4580_v46 }
 0xdf9   :  { %3587 = vmatprep.subr.bf16.mxu1 %v4583_v47 }
 0xdfc   :  { %3589 = vmatpush1.bf16.msra.mxu1 %v4586_v51 }
 0xdfd   :  { %v1832_v53 = vpop.permute.xlu0 %1831  ;;  %3591 = vmatprep.subr.bf16.mxu1 %v4650_v17 }
 0xdfe   :  { %v1834_v37 = vsel %vm310_vm1, %v1644_v30, %v1832_v53 }
 0xdff   :  { %1900 = vmatmul.mubr.f32.vlgmr.msra.gmra.mrb[20].mxu0 %v1834_v37 }
 0xe00   :  { %3545 = vmatpush1.bf16.msra.mxu0 %v4471_v9  ;;  %2066 = vmatprep.mubr.f32.mxu0 %v5282_v10 }
 0xe01   :  { %3547 = vmatprep.subr.bf16.mxu0 %v4475_v14 }
 0xe04   :  { %3549 = vmatpush1.bf16.msra.mxu0 %v4478_v16 }
 0xe05   :  { %3551 = vmatprep.subr.bf16.mxu0 %v4481_v19 }
 0xe08   :  { %3553 = vmatpush1.bf16.msra.mxu0 %v4486_v25 }
 0xe09   :  { %3555 = vmatprep.subr.bf16.mxu0 %v4489_v26 }
 0xe0c   :  { %3557 = vmatpush1.bf16.msra.mxu0 %v5288_v39 }
 0xe0d   :  { %3623 = vmatprep.subr.bf16.mxu0 %v4468_v7 }
 0xe42   :  { %v1747_v48 = vpop.f32.mrb[10].mxu0 }
 0xe43   :  { %v1749_v13 = vpop.f32.mrb[11].mxu0  ;;  %v3820_v27 = vadd.f32 %v1747_v48, %v4535_v45 }
 0xe44   :  { %v3821_v0 = vadd.f32 %v1749_v13, %v5290_v34 }
 0xe45   :  { %v3102_v37 = vmul.f32 -1.442695, %v3820_v27 }
 0xeb2   :  { %v1825_v2 = vpop.f32.mrb[10].mxu1 }
 0xeb3   :  { %v1827_v59 = vpop.f32.mrb[11].mxu1  ;;  %v1826_v55 = vadd.f32 %v1825_v2, %v4636_v22 }
 0xeb4   :  { %v1828_v30 = vadd.f32 %v1827_v59, %v5289_v56 }
 0xeb5   :  { %v3104_v53 = vmul.f32 -1.442695, %v1826_v55 }
 0xeb6   :  { %4001 = vtanh.f32 %v1828_v30 }
 0xeb7   :  { %4003 = vtanh.f32 %v3821_v0 }
 0xec0   :  { %v4002_v24 = vpop.eup %4001 }
 0xec1   :  { %1951 = vrot.lane.b32.xlu1 %v4002_v24, %s4320_s4  ;;  %v4004_v54 = vpop.eup %4003 }
 0xec5   :  { %1921 = vrot.lane.b32.xlu1 %v4004_v54, %s4320_s4 }
 0xed2   :  { %v1901_v15 = vpop.f32.mrb[20].mxu0 }
 0xed3   :  { %v1903_v5 = vpop.f32.mrb[21].mxu0 }
 0xed4   :  { %v4988_v7 = vadd.f32 %v1903_v5, %v5291_v63  ;;  %v1902_v5 = vadd.f32 %v1901_v15, %v4756_v8 }
 0xed6   :  { %4005 = vtanh.f32 %v4988_v7  ;;  %v3106_v46 = vmul.f32 -1.442695, %v1902_v5 }
 0xed7   :  { %4007 = vpow2.f32 %v3104_v53 }
 0xed8   :  { %4009 = vpow2.f32 %v3102_v37 }
 0xee0   :  { %v4006_v40 = vpop.eup %4005 }
 0xee1   :  { %1981 = vrot.lane.b32.xlu0 %v4006_v40, %s4320_s4  ;;  %v4008_v13 = vpop.eup %4007 }
 0xee2   :  { %v1939_v59 = vadd.f32 1.0, %v4008_v13  ;;  %v4010_v24 = vpop.eup %4009 }
 0xee3   :  { %v1909_v54 = vadd.f32 1.0, %v4010_v24 }
 0xee4   :  { %4011 = vrcp.f32 %v1939_v59 }
 0xee5   :  { %4013 = vrcp.f32 %v1909_v54 }
 0xee6   :  { %4015 = vpow2.f32 %v3106_v46 }
 0xeee   :  { %v4012_v51 = vpop.eup %4011 }
 0xeef   :  { %v4014_v2 = vpop.eup %4013  ;;  %v1949_v15 = vmul.f32 %v4012_v51, %v4920_v6 }
 0xef0   :  { %v4016_v27 = vpop.eup %4015  ;;  %v1919_v46 = vmul.f32 %v4014_v2, %v4924_v1  ;;  %v3105_v1 = vmul.f32 -1.442695, %v1828_v30 }
 0xef1   :  { %v1969_v53 = vadd.f32 1.0, %v4016_v27 }
 0xef3   :  { %4017 = vrcp.f32 %v1969_v53 }
 0xefd   :  { %v4018_v37 = vpop.eup %4017 }
 0xf33   :  { %v1952_v47 = vpop.permute.xlu1 %1951 }
 0xf34   :  { %v1954_v40 = vmul.f32 %v4012_v51, %v1952_v47  ;;  %v1979_v51 = vmul.f32 %v4018_v37, %v4930_v31 }
 0xf36   :  { %1956 = vrot.lane.b32.xlu0 %v1954_v40, %s4320_s4 }
 0xf37   :  { %v1922_v48 = vpop.permute.xlu1 %1921 }
 0xf38   :  { %v1924_v55 = vmul.f32 %v4014_v2, %v1922_v48  ;;  %v3103_v2 = vmul.f32 -1.442695, %v3821_v0 }
 0xf3a   :  { %1926 = vrot.lane.b32.xlu0 %v1924_v55, %s4320_s4 }
 0xf53   :  { %v1982_v13 = vpop.permute.xlu0 %1981 }
 0xf54   :  { %v1984_v59 = vmul.f32 %v4018_v37, %v1982_v13  ;;  %v3107_v37 = vmul.f32 -1.442695, %v4988_v7 }
 0xf56   :  { %1986 = vrot.lane.b32.xlu1 %v1984_v59, %s4320_s4 }
 0xfa8   :  { %v1957_v24 = vpop.permute.xlu0 %1956 }
 0xfa9   :  { %v4999_v47 = vadd.f32 %v1957_v24, %v1949_v15 }
 0xfab   :  { %4019 = vtanh.f32 %v4999_v47 }
 0xfac   :  { %v1927_v54 = vpop.permute.xlu0 %1926 }
 0xfad   :  { %v5003_v5 = vadd.f32 %v1927_v54, %v1919_v46 }
 0xfaf   :  { %4021 = vtanh.f32 %v5003_v5 }
 0xfb5   :  { %v4020_v40 = vpop.eup %4019 }
 0xfb6   :  { %1962 = vrot.lane.b32.xlu1 %v4020_v40, %s4320_s4 }
 0xfb9   :  { %v4022_v48 = vpop.eup %4021 }
 0xfba   :  { %1932 = vrot.lane.b32.xlu1 %v4022_v48, %s4320_s4  ;;  %v5292_v48 = vld [vmem:[#allocation22_spill] sm:$0xff] }
 0xfc8   :  { %v1987_v6 = vpop.permute.xlu1 %1986 }
 0xfc9   :  { %v5009_v55 = vadd.f32 %v1987_v6, %v1979_v51 }
 0xfcb   :  { %4023 = vtanh.f32 %v5009_v55 }
 0xfcc   :  { %4025 = vpow2.f32 %v3105_v1 }
 0xfcd   :  { %4027 = vpow2.f32 %v3103_v2 }
 0xfd5   :  { %v4024_v27 = vpop.eup %4023 }
 0xfd6   :  { %1992 = vrot.lane.b32.xlu0 %v4024_v27, %s4320_s4  ;;  %v4026_v53 = vpop.eup %4025 }
 0xfd7   :  { %v1945_v13 = vadd.f32 1.0, %v4026_v53  ;;  %v4028_v59 = vpop.eup %4027 }
 0xfd8   :  { %v1915_v15 = vadd.f32 1.0, %v4028_v59 }
 0xfd9   :  { %4029 = vrcp.f32 %v1945_v13 }
 0xfda   :  { %4031 = vrcp.f32 %v1915_v15 }
 0xfdb   :  { %4033 = vpow2.f32 %v3107_v37 }
 0xfe3   :  { %v4030_v24 = vpop.eup %4029 }
 0xfe4   :  { %v4032_v54 = vpop.eup %4031 }
 0xfe5   :  { %v4034_v0 = vpop.eup %4033 }
 0xfe6   :  { %v1975_v7 = vadd.f32 1.0, %v4034_v0 }
 0xfe8   :  { %4035 = vrcp.f32 %v1975_v7 }
0x1028   :  { %v1963_v31 = vpop.permute.xlu1 %1962 }
0x1029   :  { %v1965_v46 = vmul.f32 %v4030_v24, %v1963_v31 }
0x102b   :  { %2076 = vrot.lane.b32.xlu0 %v1965_v46, %s4320_s4 }
0x102c   :  { %v1933_v40 = vpop.permute.xlu1 %1932 }
0x102d   :  { %v1935_v30 = vmul.f32 %v4032_v54, %v1933_v40 }
0x102f   :  { %3108 = vmatmul.mubr.msk.f32.vlgmr.msra.gmra.mrb[12].mxu0 %vm310_vm1, %v1935_v30 }
0x1030   :  { %3625 = vmatpush1.bf16.msra.mxu0 %v4471_v9  ;;  %2387 = vmatprep.mubr.f32.mxu0 %v5282_v10  ;;  %v4036_v9 = vpop.eup %4035 }
0x1031   :  { %3627 = vmatprep.subr.bf16.mxu0 %v4475_v14 }
0x1034   :  { %3629 = vmatpush1.bf16.msra.mxu0 %v4478_v16 }
0x1035   :  { %3631 = vmatprep.subr.bf16.mxu0 %v4481_v19 }
0x1038   :  { %3633 = vmatpush1.bf16.msra.mxu0 %v4486_v25 }
0x1039   :  { %3635 = vmatprep.subr.bf16.mxu0 %v4489_v26 }
0x103c   :  { %3637 = vmatpush1.bf16.msra.mxu0 %v5288_v39 }
0x103d   :  { %3639 = vmatprep.subr.bf16.mxu0 %v5292_v48 }
0x1048   :  { %v1993_v51 = vpop.permute.xlu0 %1992 }
0x1049   :  { %v1995_v6 = vmul.f32 %v4036_v9, %v1993_v51 }
0x104b   :  { %2152 = vrot.lane.b32.xlu1 %v1995_v6, %s4320_s4 }
0x109d   :  { %v2077_v14 = vpop.permute.xlu0 %2076 }
0x109e   :  { %v2079_v16 = vsel %vm310_vm1, %v1935_v30, %v2077_v14 }
0x109f   :  { %2145 = vmatmul.mubr.f32.vlgmr.msra.gmra.mrb[12].mxu1 %v2079_v16 }
0x10a0   :  { %3593 = vmatpush1.bf16.msra.mxu1 %v4667_v38  ;;  %2220 = vmatprep.mubr.f32.mxu1 %v5282_v10 }
0x10a1   :  { %3595 = vmatprep.subr.bf16.mxu1 %v4669_v41 }
0x10a4   :  { %3597 = vmatpush1.bf16.msra.mxu1 %v4673_v57 }
0x10a5   :  { %3599 = vmatprep.subr.bf16.mxu1 %v4677_v58 }
0x10a8   :  { %3601 = vmatpush1.bf16.msra.mxu1 %v4680_v42 }
0x10a9   :  { %3603 = vmatprep.subr.bf16.mxu1 %v4683_v50 }
0x10ac   :  { %3605 = vmatpush1.bf16.msra.mxu1 %v4686_v18 }
0x10ad   :  { %3607 = vmatprep.subr.bf16.mxu1 %v4689_v23 }
0x10b0   :  { %3609 = vmatpush1.bf16.msra.mxu1 %v4692_v32 }
0x10b1   :  { %3611 = vmatprep.subr.bf16.mxu1 %v4695_v33 }
0x10b4   :  { %3613 = vmatpush1.bf16.msra.mxu1 %v4698_v49 }
0x10b5   :  { %3615 = vmatprep.subr.bf16.mxu1 %v4701_v52 }
0x10b8   :  { %3617 = vmatpush1.bf16.msra.mxu1 %v5283_v43 }
0x10b9   :  { %3619 = vmatprep.subr.bf16.mxu1 %v5284_v62 }
0x10bc   :  { %3621 = vmatpush1.bf16.msra.mxu1 %v5285_v44 }
0x10bd   :  { %v2153_v19 = vpop.permute.xlu1 %2152  ;;  %3671 = vmatprep.subr.bf16.mxu1 %v4650_v17 }
0x10be   :  { %v2155_v25 = vsel %vm310_vm1, %v1965_v46, %v2153_v19 }
0x10bf   :  { %2221 = vmatmul.mubr.f32.vlgmr.msra.gmra.mrb[14].mxu1 %v2155_v25 }
0x10c0   :  { %3673 = vmatpush1.bf16.msra.mxu1 %v4667_v38  ;;  %2541 = vmatprep.mubr.f32.mxu1 %v5282_v10 }
0x10c1   :  { %3675 = vmatprep.subr.bf16.mxu1 %v4669_v41 }
0x10c4   :  { %3677 = vmatpush1.bf16.msra.mxu1 %v4673_v57 }
0x10c5   :  { %3679 = vmatprep.subr.bf16.mxu1 %v4677_v58 }
0x10c8   :  { %3681 = vmatpush1.bf16.msra.mxu1 %v4680_v42 }
0x10c9   :  { %3683 = vmatprep.subr.bf16.mxu1 %v4683_v50 }
0x10cc   :  { %3685 = vmatpush1.bf16.msra.mxu1 %v4686_v18 }
0x10cd   :  { %3687 = vmatprep.subr.bf16.mxu1 %v4689_v23 }
0x10d0   :  { %3689 = vmatpush1.bf16.msra.mxu1 %v4692_v32 }
0x10d1   :  { %3691 = vmatprep.subr.bf16.mxu1 %v4695_v33 }
0x10d4   :  { %3693 = vmatpush1.bf16.msra.mxu1 %v4698_v49 }
0x10d5   :  { %3695 = vmatprep.subr.bf16.mxu1 %v4701_v52 }
0x10d8   :  { %3697 = vmatpush1.bf16.msra.mxu1 %v5283_v43 }
0x10d9   :  { %3699 = vmatprep.subr.bf16.mxu1 %v5284_v62 }
0x10dc   :  { %3701 = vmatpush1.bf16.msra.mxu1 %v5285_v44 }
0x10dd   :  { %3735 = vmatprep.subr.bf16.mxu1 %v4650_v17 }
0x1102   :  { %v2068_v26 = vpop.f32.mrb[12].mxu0 }
0x1103   :  { %v2070_v39 = vpop.f32.mrb[13].mxu0  ;;  %v3822_v30 = vadd.f32 %v2068_v26, %v4535_v45 }
0x1104   :  { %v5064_v53 = vadd.f32 %v2070_v39, %v5290_v34 }
0x1105   :  { %v3109_v7 = vmul.f32 -1.442695, %v3822_v30 }
0x1172   :  { %v2146_v27 = vpop.f32.mrb[12].mxu1 }
0x1173   :  { %v2148_v1 = vpop.f32.mrb[13].mxu1  ;;  %v2147_v54 = vadd.f32 %v2146_v27, %v4636_v22 }
0x1174   :  { %v2149_v2 = vadd.f32 %v2148_v1, %v5289_v56 }
0x1175   :  { %v3111_v0 = vmul.f32 -1.442695, %v2147_v54 }
0x1176   :  { %4037 = vtanh.f32 %v2149_v2 }
0x1177   :  { %4039 = vtanh.f32 %v5064_v53 }
0x1180   :  { %v4038_v13 = vpop.eup %4037 }
0x1181   :  { %2272 = vrot.lane.b32.xlu1 %v4038_v13, %s4320_s4  ;;  %v4040_v59 = vpop.eup %4039 }
0x1185   :  { %2242 = vrot.lane.b32.xlu1 %v4040_v59, %s4320_s4 }
0x1192   :  { %v2222_v15 = vpop.f32.mrb[14].mxu1 }
0x1193   :  { %v2224_v24 = vpop.f32.mrb[15].mxu1  ;;  %v2223_v46 = vadd.f32 %v2222_v15, %v4756_v8 }
0x1194   :  { %v2225_v31 = vadd.f32 %v2224_v24, %v5291_v63 }
0x1195   :  { %v3113_v40 = vmul.f32 -1.442695, %v2223_v46 }
0x1196   :  { %4041 = vtanh.f32 %v2225_v31 }
0x1197   :  { %4043 = vpow2.f32 %v3113_v40 }
0x1198   :  { %4045 = vpow2.f32 %v3111_v0 }
0x1199   :  { %4047 = vpow2.f32 %v3109_v7 }
0x11a0   :  { %v4042_v37 = vpop.eup %4041 }
0x11a1   :  { %2302 = vrot.lane.b32.xlu0 %v4042_v37, %s4320_s4  ;;  %v4044_v9 = vpop.eup %4043 }
0x11a2   :  { %v2290_v51 = vadd.f32 1.0, %v4044_v9  ;;  %v4046_v6 = vpop.eup %4045 }
0x11a3   :  { %v2260_v14 = vadd.f32 1.0, %v4046_v6  ;;  %v4048_v16 = vpop.eup %4047 }
0x11a4   :  { %4049 = vrcp.f32 %v2290_v51  ;;  %v2230_v19 = vadd.f32 1.0, %v4048_v16  ;;  %v3112_v16 = vmul.f32 -1.442695, %v2149_v2 }
0x11a5   :  { %4051 = vrcp.f32 %v2260_v14 }
0x11a6   :  { %4053 = vrcp.f32 %v2230_v19  ;;  %v3110_v19 = vmul.f32 -1.442695, %v5064_v53 }
0x11ae   :  { %v4050_v25 = vpop.eup %4049 }
0x11af   :  { %v4052_v26 = vpop.eup %4051  ;;  %v2300_v37 = vmul.f32 %v4050_v25, %v5009_v55 }
0x11b0   :  { %v4054_v15 = vpop.eup %4053  ;;  %v2270_v40 = vmul.f32 %v4052_v26, %v4999_v47  ;;  %v3114_v47 = vmul.f32 -1.442695, %v2225_v31 }
0x11b1   :  { %v2240_v7 = vmul.f32 %v4054_v15, %v5003_v5 }
0x11f3   :  { %v2273_v39 = vpop.permute.xlu1 %2272 }
0x11f4   :  { %v2275_v13 = vmul.f32 %v4052_v26, %v2273_v39 }
0x11f7   :  { %v2243_v59 = vpop.permute.xlu1 %2242 }
0x11f8   :  { %v2245_v24 = vmul.f32 %v4054_v15, %v2243_v59 }
0x1213   :  { %v2303_v27 = vpop.permute.xlu0 %2302 }
0x1214   :  { %v2305_v1 = vmul.f32 %v4050_v25, %v2303_v27 }
0x1216   :  { %2307 = vrot.lane.b32.xlu0 %v2305_v1, %s4320_s4 }
0x121a   :  { %2277 = vrot.lane.b32.xlu0 %v2275_v13, %s4320_s4 }
0x121e   :  { %2247 = vrot.lane.b32.xlu0 %v2245_v24, %s4320_s4 }
0x1288   :  { %v2308_v46 = vpop.permute.xlu0 %2307 }
0x1289   :  { %v5078_v54 = vadd.f32 %v2308_v46, %v2300_v37 }
0x128b   :  { %4055 = vtanh.f32 %v5078_v54 }
0x128c   :  { %v2278_v30 = vpop.permute.xlu0 %2277 }
0x128d   :  { %v5082_v0 = vadd.f32 %v2278_v30, %v2270_v40  ;;  %v5293_v40 = vld [vmem:[#allocation23_spill] sm:$0xff]  ;;  %v5294_v30 = vld [vmem:[#allocation24_spill] sm:$0xff] }
0x128f   :  { %4057 = vtanh.f32 %v5082_v0 }
0x1290   :  { %v2248_v9 = vpop.permute.xlu0 %2247 }
0x1291   :  { %v5086_v51 = vadd.f32 %v2248_v9, %v2240_v7  ;;  %v5295_v7 = vld [vmem:[#allocation25_spill] sm:$0xff] }
0x1293   :  { %4059 = vtanh.f32 %v5086_v51 }
0x1294   :  { %4061 = vpow2.f32 %v3114_v47 }
0x1295   :  { %v4056_v55 = vpop.eup %4055  ;;  %4063 = vpow2.f32 %v3112_v16 }
0x1296   :  { %2313 = vrot.lane.b32.xlu1 %v4056_v55, %s4320_s4  ;;  %4065 = vpow2.f32 %v3110_v19 }
0x1299   :  { %v4058_v6 = vpop.eup %4057 }
0x129a   :  { %2283 = vrot.lane.b32.xlu1 %v4058_v6, %s4320_s4 }
0x129d   :  { %v4060_v14 = vpop.eup %4059 }
0x129e   :  { %2253 = vrot.lane.b32.xlu1 %v4060_v14, %s4320_s4  ;;  %v4062_v5 = vpop.eup %4061 }
0x129f   :  { %v2296_v25 = vadd.f32 1.0, %v4062_v5  ;;  %v4064_v39 = vpop.eup %4063 }
0x12a0   :  { %v2266_v27 = vadd.f32 1.0, %v4064_v39  ;;  %v4066_v1 = vpop.eup %4065 }
0x12a1   :  { %4067 = vrcp.f32 %v2296_v25  ;;  %v2236_v26 = vadd.f32 1.0, %v4066_v1 }
0x12a2   :  { %4069 = vrcp.f32 %v2266_v27 }
0x12a3   :  { %4071 = vrcp.f32 %v2236_v26 }
0x12ab   :  { %v4068_v13 = vpop.eup %4067 }
0x12ac   :  { %v4070_v2 = vpop.eup %4069 }
0x12ad   :  { %v4072_v53 = vpop.eup %4071 }
0x1308   :  { %v2314_v59 = vpop.permute.xlu1 %2313 }
0x1309   :  { %v2316_v15 = vmul.f32 %v4068_v13, %v2314_v59 }
0x130b   :  { %2473 = vrot.lane.b32.xlu0 %v2316_v15, %s4320_s4 }
0x130c   :  { %v2284_v31 = vpop.permute.xlu1 %2283 }
0x130d   :  { %v2286_v24 = vmul.f32 %v4070_v2, %v2284_v31 }
0x130f   :  { %2397 = vrot.lane.b32.xlu0 %v2286_v24, %s4320_s4 }
0x1310   :  { %v2254_v37 = vpop.permute.xlu1 %2253 }
0x1311   :  { %v2256_v46 = vmul.f32 %v4072_v53, %v2254_v37 }
0x1313   :  { %3115 = vmatmul.mubr.msk.f32.vlgmr.msra.gmra.mrb[14].mxu0 %vm310_vm1, %v2256_v46 }
0x1314   :  { %3641 = vmatpush1.bf16.msra.mxu0 %v4544_v60  ;;  %2465 = vmatprep.mubr.f32.mxu0 %v5282_v10 }
0x1315   :  { %3643 = vmatprep.subr.bf16.mxu0 %v4546_v61 }
0x1318   :  { %3645 = vmatpush1.bf16.msra.mxu0 %v4550_v3 }
0x1319   :  { %3647 = vmatprep.subr.bf16.mxu0 %v4553_v4 }
0x131c   :  { %3649 = vmatpush1.bf16.msra.mxu0 %v4556_v11 }
0x131d   :  { %3651 = vmatprep.subr.bf16.mxu0 %v4559_v12 }
0x1320   :  { %3653 = vmatpush1.bf16.msra.mxu0 %v4562_v20 }
0x1321   :  { %3655 = vmatprep.subr.bf16.mxu0 %v4565_v21 }
0x1324   :  { %3657 = vmatpush1.bf16.msra.mxu0 %v4568_v28 }
0x1325   :  { %3659 = vmatprep.subr.bf16.mxu0 %v4571_v29 }
0x1328   :  { %3661 = vmatpush1.bf16.msra.mxu0 %v4574_v35 }
0x1329   :  { %3663 = vmatprep.subr.bf16.mxu0 %v4577_v36 }
0x132c   :  { %3665 = vmatpush1.bf16.msra.mxu0 %v5293_v40 }
0x132d   :  { %3667 = vmatprep.subr.bf16.mxu0 %v5294_v30 }
0x1330   :  { %3669 = vmatpush1.bf16.msra.mxu0 %v5295_v7 }
0x1331   :  { %3703 = vmatprep.subr.bf16.mxu0 %v5292_v48 }
0x137d   :  { %v2474_v9 = vpop.permute.xlu0 %2473 }
0x137e   :  { %v2476_v55 = vsel %vm310_vm1, %v2286_v24, %v2474_v9 }
0x137f   :  { %2542 = vmatmul.mubr.f32.vlgmr.msra.gmra.mrb[16].mxu1 %v2476_v55 }
0x1380   :  { %3737 = vmatpush1.bf16.msra.mxu1 %v4667_v38  ;;  %2783 = vmatprep.mubr.f32.mxu1 %v5282_v10 }
0x1381   :  { %v2398_v6 = vpop.permute.xlu0 %2397  ;;  %3739 = vmatprep.subr.bf16.mxu1 %v4669_v41 }
0x1382   :  { %v2400_v14 = vsel %vm310_vm1, %v2256_v46, %v2398_v6 }
0x1383   :  { %2466 = vmatmul.mubr.f32.vlgmr.msra.gmra.mrb[22].mxu0 %v2400_v14 }
0x1384   :  { %3705 = vmatpush1.bf16.msra.mxu0 %v4544_v60  ;;  %3741 = vmatpush1.bf16.msra.mxu1 %v4673_v57 }
0x1385   :  { %3707 = vmatprep.subr.bf16.mxu0 %v4546_v61  ;;  %3743 = vmatprep.subr.bf16.mxu1 %v4677_v58 }
0x1386   :  { %2707 = vmatprep.mubr.f32.mxu0 %v5282_v10 }
0x1388   :  { %3709 = vmatpush1.bf16.msra.mxu0 %v4550_v3  ;;  %3745 = vmatpush1.bf16.msra.mxu1 %v4680_v42 }
0x1389   :  { %3711 = vmatprep.subr.bf16.mxu0 %v4553_v4  ;;  %3747 = vmatprep.subr.bf16.mxu1 %v4683_v50 }
0x138c   :  { %3713 = vmatpush1.bf16.msra.mxu0 %v4556_v11  ;;  %3749 = vmatpush1.bf16.msra.mxu1 %v4686_v18 }
0x138d   :  { %3715 = vmatprep.subr.bf16.mxu0 %v4559_v12  ;;  %3751 = vmatprep.subr.bf16.mxu1 %v4689_v23 }
0x1390   :  { %3717 = vmatpush1.bf16.msra.mxu0 %v4562_v20  ;;  %3753 = vmatpush1.bf16.msra.mxu1 %v4692_v32 }
0x1391   :  { %3719 = vmatprep.subr.bf16.mxu0 %v4565_v21  ;;  %3755 = vmatprep.subr.bf16.mxu1 %v4695_v33 }
0x1394   :  { %3721 = vmatpush1.bf16.msra.mxu0 %v4568_v28  ;;  %3757 = vmatpush1.bf16.msra.mxu1 %v4698_v49 }
0x1395   :  { %3723 = vmatprep.subr.bf16.mxu0 %v4571_v29  ;;  %3759 = vmatprep.subr.bf16.mxu1 %v4701_v52 }
0x1398   :  { %3725 = vmatpush1.bf16.msra.mxu0 %v4574_v35  ;;  %3761 = vmatpush1.bf16.msra.mxu1 %v5283_v43 }
0x1399   :  { %3727 = vmatprep.subr.bf16.mxu0 %v4577_v36  ;;  %3763 = vmatprep.subr.bf16.mxu1 %v5284_v62 }
0x139c   :  { %3729 = vmatpush1.bf16.msra.mxu0 %v5293_v40  ;;  %3765 = vmatpush1.bf16.msra.mxu1 %v5285_v44 }
0x139d   :  { %3731 = vmatprep.subr.bf16.mxu0 %v5294_v30 }
0x13a0   :  { %3733 = vmatpush1.bf16.msra.mxu0 %v5295_v7 }
0x13a1   :  { %3767 = vmatprep.subr.bf16.mxu0 %v4650_v17 }
0x13e6   :  { %v2389_v60 = vpop.f32.mrb[14].mxu0 }
0x13e7   :  { %v2391_v61 = vpop.f32.mrb[15].mxu0 }
0x13e8   :  { %v5151_v28 = vadd.f32 %v2391_v61, %v5290_v34  ;;  %v3824_v34 = vadd.f32 %v2389_v60, %v4535_v45 }
0x13ea   :  { %v3116_v19 = vmul.f32 -1.442695, %v3824_v34 }
0x1452   :  { %v2543_v3 = vpop.f32.mrb[16].mxu1 }
0x1453   :  { %v2545_v4 = vpop.f32.mrb[17].mxu1  ;;  %v2544_v17 = vadd.f32 %v2543_v3, %v4756_v8 }
0x1454   :  { %v2546_v11 = vadd.f32 %v2545_v4, %v5291_v63 }
0x1455   :  { %v3120_v48 = vmul.f32 -1.442695, %v2544_v17 }
0x1456   :  { %4073 = vtanh.f32 %v2546_v11  ;;  %v2467_v12 = vpop.f32.mrb[22].mxu0 }
0x1457   :  { %v2469_v20 = vpop.f32.mrb[23].mxu0  ;;  %v2468_v47 = vadd.f32 %v2467_v12, %v4636_v22 }
0x1458   :  { %v2470_v21 = vadd.f32 %v2469_v20, %v5289_v56 }
0x1459   :  { %v3118_v16 = vmul.f32 -1.442695, %v2468_v47 }
0x145a   :  { %4075 = vtanh.f32 %v2470_v21  ;;  %v3119_v4 = vmul.f32 -1.442695, %v2470_v21 }
0x145b   :  { %4077 = vtanh.f32 %v5151_v28 }
0x145c   :  { %4079 = vpow2.f32 %v3120_v48 }
0x145d   :  { %4081 = vpow2.f32 %v3118_v16 }
0x145e   :  { %4083 = vpow2.f32 %v3116_v19 }
0x1460   :  { %v4074_v29 = vpop.eup %4073 }
0x1461   :  { %2623 = vrot.lane.b32.xlu1 %v4074_v29, %s4320_s4 }
0x1464   :  { %v4076_v35 = vpop.eup %4075 }
0x1465   :  { %2593 = vrot.lane.b32.xlu0 %v4076_v35, %s4320_s4  ;;  %v4078_v36 = vpop.eup %4077 }
0x1466   :  { %v4080_v5 = vpop.eup %4079 }
0x1467   :  { %v2611_v25 = vadd.f32 1.0, %v4080_v5  ;;  %v4082_v39 = vpop.eup %4081 }
0x1468   :  { %v2581_v27 = vadd.f32 1.0, %v4082_v39  ;;  %v4084_v1 = vpop.eup %4083 }
0x1469   :  { %2563 = vrot.lane.b32.xlu0 %v4078_v36, %s4320_s4  ;;  %4085 = vrcp.f32 %v2611_v25  ;;  %v2551_v26 = vadd.f32 1.0, %v4084_v1 }
0x146a   :  { %4087 = vrcp.f32 %v2581_v27 }
0x146b   :  { %4089 = vrcp.f32 %v2551_v26 }
0x1473   :  { %v4086_v13 = vpop.eup %4085 }
0x1474   :  { %v4088_v45 = vpop.eup %4087  ;;  %v2621_v46 = vmul.f32 %v4086_v13, %v5078_v54 }
0x1475   :  { %v4090_v24 = vpop.eup %4089  ;;  %v2591_v7 = vmul.f32 %v4088_v45, %v5082_v0  ;;  %v3121_v0 = vmul.f32 -1.442695, %v2546_v11  ;;  %v3117_v11 = vmul.f32 -1.442695, %v5151_v28 }
0x1476   :  { %v2561_v6 = vmul.f32 %v4090_v24, %v5086_v51 }
0x14d3   :  { %v2624_v59 = vpop.permute.xlu1 %2623 }
0x14d4   :  { %v2626_v15 = vmul.f32 %v4086_v13, %v2624_v59 }
0x14d6   :  { %2628 = vrot.lane.b32.xlu1 %v2626_v15, %s4320_s4 }
0x14d7   :  { %v2594_v2 = vpop.permute.xlu0 %2593 }
0x14d8   :  { %v2596_v31 = vmul.f32 %v4088_v45, %v2594_v2 }
0x14da   :  { %2598 = vrot.lane.b32.xlu1 %v2596_v31, %s4320_s4 }
0x14db   :  { %v2564_v53 = vpop.permute.xlu0 %2563 }
0x14dc   :  { %v2566_v37 = vmul.f32 %v4090_v24, %v2564_v53 }
0x14de   :  { %2568 = vrot.lane.b32.xlu1 %v2566_v37, %s4320_s4 }
0x1548   :  { %v2629_v40 = vpop.permute.xlu1 %2628 }
0x1549   :  { %v5164_v30 = vadd.f32 %v2629_v40, %v2621_v46 }
0x154b   :  { %4091 = vtanh.f32 %v5164_v30 }
0x154c   :  { %v2599_v9 = vpop.permute.xlu1 %2598 }
0x154d   :  { %v5168_v55 = vadd.f32 %v2599_v9, %v2591_v7 }
0x154f   :  { %4093 = vtanh.f32 %v5168_v55 }
0x1550   :  { %v2569_v14 = vpop.permute.xlu1 %2568 }
0x1551   :  { %v2571_v60 = vadd.f32 %v2569_v14, %v2561_v6 }
0x1553   :  { %4095 = vtanh.f32 %v2571_v60 }
0x1554   :  { %4097 = vpow2.f32 %v3121_v0 }
0x1555   :  { %v4092_v61 = vpop.eup %4091  ;;  %4099 = vpow2.f32 %v3119_v4 }
0x1556   :  { %2634 = vrot.lane.b32.xlu0 %v4092_v61, %s4320_s4 }
0x1559   :  { %v4094_v54 = vpop.eup %4093 }
0x155a   :  { %2604 = vrot.lane.b32.xlu0 %v4094_v54, %s4320_s4 }
0x155d   :  { %v4096_v3 = vpop.eup %4095 }
0x155e   :  { %2574 = vrot.lane.b32.xlu0 %v4096_v3, %s4320_s4  ;;  %v4098_v12 = vpop.eup %4097 }
0x155f   :  { %v2617_v20 = vadd.f32 1.0, %v4098_v12  ;;  %v4100_v29 = vpop.eup %4099 }
0x1560   :  { %v2587_v51 = vadd.f32 1.0, %v4100_v29 }
0x1561   :  { %4101 = vrcp.f32 %v2617_v20 }
0x1562   :  { %4103 = vrcp.f32 %v2587_v51 }
0x1563   :  { %4105 = vpow2.f32 %v3117_v11 }
0x156b   :  { %v4102_v35 = vpop.eup %4101 }
0x156c   :  { %v4104_v48 = vpop.eup %4103 }
0x156d   :  { %v4106_v21 = vpop.eup %4105 }
0x156e   :  { %v2557_v16 = vadd.f32 1.0, %v4106_v21 }
0x1570   :  { %4107 = vrcp.f32 %v2557_v16 }
0x157a   :  { %v4108_v39 = vpop.eup %4107 }
0x15c8   :  { %v2635_v36 = vpop.permute.xlu0 %2634 }
0x15c9   :  { %v2637_v17 = vmul.f32 %v4102_v35, %v2635_v36 }
0x15cb   :  { %2715 = vrot.lane.b32.xlu1 %v2637_v17, %s4320_s4 }
0x15cc   :  { %v2605_v47 = vpop.permute.xlu0 %2604 }
0x15cd   :  { %v2607_v34 = vmul.f32 %v4104_v48, %v2605_v47 }
0x15cf   :  { %2639 = vrot.lane.b32.xlu1 %v2607_v34, %s4320_s4 }
0x15d0   :  { %v2575_v19 = vpop.permute.xlu0 %2574 }
0x15d1   :  { %v2577_v27 = vmul.f32 %v4108_v39, %v2575_v19  ;;  %v2958_v39 = vld [vmem:[#allocation12 + $0x10] sm:$0xff] }
0x163d   :  { %v2716_v5 = vpop.permute.xlu1 %2715 }
0x163e   :  { %v2718_v25 = vsel %vm310_vm1, %v2607_v34, %v2716_v5  ;;  %v2956_v5 = vld [vmem:[#allocation12] sm:$0xff] }
0x163f   :  { %2784 = vmatmul.mubr.f32.vlgmr.msra.gmra.mrb[18].mxu1 %v2718_v25  ;;  %v2957_v25 = vld [vmem:[#allocation12 + $0x8] sm:$0xff] }
0x1640   :  { %3155 = vmatprep.mubr.msk.f32.mxu1 %vm4322_vm2, %v5282_v10 }
0x1641   :  { %v2640_v1 = vpop.permute.xlu1 %2639 }
0x1642   :  { %v2642_v26 = vsel %vm310_vm1, %v2577_v27, %v2640_v1  ;;  %v3799_v27 = vpack.c.bf16 %v2957_v25, %v2956_v5  ;;  %v2959_v1 = vld [vmem:[#allocation12 + $0x18] sm:$0xff] }
0x1643   :  { %2708 = vmatmul.mubr.f32.vlgmr.msra.gmra.mrb[24].mxu0 %v2642_v26  ;;  %v3802_v26 = vpack.c.bf16 %v2959_v1, %v2958_v39 }
0x1644   :  { %3769 = vmatpush1.bf16.msra.mxu0 %v4667_v38  ;;  %2919 = vmatprep.mubr.f32.mxu0 %v5282_v10 }
0x1645   :  { %3771 = vmatprep.subr.bf16.mxu0 %v4669_v41 }
0x1648   :  { %3773 = vmatpush1.bf16.msra.mxu0 %v4673_v57 }
0x1649   :  { %3775 = vmatprep.subr.bf16.mxu0 %v4677_v58 }
0x164c   :  { %3777 = vmatpush1.bf16.msra.mxu0 %v4680_v42 }
0x164d   :  { %3779 = vmatprep.subr.bf16.mxu0 %v4683_v50 }
0x1650   :  { %3781 = vmatpush1.bf16.msra.mxu0 %v4686_v18 }
0x1651   :  { %3783 = vmatprep.subr.bf16.mxu0 %v4689_v23 }
0x1654   :  { %3785 = vmatpush1.bf16.msra.mxu0 %v4692_v32 }
0x1655   :  { %3787 = vmatprep.subr.bf16.mxu0 %v4695_v33 }
0x1658   :  { %3789 = vmatpush1.bf16.msra.mxu0 %v4698_v49 }
0x1659   :  { %3791 = vmatprep.subr.bf16.mxu0 %v4701_v52 }
0x165c   :  { %3793 = vmatpush1.bf16.msra.mxu0 %v5283_v43 }
0x165d   :  { %3795 = vmatprep.subr.bf16.mxu0 %v5284_v62 }
0x1660   :  { %3797 = vmatpush1.bf16.msra.mxu0 %v5285_v44 }
0x1712   :  { %v2785_v38 = vpop.f32.mrb[18].mxu1 }
0x1713   :  { %v2787_v41 = vpop.f32.mrb[19].mxu1  ;;  %v2786_v32 = vadd.f32 %v2785_v38, %v4756_v8  ;;  %v2961_v38 = vld [vmem:[#allocation12 + $0x28] sm:$0xff] }
0x1714   :  { %v2788_v57 = vadd.f32 %v2787_v41, %v5291_v63 }
0x1715   :  { %v3124_v33 = vmul.f32 -1.442695, %v2786_v32 }
0x1716   :  { %4109 = vtanh.f32 %v2788_v57  ;;  %v2709_v58 = vpop.f32.mrb[24].mxu0  ;;  %v3125_v9 = vmul.f32 -1.442695, %v2788_v57  ;;  %v2962_v57 = vld [vmem:[#allocation12 + $0x30] sm:$0xff] }
0x1717   :  { %v2711_v42 = vpop.f32.mrb[25].mxu0  ;;  %v2710_v49 = vadd.f32 %v2709_v58, %v4636_v22  ;;  %v2963_v58 = vld [vmem:[#allocation12 + $0x38] sm:$0xff] }
0x1718   :  { %v2712_v50 = vadd.f32 %v2711_v42, %v5289_v56  ;;  %v3808_v42 = vpack.c.bf16 %v2963_v58, %v2962_v57 }
0x1719   :  { %v3122_v52 = vmul.f32 -1.442695, %v2710_v49 }
0x171a   :  { %4111 = vtanh.f32 %v2712_v50 }
0x171b   :  { %4113 = vpow2.f32 %v3124_v33 }
0x171c   :  { %4115 = vpow2.f32 %v3122_v52 }
0x1720   :  { %v4110_v18 = vpop.eup %4109 }
0x1721   :  { %2835 = vrot.lane.b32.xlu0 %v4110_v18, %s4320_s4 }
0x1724   :  { %v4112_v23 = vpop.eup %4111 }
0x1725   :  { %2805 = vrot.lane.b32.xlu1 %v4112_v23, %s4320_s4  ;;  %v4114_v43 = vpop.eup %4113 }
0x1726   :  { %v2823_v62 = vadd.f32 1.0, %v4114_v43  ;;  %v4116_v44 = vpop.eup %4115 }
0x1727   :  { %v2793_v56 = vadd.f32 1.0, %v4116_v44 }
0x1728   :  { %4117 = vrcp.f32 %v2823_v62 }
0x1729   :  { %4119 = vrcp.f32 %v2793_v56  ;;  %v3128_v56 = vld [vmem:[%s5245_s9] ss:$0 sm:$0xff] }
0x1732   :  { %v4118_v28 = vpop.eup %4117 }
0x1733   :  { %v4120_v15 = vpop.eup %4119  ;;  %v2833_v22 = vmul.f32 %v4118_v28, %v5164_v30 }
0x1734   :  { %v2803_v53 = vmul.f32 %v4120_v15, %v5168_v55  ;;  %v3123_v55 = vmul.f32 -1.442695, %v2712_v50 }
0x1793   :  { %v2836_v13 = vpop.permute.xlu0 %2835 }
0x1794   :  { %v2838_v59 = vmul.f32 %v4118_v28, %v2836_v13 }
0x1796   :  { %2840 = vrot.lane.b32.xlu0 %v2838_v59, %s4320_s4 }
0x1797   :  { %v2806_v45 = vpop.permute.xlu1 %2805 }
0x1798   :  { %v2808_v2 = vmul.f32 %v4120_v15, %v2806_v45 }
0x179a   :  { %2810 = vrot.lane.b32.xlu1 %v2808_v2, %s4320_s4 }
0x1808   :  { %v2841_v31 = vpop.permute.xlu0 %2840 }
0x1809   :  { %v5205_v24 = vadd.f32 %v2841_v31, %v2833_v22 }
0x180b   :  { %4121 = vtanh.f32 %v5205_v24 }
0x180c   :  { %v2811_v37 = vpop.permute.xlu1 %2810 }
0x180d   :  { %v2813_v46 = vadd.f32 %v2811_v37, %v2803_v53 }
0x180f   :  { %4123 = vtanh.f32 %v2813_v46 }
0x1810   :  { %4125 = vpow2.f32 %v3125_v9 }
0x1815   :  { %v4122_v40 = vpop.eup %4121 }
0x1816   :  { %2846 = vrot.lane.b32.xlu0 %v4122_v40, %s4320_s4 }
0x1819   :  { %v4124_v7 = vpop.eup %4123 }
0x181a   :  { %2816 = vrot.lane.b32.xlu1 %v4124_v7, %s4320_s4  ;;  %v4126_v6 = vpop.eup %4125 }
0x181b   :  { %v2829_v30 = vadd.f32 1.0, %v4126_v6 }
0x181d   :  { %4127 = vrcp.f32 %v2829_v30 }
0x181e   :  { %4129 = vpow2.f32 %v3123_v55 }
0x1827   :  { %v4128_v14 = vpop.eup %4127 }
0x1828   :  { %v4130_v54 = vpop.eup %4129 }
0x1829   :  { %v2799_v3 = vadd.f32 1.0, %v4130_v54 }
0x182b   :  { %4131 = vrcp.f32 %v2799_v3 }
0x1835   :  { %v4132_v4 = vpop.eup %4131 }
0x1888   :  { %v2847_v60 = vpop.permute.xlu0 %2846 }
0x1889   :  { %v2849_v61 = vmul.f32 %v4128_v14, %v2847_v60 }
0x188b   :  { %2851 = vrot.lane.b32.xlu0 %v2849_v61, %s4320_s4 }
0x188c   :  { %v2817_v0 = vpop.permute.xlu1 %2816 }
0x188d   :  { %v2819_v12 = vmul.f32 %v4132_v4, %v2817_v0 }
0x18fd   :  { %v2852_v20 = vpop.permute.xlu0 %2851 }
0x18fe   :  { %v2854_v29 = vsel %vm310_vm1, %v2819_v12, %v2852_v20 }
0x18ff   :  { %2920 = vmatmul.mubr.f32.vlgmr.msra.gmra.mrb[26].mxu0 %v2854_v29 }
0x19d2   :  { %v2921_v51 = vpop.f32.mrb[26].mxu0 }
0x19d3   :  { %v2923_v35 = vpop.f32.mrb[27].mxu0  ;;  %v2922_v48 = vadd.f32 %v2921_v51, %v4756_v8  ;;  %v2960_v8 = vld [vmem:[#allocation12 + $0x20] sm:$0xff] }
0x19d4   :  { %v2924_v36 = vadd.f32 %v2923_v35, %v5291_v63  ;;  %v4321_v63 = vmov 0.0|0.0   ;;  %v3805_v41 = vpack.c.bf16 %v2961_v38, %v2960_v8 }
0x19d5   :  { %v3126_v47 = vmul.f32 -1.442695, %v2922_v48  ;;  %3798 = vmatprep.subr.bf16.mxu1 %v4321_v63 }
0x19d6   :  { %4133 = vtanh.f32 %v2924_v36  ;;  %3800 = vmatpush3.bf16.msra.mxu1 %v3799_v27  ;;  %v3127_v33 = vmul.f32 -1.442695, %v2924_v36 }
0x19d7   :  { %4135 = vpow2.f32 %v3126_v47  ;;  %3801 = vmatprep.subr.bf16.mxu1 %v4321_v63 }
0x19da   :  { %3803 = vmatpush3.bf16.msra.mxu1 %v3802_v26 }
0x19db   :  { %3804 = vmatprep.subr.bf16.mxu1 %v4321_v63 }
0x19de   :  { %3806 = vmatpush3.bf16.msra.mxu1 %v3805_v41 }
0x19df   :  { %3807 = vmatprep.subr.bf16.mxu1 %v4321_v63 }
0x19e0   :  { %v4134_v17 = vpop.eup %4133 }
0x19e1   :  { %2941 = vrot.lane.b32.xlu1 %v4134_v17, %s4320_s4  ;;  %v4136_v34 = vpop.eup %4135 }
0x19e2   :  { %v2929_v11 = vadd.f32 1.0, %v4136_v34  ;;  %3809 = vmatpush3.bf16.msra.mxu1 %v3808_v42 }
0x19e4   :  { %4137 = vrcp.f32 %v2929_v11 }
0x19ee   :  { %v4138_v21 = vpop.eup %4137 }
0x19ef   :  { %v2939_v50 = vmul.f32 %v4138_v21, %v5205_v24 }
0x1a53   :  { %v2942_v16 = vpop.permute.xlu1 %2941 }
0x1a54   :  { %v2944_v19 = vmul.f32 %v4138_v21, %v2942_v16 }
0x1a56   :  { %2946 = vrot.lane.b32.xlu0 %v2944_v19, %s4320_s4 }
0x1ac8   :  { %v2947_v18 = vpop.permute.xlu0 %2946 }
0x1ac9   :  { %v2949_v23 = vadd.f32 %v2947_v18, %v2939_v50 }
0x1acb   :  { %4139 = vtanh.f32 %v2949_v23 }
0x1acc   :  { %4141 = vpow2.f32 %v3127_v33 }
0x1ad5   :  { %v4140_v32 = vpop.eup %4139 }
0x1ad6   :  { %2952 = vrot.lane.b32.xlu1 %v4140_v32, %s4320_s4  ;;  %v4142_v49 = vpop.eup %4141 }
0x1ad7   :  { %v2935_v52 = vadd.f32 1.0, %v4142_v49 }
0x1ad9   :  { %4143 = vrcp.f32 %v2935_v52 }
0x1ae3   :  { %v4144_v43 = vpop.eup %4143 }
0x1b48   :  { %v2953_v62 = vpop.permute.xlu1 %2952 }
0x1b49   :  { %v2955_v44 = vmul.f32 %v4144_v43, %v2953_v62 }
0x1b4b   :  { %3156 = vmatmul.mubr.msk.f32.vlgmr.msra.gmra.mrb[20].mxu1 %vm310_vm1, %v2955_v44 }
0x1c1e   :  { %v3040_v10 = vpop.f32.mrb[20].mxu1 }
0x1c1f   :  { %v3041_v28 = vadd.f32 %v3128_v56, %v3040_v10  ;;  %v3157_v13 = vpop.f32.mrb[21].mxu1 }
0x1c21   :  { %3044 = vst [vmem:[#allocation14] sm:$0xff] %v3041_v28 }
0x1c22   :  { %4288 = shalt.err (!%p4285_p10)
}
0x1c23   :  { %s4289_s1 = scalar_lea.hbm %s5246_s10, 128 }
0x1c24   :  { %p4290_p11 = scmp.ne.s32.totalorder %s5246_s10, %s4289_s1  ;;  %p4293_p12 = scmp.lt.u32.totalorder %s4289_s1, %s5246_s10 }
0x1c26   :  { %p4295_p13 = pnand %p4293_p12, %p4290_p11 }
0x1c28   :  { %4298 = shalt.err (!%p4295_p13)
}
0x1c29   :  { %3054 = dma.vmem_to_hbm [thread:$0]  %s3052_s30, 128, %s5246_s10, [#allocation5]  }
0x1c2a   :  { %4307 = dma.done.wait [#allocation5], 128  }
0x1c2b   :  { %4308 = vsyncadd [#allocation5], 4294967168 }
0x1c2c   :  { %3058 = vsyncpa [#allocation4], 1 }
0x1c2d   :  { %3059 = vsyncpa [#allocation7], 1 }
0x1c2e   :  { %3060 = vsyncpa [#allocation10], 1 }
0x1c2f   :  { %3061 = vsyncpa [#allocation13], 1 }
0x1c30   :  { %3062 = vsyncpa [#allocation5], 1 }

</bundles_post_ra>
